<compile_context>
chip_gen: v7x
topology: tpu7x:2x2x1
jax: 0.10.0
libtpu: 0.0.40
codegen_flags: <defaults>
</compile_context>

<pallas_src>
import numpy as np
import jax
import jax.numpy as jnp
from jax.experimental import pallas as pl
from jax.experimental.pallas import tpu as pltpu

BN_EPS = 1e-5


# ---------------------------------------------------------------------------
# Fused DecoderBlock kernel (one grid step per batch element)
# ---------------------------------------------------------------------------
def _decoder_kernel(x_ref, u_ref, w1_ref, b1_ref, w2_ref, b2_ref,
                    w3_ref, b3_ref, o_ref):
    x = x_ref[0]                                                   # (H*W, Cin) bf16

    # conv_block1: 1x1 conv + BN(eval) + ReLU   (BN scale folded into w1/b1)
    t = jnp.dot(x, w1_ref[...], preferred_element_type=jnp.float32)
    t = jnp.maximum(t + b1_ref[...], 0.0).astype(jnp.bfloat16)     # (H*W, C4)

    # deconv_block: 2x bilinear upsample (align_corners=True) expressed as a
    # single fused (Ho*Wo, H*W) interpolation matmul, then 1x1 conv + BN + ReLU
    u = jnp.dot(u_ref[...], t,
                preferred_element_type=jnp.float32).astype(jnp.bfloat16)  # (Ho*Wo, C4)
    t = jnp.dot(u, w2_ref[...], preferred_element_type=jnp.float32)
    t = jnp.maximum(t + b2_ref[...], 0.0).astype(jnp.bfloat16)     # (Ho*Wo, C4)

    # conv_block2: 1x1 conv + BN(eval) + ReLU
    t = jnp.dot(t, w3_ref[...], preferred_element_type=jnp.float32)
    t = jnp.maximum(t + b3_ref[...], 0.0)                          # (Ho*Wo, Cout)

    o_ref[0] = t.astype(o_ref.dtype)


# ---------------------------------------------------------------------------
# Bilinear (align_corners=True) 1-D interpolation matrix, built on host
# ---------------------------------------------------------------------------
def _interp_matrix(n_in, n_out):
    if n_in == 1:
        return np.ones((n_out, 1), np.float32)
    src = np.arange(n_out, dtype=np.float64) * (n_in - 1) / (n_out - 1)
    i0 = np.clip(np.floor(src).astype(np.int64), 0, n_in - 2)
    frac = (src - i0).astype(np.float32)
    A = np.zeros((n_out, n_in), np.float32)
    A[np.arange(n_out), i0] = 1.0 - frac
    A[np.arange(n_out), i0 + 1] = frac
    return A


# ---------------------------------------------------------------------------
# Wrapper: NCHW in / NCHW out, matches DecoderBlock.forward(x1, x2)
# ---------------------------------------------------------------------------
def decoder_block(x1_nchw, x2_nchw, params):
    # x2 (low-level features) is never read in the reference forward().
    del x2_nchw

    N, Cin, H, W = x1_nchw.shape
    C4 = Cin // 4
    Cout = params["w3"].shape[1]
    Ho, Wo = 2 * H, 2 * W

    # BN eval-mode affine with fresh running stats: y = (conv + bias) * s_bn
    s_bn = 1.0 / np.sqrt(1.0 + BN_EPS)
    # TODO(synk): BN scale/shift assume freshly-initialized running stats
    # (mean=0, var=1, gamma=1, beta=0); parameterize if trained stats are loaded.

    # NCHW -> (N, H*W, Cin) bf16 slab (channels in the lane dimension)
    x = jnp.transpose(x1_nchw, (0, 2, 3, 1)).reshape(N, H * W, Cin)
    x = x.astype(jnp.bfloat16)

    # Fused 2-D bilinear interpolation matrix: (Ho*Wo, H*W)
    U = np.kron(_interp_matrix(H, Ho), _interp_matrix(W, Wo))
    U = jnp.asarray(U, jnp.bfloat16)

    # Fold the BN scale into weights and biases (done in f32, then cast).
    w1 = (params["w1"] * s_bn).astype(jnp.bfloat16)
    w2 = (params["w2"] * s_bn).astype(jnp.bfloat16)
    w3 = (params["w3"] * s_bn).astype(jnp.bfloat16)
    b1 = (params["b1"] * s_bn).reshape(1, C4).astype(jnp.float32)
    b2 = (params["b2"] * s_bn).reshape(1, C4).astype(jnp.float32)
    b3 = (params["b3"] * s_bn).reshape(1, Cout).astype(jnp.float32)

    out = pl.pallas_call(
        _decoder_kernel,
        out_shape=jax.ShapeDtypeStruct((N, Ho * Wo, Cout), jnp.float32),
        grid_spec=pltpu.PrefetchScalarGridSpec(
            num_scalar_prefetch=0,
            grid=(N,),
            in_specs=[
                pl.BlockSpec((1, H * W, Cin), lambda n: (n, 0, 0)),   # x (per batch)
                pl.BlockSpec((Ho * Wo, H * W), lambda n: (0, 0)),     # interp matrix
                pl.BlockSpec((Cin, C4), lambda n: (0, 0)),            # w1
                pl.BlockSpec((1, C4), lambda n: (0, 0)),              # b1
                pl.BlockSpec((C4, C4), lambda n: (0, 0)),             # w2
                pl.BlockSpec((1, C4), lambda n: (0, 0)),              # b2
                pl.BlockSpec((C4, Cout), lambda n: (0, 0)),           # w3
                pl.BlockSpec((1, Cout), lambda n: (0, 0)),            # b3
            ],
            out_specs=pl.BlockSpec((1, Ho * Wo, Cout), lambda n: (n, 0, 0)),
        ),
        compiler_params=pltpu.CompilerParams(
            dimension_semantics=("parallel",),       # both TCs on v7x get a batch elem
            vmem_limit_bytes=32 * 1024 * 1024,       # safe on v5e/v6e/v7x
        ),
    )(x, U, w1, b1, w2, b2, w3, b3)

    out = out.reshape(N, Ho, Wo, Cout)
    return jnp.transpose(out, (0, 3, 1, 2))          # back to NCHW


# ---------------------------------------------------------------------------
# Pure-JAX reference (f32) for a numerical sanity check
# ---------------------------------------------------------------------------
def decoder_block_ref(x1_nchw, params):
    s_bn = 1.0 / np.sqrt(1.0 + BN_EPS)
    x = jnp.transpose(x1_nchw, (0, 2, 3, 1))                        # NHWC

    def cbr(x, w, b):
        y = (jnp.einsum('nhwc,cd->nhwd', x, w) + b) * s_bn
        return jnp.maximum(y, 0.0)

    t = cbr(x, params["w1"], params["b1"])
    N, H, W, C = t.shape
    Ah = jnp.asarray(_interp_matrix(H, 2 * H))
    Aw = jnp.asarray(_interp_matrix(W, 2 * W))
    t = jnp.einsum('oh,nhwc->nowc', Ah, t)
    t = jnp.einsum('pw,nowc->nopc', Aw, t)
    t = cbr(t, params["w2"], params["b2"])
    t = cbr(t, params["w3"], params["b3"])
    return jnp.transpose(t, (0, 3, 1, 2))


# ---------------------------------------------------------------------------
# Deterministic parameters (PyTorch Conv2d default-style init; 1x1 kernels are
# stored as (Cin, Cout) matrices: W = torch_weight[:, :, 0, 0].T)
# ---------------------------------------------------------------------------
def make_params(key, in_channels, out_channels):
    c4 = in_channels // 4
    ks = jax.random.split(key, 6)

    def conv(kw, kb, cin, cout):
        bound = 1.0 / np.sqrt(cin)          # fan_in = cin for a 1x1 conv
        w = jax.random.uniform(kw, (cin, cout), jnp.float32, -bound, bound)
        b = jax.random.uniform(kb, (cout,), jnp.float32, -bound, bound)
        return w, b

    w1, b1 = conv(ks[0], ks[1], in_channels, c4)
    w2, b2 = conv(ks[2], ks[3], c4, c4)
    w3, b3 = conv(ks[4], ks[5], c4, out_channels)
    return {"w1": w1, "b1": b1, "w2": w2, "b2": b2, "w3": w3, "b3": b3}


if __name__ == "__main__":
    IN_CH, OUT_CH = 512, 256        # -> C4 = 128; all matmul lanes are 128-dense
    N, H, W = 2, 16, 16

    key = jax.random.PRNGKey(0)
    kp, k1, k2 = jax.random.split(key, 3)
    params = make_params(kp, IN_CH, OUT_CH)

    # PyTorch-convention NCHW inputs.
    x1 = jax.random.normal(k1, (N, IN_CH, H, W), jnp.float32)              # high-level
    x2 = jax.random.normal(k2, (N, IN_CH // 2, 2 * H, 2 * W), jnp.float32)  # low-level (unused)

    out = decoder_block(x1, x2, params)
    out = jax.block_until_ready(out)

    assert out.shape == (N, OUT_CH, 2 * H, 2 * W), out.shape
    assert bool(jnp.all(jnp.isfinite(out)))

    # Loose numerical check vs. f32 reference (kernel computes in bf16).
    ref = jax.block_until_ready(decoder_block_ref(x1, params))
    err = jnp.max(jnp.abs(out - ref)) / (jnp.max(jnp.abs(ref)) + 1e-6)
    assert float(err) < 0.1, float(err)

    print("KERNEL_OK")
</pallas_src>

<mosaic_0001>
module attributes {stable_mosaic.version = 11 : i64} {
  func.func @_decoder_kernel(%arg0: i32, %arg1: memref<1x256x512xbf16, #tpu.memory_space<vmem>>, %arg2: memref<1024x256xbf16, #tpu.memory_space<vmem>>, %arg3: memref<512x128xbf16, #tpu.memory_space<vmem>>, %arg4: memref<1x128xf32, #tpu.memory_space<vmem>>, %arg5: memref<128x128xbf16, #tpu.memory_space<vmem>>, %arg6: memref<1x128xf32, #tpu.memory_space<vmem>>, %arg7: memref<128x256xbf16, #tpu.memory_space<vmem>>, %arg8: memref<1x256xf32, #tpu.memory_space<vmem>>, %arg9: memref<1x1024x256xf32, #tpu.memory_space<vmem>>) attributes {dimension_semantics = [#tpu.dimension_semantics<parallel>], iteration_bounds = array<i64: 2>, scalar_prefetch = 0 : i64, scratch_operands = 0 : i64, tpu.core_type = #tpu.core_type<tc>, window_params = [{transform_indices = @transform_0, window_bounds = array<i64: 1, 256, 512>}, {pipeline_mode = #tpu.pipeline_mode<synchronous>, transform_indices = @transform_1, window_bounds = array<i64: 1024, 256>}, {pipeline_mode = #tpu.pipeline_mode<synchronous>, transform_indices = @transform_2, window_bounds = array<i64: 512, 128>}, {pipeline_mode = #tpu.pipeline_mode<synchronous>, transform_indices = @transform_3, window_bounds = array<i64: 1, 128>}, {pipeline_mode = #tpu.pipeline_mode<synchronous>, transform_indices = @transform_4, window_bounds = array<i64: 128, 128>}, {pipeline_mode = #tpu.pipeline_mode<synchronous>, transform_indices = @transform_5, window_bounds = array<i64: 1, 128>}, {pipeline_mode = #tpu.pipeline_mode<synchronous>, transform_indices = @transform_6, window_bounds = array<i64: 128, 256>}, {pipeline_mode = #tpu.pipeline_mode<synchronous>, transform_indices = @transform_7, window_bounds = array<i64: 1, 256>}, {transform_indices = @transform_8, window_bounds = array<i64: 1, 1024, 256>}]} {
    %c0 = arith.constant 0 : index
    %c0_0 = arith.constant 0 : index
    %c0_1 = arith.constant 0 : index
    %0 = vector.load %arg1[%c0, %c0_0, %c0_1] : memref<1x256x512xbf16, #tpu.memory_space<vmem>>, vector<1x256x512xbf16>
    %1 = vector.shape_cast %0 : vector<1x256x512xbf16> to vector<256x512xbf16>
    %c0_2 = arith.constant 0 : index
    %c0_3 = arith.constant 0 : index
    %2 = vector.load %arg3[%c0_2, %c0_3] : memref<512x128xbf16, #tpu.memory_space<vmem>>, vector<512x128xbf16>
    %cst = arith.constant dense<0.000000e+00> : vector<256x128xf32>
    %3 = tpu.matmul %1, %2, %cst {dimension_numbers = #tpu.dot_dimension_numbers<[1], [0], [0], [1], [0, 0, 1, 1], [], []>} : vector<256x512xbf16>, vector<512x128xbf16>, vector<256x128xf32> -> vector<256x128xf32>
    %c0_4 = arith.constant 0 : index
    %c0_5 = arith.constant 0 : index
    %4 = vector.load %arg4[%c0_4, %c0_5] : memref<1x128xf32, #tpu.memory_space<vmem>>, vector<1x128xf32>
    %5 = vector.broadcast %4 : vector<1x128xf32> to vector<256x128xf32>
    %6 = arith.addf %3, %5 : vector<256x128xf32>
    %cst_6 = arith.constant 0.000000e+00 : f32
    %7 = vector.broadcast %cst_6 : f32 to vector<256x128xf32>
    %8 = arith.maximumf %6, %7 : vector<256x128xf32>
    %9 = arith.truncf %8 : vector<256x128xf32> to vector<256x128xbf16>
    %c0_7 = arith.constant 0 : index
    %c0_8 = arith.constant 0 : index
    %10 = vector.load %arg2[%c0_7, %c0_8] : memref<1024x256xbf16, #tpu.memory_space<vmem>>, vector<1024x256xbf16>
    %cst_9 = arith.constant dense<0.000000e+00> : vector<1024x128xf32>
    %11 = tpu.matmul %10, %9, %cst_9 {dimension_numbers = #tpu.dot_dimension_numbers<[1], [0], [0], [1], [0, 0, 1, 1], [], []>} : vector<1024x256xbf16>, vector<256x128xbf16>, vector<1024x128xf32> -> vector<1024x128xf32>
    %12 = arith.truncf %11 : vector<1024x128xf32> to vector<1024x128xbf16>
    %c0_10 = arith.constant 0 : index
    %c0_11 = arith.constant 0 : index
    %13 = vector.load %arg5[%c0_10, %c0_11] : memref<128x128xbf16, #tpu.memory_space<vmem>>, vector<128x128xbf16>
    %cst_12 = arith.constant dense<0.000000e+00> : vector<1024x128xf32>
    %14 = tpu.matmul %12, %13, %cst_12 {dimension_numbers = #tpu.dot_dimension_numbers<[1], [0], [0], [1], [0, 0, 1, 1], [], []>} : vector<1024x128xbf16>, vector<128x128xbf16>, vector<1024x128xf32> -> vector<1024x128xf32>
    %c0_13 = arith.constant 0 : index
    %c0_14 = arith.constant 0 : index
    %15 = vector.load %arg6[%c0_13, %c0_14] : memref<1x128xf32, #tpu.memory_space<vmem>>, vector<1x128xf32>
    %16 = vector.broadcast %15 : vector<1x128xf32> to vector<1024x128xf32>
    %17 = arith.addf %14, %16 : vector<1024x128xf32>
    %cst_15 = arith.constant 0.000000e+00 : f32
    %18 = vector.broadcast %cst_15 : f32 to vector<1024x128xf32>
    %19 = arith.maximumf %17, %18 : vector<1024x128xf32>
    %20 = arith.truncf %19 : vector<1024x128xf32> to vector<1024x128xbf16>
    %c0_16 = arith.constant 0 : index
    %c0_17 = arith.constant 0 : index
    %21 = vector.load %arg7[%c0_16, %c0_17] : memref<128x256xbf16, #tpu.memory_space<vmem>>, vector<128x256xbf16>
    %cst_18 = arith.constant dense<0.000000e+00> : vector<1024x256xf32>
    %22 = tpu.matmul %20, %21, %cst_18 {dimension_numbers = #tpu.dot_dimension_numbers<[1], [0], [0], [1], [0, 0, 1, 1], [], []>} : vector<1024x128xbf16>, vector<128x256xbf16>, vector<1024x256xf32> -> vector<1024x256xf32>
    %c0_19 = arith.constant 0 : index
    %c0_20 = arith.constant 0 : index
    %23 = vector.load %arg8[%c0_19, %c0_20] : memref<1x256xf32, #tpu.memory_space<vmem>>, vector<1x256xf32>
    %24 = vector.broadcast %23 : vector<1x256xf32> to vector<1024x256xf32>
    %25 = arith.addf %22, %24 : vector<1024x256xf32>
    %cst_21 = arith.constant 0.000000e+00 : f32
    %26 = vector.broadcast %cst_21 : f32 to vector<1024x256xf32>
    %27 = arith.maximumf %25, %26 : vector<1024x256xf32>
    %c0_22 = arith.constant 0 : index
    %c0_23 = arith.constant 0 : index
    %c0_24 = arith.constant 0 : index
    %28 = vector.load %arg9[%c0_22, %c0_23, %c0_24] : memref<1x1024x256xf32, #tpu.memory_space<vmem>>, vector<1x1024x256xf32>
    %29 = vector.shape_cast %28 : vector<1x1024x256xf32> to vector<1024x256xf32>
    %30 = vector.shape_cast %27 : vector<1024x256xf32> to vector<1x1024x256xf32>
    tpu.vector_store %arg9[%c0_22, %c0_23, %c0_24], %30 {strides = array<i32>} : memref<1x1024x256xf32, #tpu.memory_space<vmem>>, vector<1x1024x256xf32>,
    return
  }
  func.func @transform_0(%arg0: i32) -> (i32, i32, i32) {
    %c0_i32 = arith.constant 0 : i32
    %c0_i32_0 = arith.constant 0 : i32
    %c0_i32_1 = arith.constant 0 : i32
    return %arg0, %c0_i32, %c0_i32_0 : i32, i32, i32
  }
  func.func @transform_1(%arg0: i32) -> (i32, i32) {
    %c0_i32 = arith.constant 0 : i32
    %c0_i32_0 = arith.constant 0 : i32
    %c0_i32_1 = arith.constant 0 : i32
    return %c0_i32, %c0_i32_0 : i32, i32
  }
  func.func @transform_2(%arg0: i32) -> (i32, i32) {
    %c0_i32 = arith.constant 0 : i32
    %c0_i32_0 = arith.constant 0 : i32
    %c0_i32_1 = arith.constant 0 : i32
    return %c0_i32, %c0_i32_0 : i32, i32
  }
  func.func @transform_3(%arg0: i32) -> (i32, i32) {
    %c0_i32 = arith.constant 0 : i32
    %c0_i32_0 = arith.constant 0 : i32
    %c0_i32_1 = arith.constant 0 : i32
    return %c0_i32, %c0_i32_0 : i32, i32
  }
  func.func @transform_4(%arg0: i32) -> (i32, i32) {
    %c0_i32 = arith.constant 0 : i32
    %c0_i32_0 = arith.constant 0 : i32
    %c0_i32_1 = arith.constant 0 : i32
    return %c0_i32, %c0_i32_0 : i32, i32
  }
  func.func @transform_5(%arg0: i32) -> (i32, i32) {
    %c0_i32 = arith.constant 0 : i32
    %c0_i32_0 = arith.constant 0 : i32
    %c0_i32_1 = arith.constant 0 : i32
    return %c0_i32, %c0_i32_0 : i32, i32
  }
  func.func @transform_6(%arg0: i32) -> (i32, i32) {
    %c0_i32 = arith.constant 0 : i32
    %c0_i32_0 = arith.constant 0 : i32
    %c0_i32_1 = arith.constant 0 : i32
    return %c0_i32, %c0_i32_0 : i32, i32
  }
  func.func @transform_7(%arg0: i32) -> (i32, i32) {
    %c0_i32 = arith.constant 0 : i32
    %c0_i32_0 = arith.constant 0 : i32
    %c0_i32_1 = arith.constant 0 : i32
    return %c0_i32, %c0_i32_0 : i32, i32
  }
  func.func @transform_8(%arg0: i32) -> (i32, i32, i32) {
    %c0_i32 = arith.constant 0 : i32
    %c0_i32_0 = arith.constant 0 : i32
    %c0_i32_1 = arith.constant 0 : i32
    return %arg0, %c0_i32, %c0_i32_0 : i32, i32, i32
  }
}

</mosaic_0001>

<bundles_post_ra>
// kernel: tpu_custom_call.1
= control target key start
LH: loop header
LB: loop body
LE: loop exit
PB: predicated region body
PF: predicated region fallthrough
CT: control target
= control target key end

     0   :  { %13 = vsyncpa [#allocation3], 0  ;;  %s8118_s0 = inlined_call_operand.hbm [shape: bf16[2,256,512], index: 0, kind: input, shape index: {}]   ;;  %s8119_s1 = inlined_call_operand.hbm [shape: bf16[1024,256], index: 1, kind: input, shape index: {}]   ;;  %s8120_s2 = inlined_call_operand.hbm [shape: bf16[512,128], index: 2, kind: input, shape index: {}]   ;;  %s8121_s3 = inlined_call_operand.hbm [shape: f32[1,128], index: 3, kind: input, shape index: {}]   ;;  %s8122_s4 = inlined_call_operand.hbm [shape: bf16[128,128], index: 4, kind: input, shape index: {}]   ;;  %s8123_s5 = inlined_call_operand.hbm [shape: f32[1,128], index: 5, kind: input, shape index: {}]   ;;  %s8124_s6 = inlined_call_operand.hbm [shape: bf16[128,256], index: 6, kind: input, shape index: {}]   ;;  %s8125_s7 = inlined_call_operand.hbm [shape: f32[1,256], index: 7, kind: input, shape index: {}]   ;;  %s8126_s8 = inlined_call_operand.hbm [shape: f32[2,1024,256], index: 8, kind: output, shape index: {}]  }
   0x1   :  { %15 = vsyncpa [#allocation3 + $0x1], 0 }
   0x2   :  { %16 = vsyncpa [#allocation6], 0 }
   0x3   :  { %17 = vsyncpa [#allocation9], 0 }
   0x4   :  { %18 = vsyncpa [#allocation12], 0 }
   0x5   :  { %19 = vsyncpa [#allocation15], 0 }
   0x6   :  { %20 = vsyncpa [#allocation4], 0 }
   0x7   :  { %22 = vsyncpa [#allocation4 + $0x1], 0  ;;  %s6642_s27 = smov 0   ;;  %s6644_s28 = smov 0  }
   0x8   :  { %s6646_s29 = smov 0   ;;  %s6648_s30 = smov 0  }
   0x9 LB: > { %s6579_s9 = smov [#allocation5]   ;;  %s6663_s11 = sadd.s32 4294967295, %s6577_s30   ;;  %s6577_s30 = sphi %s6648_s30, %s8157_s30   ;;  %s6573_s29 = sphi %s6646_s29, %s8156_s29   ;;  %s6569_s28 = sphi %s6644_s28, %s8155_s28   ;;  %s6565_s27 = sphi %s6642_s27, %s8154_s27  }
   0xa   : > { %s244_s10 = sshll.u32 %s6579_s9, 4  ;;  %p5071_p0 = scmp.ge.s32.totalorder %s6577_s30, 1  ;;  %s6668_s10 = int_to_ptr.vmem [resolvable:$true] %s244_s10 }
   0xb   : > { %p8127_p1 = scmp.eq.s32.totalorder %s6663_s11, 0  ;;  %p232_p2 = scmp.lt.s32.totalorder %s6577_s30, 3 }
   0xc   : > { %s6580_s13 = smov [#allocation8]   ;;  %s6581_s16 = smov [#allocation11]  }
   0xd   : > { %p6670_p3 = pnand %p5071_p0, %p232_p2  ;;  %s271_s14 = sshll.u32 %s6580_s13, 4  ;;  %s6683_s14 = int_to_ptr.vmem [resolvable:$true] %s271_s14 }
   0xe   : > { %s295_s17 = sshll.u32 %s6581_s16, 4  ;;  %s6269_s20 = scalar_lea.hbm %s8119_s1, 16384  ;;  %s6685_s17 = int_to_ptr.vmem [resolvable:$true] %s295_s17 }
   0xf   : > { %s8132_s12 = scalar_select %p6670_p3, 1, 0 }
  0x10   : > { %p5822_p5 = pneg %p6670_p3  ;;  %p6270_p7 = scmp.ne.s32.totalorder %s8119_s1, %s6269_s20 }
  0x11   : > { %p6276_p11 = scmp.lt.u32.totalorder %s6269_s20, %s8119_s1 }
  0x12   : > { %p6679_p6 = pnand %p5822_p5, %p8127_p1 }
  0x14   : > { %p6695_p8 = pneg %p6679_p6 }
  0x16   : > { %p6272_p9 = pnand %p6695_p8, %p6270_p7 }
  0x18   : > { %p6273_p10 = pneg %p6272_p9 }
  0x1a   : > { %p6278_p12 = pnand %p6276_p11, %p6273_p10 }
  0x1c   : > { %6281 = shalt.err (!%p6278_p12)
}
  0x1d   : > { %s6282_s26 = scalar_lea.vmem %s6668_s10, 16384  ;;  %p6290_p5 = scmp.lt.s32.totalorder %s6668_s10, %s6668_s10 }
  0x1e   : > { %p6283_p13 = scmp.ne.s32.totalorder %s6668_s10, %s6282_s26  ;;  %p6291_p4 = scmp.lt.s32.totalorder %s6282_s26, %s6282_s26 }
  0x20   : > { %p6285_p0 = pnand %p6283_p13, %p6695_p8  ;;  %p6292_p7 = por %p6291_p4, %p6290_p5 }
  0x22   : > { %p6286_p2 = pneg %p6285_p0 }
  0x24   : > { %p6293_p9 = pnand %p6292_p7, %p6286_p2 }
  0x26   : > { %6296 = shalt.err (!%p6293_p9)
}
  0x27   : > { %s8129_s9 = smov 128   ;;  %s8130_s13 = smov 8  }
  0x28   : > { %5825 = dma.hbm_to_vmem [thread:$0]  (!%p6679_p6), %s8119_s1, 16384, %s6668_s10, [#allocation6], %s8129_s9, %s8129_s9, %s8130_s13  }
  0x29   : > { %s6297_s21 = scalar_lea.hbm %s8121_s3, 16 }
  0x2a   : > { %p6298_p4 = scmp.ne.s32.totalorder %s8121_s3, %s6297_s21  ;;  %p6304_p12 = scmp.lt.u32.totalorder %s6297_s21, %s8121_s3 }
  0x2c   : > { %p6300_p10 = pnand %p6298_p4, %p6695_p8 }
  0x2e   : > { %p6301_p11 = pneg %p6300_p10 }
  0x30   : > { %p6306_p13 = pnand %p6304_p12, %p6301_p11 }
  0x32   : > { %6309 = shalt.err (!%p6306_p13)
}
  0x33   : > { %s6310_s10 = scalar_lea.vmem %s6683_s14, 16  ;;  %s6317_s16 = scalar_lea.vmem %s6683_s14, 32 }
  0x34   : > { %p6311_p0 = scmp.ne.s32.totalorder %s6683_s14, %s6310_s10  ;;  %p6318_p7 = scmp.lt.s32.totalorder %s6683_s14, %s6683_s14 }
  0x35   : > { %p6319_p9 = scmp.lt.s32.totalorder %s6317_s16, %s6310_s10 }
  0x36   : > { %p6313_p2 = pnand %p6311_p0, %p6695_p8 }
  0x37   : > { %p6320_p4 = por %p6319_p9, %p6318_p7 }
  0x38   : > { %p6314_p5 = pneg %p6313_p2 }
  0x3a   : > { %p6321_p10 = pnand %p6320_p4, %p6314_p5 }
  0x3c   : > { %6324 = shalt.err (!%p6321_p10)
}
  0x3d   : > { %5831 = dma.hbm_to_vmem [thread:$0]  (!%p6679_p6), %s8121_s3, 16, %s6683_s14, [#allocation9]  }
  0x3e   : > { %s6325_s22 = scalar_lea.hbm %s8123_s5, 16 }
  0x3f   : > { %p6326_p11 = scmp.ne.s32.totalorder %s8123_s5, %s6325_s22  ;;  %p6332_p0 = scmp.lt.u32.totalorder %s6325_s22, %s8123_s5 }
  0x41   : > { %p6328_p12 = pnand %p6326_p11, %p6695_p8 }
  0x43   : > { %p6329_p13 = pneg %p6328_p12 }
  0x45   : > { %p6334_p2 = pnand %p6332_p0, %p6329_p13 }
  0x47   : > { %6337 = shalt.err (!%p6334_p2)
}
  0x48   : > { %s6338_s14 = scalar_lea.vmem %s6685_s17, 16  ;;  %s6345_s16 = scalar_lea.vmem %s6685_s17, 32 }
  0x49   : > { %p6339_p5 = scmp.ne.s32.totalorder %s6685_s17, %s6338_s14  ;;  %p6346_p4 = scmp.lt.s32.totalorder %s6685_s17, %s6685_s17 }
  0x4a   : > { %p6347_p10 = scmp.lt.s32.totalorder %s6345_s16, %s6338_s14 }
  0x4b   : > { %p6341_p7 = pnand %p6339_p5, %p6695_p8 }
  0x4c   : > { %p6348_p11 = por %p6347_p10, %p6346_p4 }
  0x4d   : > { %p6342_p9 = pneg %p6341_p7 }
  0x4f   : > { %p6349_p12 = pnand %p6348_p11, %p6342_p9 }
  0x51   : > { %6352 = shalt.err (!%p6349_p12)
}
  0x52   : > { %5837 = dma.hbm_to_vmem [thread:$0]  (!%p6679_p6), %s8123_s5, 16, %s6685_s17, [#allocation12]  }
  0x53   : > { %s6584_s20 = smov [#allocation7]   ;;  %s6353_s25 = scalar_lea.hbm %s8120_s2, 4096 }
  0x54   : > { %s257_s21 = sshll.u32 %s6584_s20, 4  ;;  %p6354_p13 = scmp.ne.s32.totalorder %s8120_s2, %s6353_s25  ;;  %s258_s21 = int_to_ptr.vmem [resolvable:$true] %s257_s21 }
  0x55   : > { %p6360_p5 = scmp.lt.u32.totalorder %s6353_s25, %s8120_s2 }
  0x56   : > { %p6356_p0 = pnand %p6354_p13, %p6695_p8 }
  0x58   : > { %p6357_p2 = pneg %p6356_p0 }
  0x5a   : > { %p6362_p7 = pnand %p6360_p5, %p6357_p2 }
  0x5c   : > { %6365 = shalt.err (!%p6362_p7)
}
  0x5d   : > { %s6366_s17 = scalar_lea.vmem %s258_s21, 4096  ;;  %p6374_p11 = scmp.lt.s32.totalorder %s258_s21, %s258_s21 }
  0x5e   : > { %p6367_p9 = scmp.ne.s32.totalorder %s258_s21, %s6366_s17  ;;  %p6375_p12 = scmp.lt.s32.totalorder %s6366_s17, %s6366_s17 }
  0x60   : > { %p6369_p4 = pnand %p6367_p9, %p6695_p8  ;;  %p6376_p1 = por %p6375_p12, %p6374_p11 }
  0x62   : > { %p6370_p10 = pneg %p6369_p4 }
  0x64   : > { %p6377_p3 = pnand %p6376_p1, %p6370_p10 }
  0x66   : > { %6380 = shalt.err (!%p6377_p3)
}
  0x67   : > { %s6585_s18 = smov 64   ;;  %s6586_s19 = smov 4  }
  0x68   : > { %5828 = dma.hbm_to_vmem [thread:$0]  (!%p6679_p6), %s8120_s2, 4096, %s258_s21, [#allocation6], %s6585_s18, %s6585_s18, %s6586_s19  }
  0x69   : > { %s6587_s24 = smov [#allocation10]   ;;  %s6588_s26 = smov [#allocation13]  }
  0x6a   : > { %s281_s25 = sshll.u32 %s6587_s24, 4  ;;  %s305_s10 = sshll.u32 %s6588_s26, 4  ;;  %s282_s25 = int_to_ptr.vmem [resolvable:$true] %s281_s25  ;;  %s6785_s10 = int_to_ptr.vmem [resolvable:$true] %s305_s10 }
  0x6b   : > { %s6381_s17 = scalar_lea.hbm %s8122_s4, 1024 }
  0x6c   : > { %p6382_p1 = scmp.ne.s32.totalorder %s8122_s4, %s6381_s17  ;;  %p6388_p0 = scmp.lt.u32.totalorder %s6381_s17, %s8122_s4 }
  0x6e   : > { %p6384_p3 = pnand %p6382_p1, %p6695_p8 }
  0x70   : > { %p6385_p13 = pneg %p6384_p3 }
  0x72   : > { %p6390_p2 = pnand %p6388_p0, %p6385_p13 }
  0x74   : > { %6393 = shalt.err (!%p6390_p2)
}
  0x75   : > { %s6394_s22 = scalar_lea.vmem %s282_s25, 1024  ;;  %p6402_p4 = scmp.lt.s32.totalorder %s282_s25, %s282_s25 }
  0x76   : > { %p6395_p5 = scmp.ne.s32.totalorder %s282_s25, %s6394_s22  ;;  %p6403_p10 = scmp.lt.s32.totalorder %s6394_s22, %s6394_s22 }
  0x78   : > { %p6397_p7 = pnand %p6395_p5, %p6695_p8  ;;  %p6404_p11 = por %p6403_p10, %p6402_p4 }
  0x7a   : > { %p6398_p9 = pneg %p6397_p7 }
  0x7c   : > { %p6405_p12 = pnand %p6404_p11, %p6398_p9 }
  0x7e   : > { %6408 = shalt.err (!%p6405_p12)
}
  0x7f   : > { %5834 = dma.hbm_to_vmem [thread:$0]  (!%p6679_p6), %s8122_s4, 1024, %s282_s25, [#allocation9], %s6585_s18, %s6585_s18, %s6586_s19  }
  0x80   : > { %s6409_s14 = scalar_lea.hbm %s8124_s6, 2048 }
  0x81   : > { %p6410_p1 = scmp.ne.s32.totalorder %s8124_s6, %s6409_s14  ;;  %p6416_p0 = scmp.lt.u32.totalorder %s6409_s14, %s8124_s6 }
  0x83   : > { %p6412_p3 = pnand %p6410_p1, %p6695_p8 }
  0x85   : > { %p6413_p13 = pneg %p6412_p3 }
  0x87   : > { %p6418_p2 = pnand %p6416_p0, %p6413_p13 }
  0x89   : > { %6421 = shalt.err (!%p6418_p2)
}
  0x8a   : > { %s6422_s18 = scalar_lea.vmem %s6785_s10, 2048  ;;  %p6430_p4 = scmp.lt.s32.totalorder %s6785_s10, %s6785_s10 }
  0x8b   : > { %p6423_p5 = scmp.ne.s32.totalorder %s6785_s10, %s6422_s18  ;;  %p6431_p10 = scmp.lt.s32.totalorder %s6422_s18, %s6422_s18 }
  0x8d   : > { %p6425_p7 = pnand %p6423_p5, %p6695_p8  ;;  %p6432_p11 = por %p6431_p10, %p6430_p4 }
  0x8f   : > { %p6426_p9 = pneg %p6425_p7 }
  0x91   : > { %p6433_p12 = pnand %p6432_p11, %p6426_p9 }
  0x93   : > { %6436 = shalt.err (!%p6433_p12)
}
  0x94   : > { %s8135_s19 = smov 8   ;;  %s8136_s25 = smov 128  }
  0x95   : > { %5840 = dma.hbm_to_vmem [thread:$0]  (!%p6679_p6), %s8124_s6, 2048, %s6785_s10, [#allocation12], %s8136_s25, %s8136_s25, %s8135_s19  }
  0x96   : > { %s6589_s13 = smov [#allocation14]   ;;  %s6437_s16 = scalar_lea.hbm %s8125_s7, 32 }
  0x97   : > { %s319_s24 = sshll.u32 %s6589_s13, 4  ;;  %p6438_p1 = scmp.ne.s32.totalorder %s8125_s7, %s6437_s16  ;;  %s320_s24 = int_to_ptr.vmem [resolvable:$true] %s319_s24 }
  0x98   : > { %p6444_p0 = scmp.lt.u32.totalorder %s6437_s16, %s8125_s7 }
  0x99   : > { %p6440_p3 = pnand %p6438_p1, %p6695_p8 }
  0x9b   : > { %p6441_p13 = pneg %p6440_p3 }
  0x9d   : > { %p6446_p2 = pnand %p6444_p0, %p6441_p13 }
  0x9f   : > { %6449 = shalt.err (!%p6446_p2)
}
  0xa0   : > { %s6450_s10 = scalar_lea.vmem %s320_s24, 32  ;;  %p6458_p4 = scmp.lt.s32.totalorder %s320_s24, %s320_s24 }
  0xa1   : > { %p6451_p5 = scmp.ne.s32.totalorder %s320_s24, %s6450_s10  ;;  %p6459_p10 = scmp.lt.s32.totalorder %s6450_s10, %s6450_s10 }
  0xa3   : > { %p6453_p7 = pnand %p6451_p5, %p6695_p8  ;;  %p6460_p11 = por %p6459_p10, %p6458_p4 }
  0xa5   : > { %p6454_p9 = pneg %p6453_p7 }
  0xa7   : > { %p6461_p12 = pnand %p6460_p11, %p6454_p9 }
  0xa9   : > { %6464 = shalt.err (!%p6461_p12)
}
  0xaa   : > { %5843 = dma.hbm_to_vmem [thread:$0]  (!%p6679_p6), %s8125_s7, 32, %s320_s24, [#allocation15]  }
  0xab   : > { %s5070_s23 = sadd.s32 4294967294, %s6577_s30   ;;  %s6851_s15 = sadd.s32 1, %s6577_s30  }
  0xac   : > { %s35_s22 = sadd.s32 1, %s6573_s29  ;;  %s32_s9 = ssub.s32 %s6577_s30, %s6851_s15 }
  0xad   : > { %p42_p8 = scmp.ne.s32.totalorder %s6573_s29, %s6569_s28  ;;  %p33_p1 = scmp.eq.s32.totalorder %s32_s9, 0 }
  0xae   : > { %p43_p3 = scmp.eq.s32.totalorder %s6577_s30, 0  ;;  %p48_p13 = scmp.ne.s32.totalorder %s6569_s28, %s6565_s27 }
  0xaf   : > { %p219_p0 = scmp.eq.s32.totalorder %s6663_s11, 1  ;;  %p8137_p5 = scmp.eq.s32.totalorder %s6663_s11, 0 }
  0xb0   : > { %s6863_s13 = scalar_select %p33_p1, %s6573_s29, %s35_s22  }
  0xb1   : > { %p44_p2 = por %p43_p3, %p42_p8  ;;  %p6867_p7 = por %p8137_p5, %p48_p13 }
  0xb2   : > { %p6871_p6 = por %p219_p0, %p42_p8  ;;  %p225_p9 = scmp.eq.s32.totalorder %s5070_s23, 1 }
  0xb3   : > { %p5859_p4 = scmp.lt.s32.totalorder %s6577_s30, 2  ;;  %s330_s14 = sand.u32 1, %s6573_s29  }
  0xb4   : > { %s8139_s24 = scalar_select %p6871_p6, 1, 0 }
  0xb5   : > { %p6877_p10 = por %p225_p9, %p48_p13  ;;  %s5080_s17 = sshll.u32 %s330_s14, 9 }
  0xb6   : > { %s5348_s20 = sshll.u32 %s6577_s30, 13  ;;  %s334_s19 = scalar_lea.vmem [#allocation2], %s5080_s17 }
  0xb7   : > { %s8140_s16 = scalar_select %p6877_p10, 1, 0 }
  0xb8   : > { %s6885_s10 = scalar_lea.hbm %s8118_s0, %s5348_s20  ;;  %s341_s25 = sshll.u32 %s334_s19, 4  ;;  %s6891_s25 = int_to_ptr.vmem [resolvable:$true] %s341_s25 }
  0xb9   : > { %p6887_p11 = pnand %p5859_p4, %p44_p2  ;;  %s6893_s22 = scalar_lea.sflag [#allocation3], %s330_s14 }
  0xba   : > { %s6465_s9 = scalar_lea.hbm %s6885_s10, 8192  ;;  %s6470_s21 = scalar_lea.hbm %s8118_s0, 16384 }
  0xbb   : > { %p6466_p12 = scmp.ne.s32.totalorder %s6885_s10, %s6465_s9  ;;  %p6467_p8 = pneg %p6887_p11 }
  0xbc   : > { %p6471_p13 = scmp.lt.u32.totalorder %s6885_s10, %s8118_s0  ;;  %p6472_p0 = scmp.lt.u32.totalorder %s6470_s21, %s6465_s9 }
  0xbd   : > { %p6468_p1 = pnand %p6467_p8, %p6466_p12  ;;  %p6474_p5 = scmp.lt.u32.totalorder %s6465_s9, %s6885_s10 }
  0xbe   : > { %p6473_p2 = por %p6472_p0, %p6471_p13 }
  0xbf   : > { %p6469_p3 = pneg %p6468_p1 }
  0xc0   : > { %p6475_p9 = por %p6474_p5, %p6473_p2 }
  0xc2   : > { %p6476_p4 = pnand %p6475_p9, %p6469_p3 }
  0xc4   : > { %6479 = shalt.err (!%p6476_p4)
}
  0xc5   : > { %s6480_s14 = scalar_lea.vmem %s6891_s25, 8192  ;;  %s6590_s17 = smov [#allocation2]  }
  0xc6   : > { %p6481_p12 = scmp.ne.s32.totalorder %s6891_s25, %s6480_s14  ;;  %s6485_s20 = sshll.u32 %s6590_s17, 4  ;;  %s6486_s20 = int_to_ptr.vmem [resolvable:$false] %s6485_s20 }
  0xc7   : > { %s6487_s18 = scalar_lea.vmem %s6486_s20, 16384  ;;  %p6488_p6 = scmp.lt.s32.totalorder %s6891_s25, %s6486_s20 }
  0xc8   : > { %p6483_p1 = pnand %p6481_p12, %p6467_p8  ;;  %p6489_p13 = scmp.lt.s32.totalorder %s6487_s18, %s6480_s14 }
  0xca   : > { %p6484_p10 = pneg %p6483_p1  ;;  %p6490_p0 = por %p6489_p13, %p6488_p6 }
  0xcc   : > { %p6491_p2 = pnand %p6490_p0, %p6484_p10 }
  0xce   : > { %6494 = shalt.err (!%p6491_p2)
}
  0xcf   : > { %s6591_s9 = smov 256   ;;  %s6592_s21 = smov 16  }
  0xd0   : > { %5847 = dma.hbm_to_vmem [thread:$0]  (!%p6887_p11), %s6885_s10, 8192, %s6891_s25, %s6893_s22, %s6591_s9, %s6591_s9, %s6592_s21  }
  0xd1   : > { %p8142_p8 = scmp.ne.s32.totalorder %s8132_s12, 0 }
  0xd2   : > { %s6924_s19 = sand.u32 (!%p8142_p8), 1, %s6569_s28  }
  0xd3   : > { %353 = sbr.rel (%p8142_p8) target bundleno = 2205 (0x89d), region = 52  ;;  %s5084_s14 = sshll.u32 (!%p8142_p8), %s6924_s19, 9 }
  0xd4   : > { %s356_s17 = scalar_lea.sflag (!%p8142_p8), [#allocation3], %s6924_s19  ;;  %s6928_s20 = scalar_lea.vmem (!%p8142_p8), [#allocation2], %s5084_s14 }
  0xda   : > { %6540 = dma.done.wait (%p6867_p7), %s356_s17, 8192  }
  0xdb   : > { %6542 = vsyncadd (%p6867_p7), %s356_s17, 4294959104  ;;  %p8143_p6 = scmp.eq.s32.totalorder %s6663_s11, 0 }
  0xdd   : > { %6544 = dma.done.wait (%p8143_p6), [#allocation6], 20480   ;;  %p8144_p10 = pmov %p8143_p6 }
  0xde   : > { %p8145_p11 = pmov %p8143_p6 }
  0xdf   : > { %6546 = vsyncadd (%p8144_p10), [#allocation6], 4294946816 }
  0xe0   : > { %6548 = dma.done.wait (%p8145_p11), [#allocation9], 1040   ;;  %p8146_p3 = pmov %p8143_p6 }
  0xe2   : > { %6550 = vsyncadd (%p8146_p3), [#allocation9], 4294966256  ;;  %p8147_p5 = pmov %p8146_p3 }
  0xe3   : > { %p8148_p9 = pmov %p8146_p3 }
  0xe4   : > { %6552 = dma.done.wait (%p8147_p5), [#allocation12], 2064  }
  0xe5   : > { %6554 = vsyncadd (%p8148_p9), [#allocation12], 4294965232  ;;  %p8149_p7 = pmov %p8146_p3 }
  0xe6   : > { %p8150_p4 = pmov %p8146_p3 }
  0xe7   : > { %6556 = dma.done.wait (%p8149_p7), [#allocation15], 32  }
  0xe8   : > { %6558 = vsyncadd (%p8150_p4), [#allocation15], 4294967264  ;;  %v5916_v0 = vld [vmem:[#allocation7 + $0x40] sm:$0xff]   ;;  %v5918_v2 = vld [vmem:[#allocation7 + $0x48] sm:$0xff]   ;;  %s5092_s12 = sshll.u32 %s6924_s19, 11  ;;  %s5349_s10 = sshll.u32 %s6663_s11, 15 }
  0xe9   : > { %v5917_v1 = vld [vmem:[#allocation7] sm:$0xff]   ;;  %5350 = vmatprep.subr.bf16.mxu0 %v5916_v0  ;;  %v5919_v3 = vld [vmem:[#allocation7 + $0x8] sm:$0xff]   ;;  %v5920_v4 = vld [vmem:[#allocation7 + $0x50] sm:$0xff]   ;;  %s7484_s26 = scalar_lea.vmem [#allocation16], %s5092_s12  ;;  %s8069_s18 = scalar_lea.hbm %s8126_s8, %s5349_s10 }
  0xea   : > { %5351 = vmatpush3.bf16.msra.mxu0 %v5917_v1  ;;  %v5921_v5 = vld [vmem:[#allocation7 + $0x10] sm:$0xff]   ;;  %v5922_v6 = vld [vmem:[#allocation7 + $0x58] sm:$0xff]   ;;  %v5924_v8 = vld [vmem:[#allocation7 + $0x60] sm:$0xff]   ;;  %s4930_s25 = sshll.u32 %s7484_s26, 4  ;;  %s4917_s11 = scalar_lea.sflag [#allocation4], %s6924_s19  ;;  %s8071_s25 = int_to_ptr.vmem [resolvable:$true] %s4930_s25 }
  0xeb   : > { %5352 = vmatprep.subr.bf16.mxu0 %v5918_v2  ;;  %v5923_v7 = vld [vmem:[#allocation7 + $0x18] sm:$0xff]   ;;  %v5925_v9 = vld [vmem:[#allocation7 + $0x20] sm:$0xff]   ;;  %v5926_v10 = vld [vmem:[#allocation7 + $0x68] sm:$0xff]   ;;  %s6495_s9 = scalar_lea.vmem %s8071_s25, 32768  ;;  %p8151_p1 = scmp.ne.s32.totalorder %s8139_s24, 0 }
  0xec   : > { %v5934_v11 = vld [vmem:[%s6928_s20 + $0x4] ss:$16 sps:$4 sm:$0xff]   ;;  %v5927_v12 = vld [vmem:[#allocation7 + $0x28] sm:$0xff]   ;;  %v5930_v15 = vld [vmem:[#allocation7 + $0x78] sm:$0xff]   ;;  %p6496_p12 = scmp.ne.s32.totalorder %s8071_s25, %s6495_s9  ;;  %s6594_s21 = smov [#allocation16]  }
  0xed   : > { %1100 = vmatprep.mubr.bf16.mxu0 %v5934_v11  ;;  %v5928_v13 = vld [vmem:[#allocation7 + $0x70] sm:$0xff]   ;;  %v5931_v16 = vld [vmem:[#allocation7 + $0x38] sm:$0xff]   ;;  %v5935_v17 = vld [vmem:[#allocation7 + $0xc0] sm:$0xff]   ;;  %s6499_s14 = sshll.u32 %s6594_s21, 4  ;;  %s6500_s14 = int_to_ptr.vmem [resolvable:$false] %s6499_s14 }
  0xee   : > { %5353 = vmatpush3.bf16.msra.mxu0 %v5919_v3  ;;  %v5929_v14 = vld [vmem:[#allocation7 + $0x30] sm:$0xff]   ;;  %v5936_v19 = vld [vmem:[#allocation7 + $0x80] sm:$0xff]   ;;  %v5943_v21 = vld [vmem:[#allocation7 + $0xc8] sm:$0xff]   ;;  %p6497_p13 = pnand %p6496_p12, %p8151_p1  ;;  %s6501_s17 = scalar_lea.vmem %s6500_s14, 65536 }
  0xef   : > { %5354 = vmatprep.subr.bf16.mxu0 %v5920_v4  ;;  %v5932_v18 = vld [vmem:[%s6928_s20] ss:$16 sps:$4 sm:$0xff]   ;;  %v5937_v20 = vld [vmem:[%s6928_s20 + $0x24] ss:$16 sps:$4 sm:$0xff]   ;;  %v5944_v22 = vld [vmem:[#allocation7 + $0x88] sm:$0xff]   ;;  %p6502_p2 = scmp.lt.s32.totalorder %s8071_s25, %s6500_s14  ;;  %p6503_p8 = scmp.lt.s32.totalorder %s6501_s17, %s6495_s9 }
  0xf0   : > { %v5951_v23 = vld [vmem:[#allocation7 + $0xd0] sm:$0xff]   ;;  %v5959_v27 = vld [vmem:[#allocation7 + $0xd8] sm:$0xff]   ;;  %v5967_v29 = vld [vmem:[#allocation7 + $0xe0] sm:$0xff]   ;;  %p6498_p0 = pneg %p6497_p13 }
  0xf1   : > { %v5939_v24 = vld [vmem:[%s6928_s20 + $0x20] ss:$16 sps:$4 sm:$0xff]   ;;  %v5940_v25 = vld [vmem:[%s6928_s20 + $0x44] ss:$16 sps:$4 sm:$0xff]   ;;  %v5960_v28 = vld [vmem:[#allocation7 + $0x98] sm:$0xff]   ;;  %p6504_p6 = por %p6503_p8, %p6502_p2 }
  0xf2   : > { %5355 = vmatpush3.bf16.msra.mxu0 %v5921_v5  ;;  %v5952_v26 = vld [vmem:[#allocation7 + $0x90] sm:$0xff]   ;;  %v5968_v32 = vld [vmem:[#allocation7 + $0xa0] sm:$0xff]   ;;  %v5975_v33 = vld [vmem:[#allocation7 + $0xe8] sm:$0xff]  }
  0xf3   : > { %5356 = vmatprep.subr.bf16.mxu0 %v5922_v6  ;;  %v5942_v30 = vld [vmem:[%s6928_s20 + $0x40] ss:$16 sps:$4 sm:$0xff]   ;;  %v5945_v31 = vld [vmem:[%s6928_s20 + $0x64] ss:$16 sps:$4 sm:$0xff]   ;;  %v5976_v34 = vld [vmem:[#allocation7 + $0xa8] sm:$0xff]   ;;  %p6505_p10 = pnand %p6504_p6, %p6498_p0 }
  0xf4   : > { %v5983_v35 = vld [vmem:[#allocation7 + $0xf0] sm:$0xff]   ;;  %v5991_v39 = vld [vmem:[#allocation7 + $0xf8] sm:$0xff]  }
  0xf5   : > { %v5947_v36 = vld [vmem:[%s6928_s20 + $0x60] ss:$16 sps:$4 sm:$0xff]   ;;  %v5948_v37 = vld [vmem:[%s6928_s20 + $0x84] ss:$16 sps:$4 sm:$0xff]   ;;  %v5992_v40 = vld [vmem:[#allocation7 + $0xb8] sm:$0xff]  }
  0xf6   : > { %5357 = vmatpush3.bf16.msra.mxu0 %v5923_v7  ;;  %v5984_v38 = vld [vmem:[#allocation7 + $0xb0] sm:$0xff]   ;;  %v5998_v0 = vld [vmem:[%s6928_s20 + $0xc] ss:$16 sps:$4 sm:$0xff]   ;;  %v5996_v1 = vld [vmem:[%s6928_s20 + $0x8] ss:$16 sps:$4 sm:$0xff]  }
  0xf7   : > { %5358 = vmatprep.subr.bf16.mxu0 %v5924_v8  ;;  %v5950_v41 = vld [vmem:[%s6928_s20 + $0x80] ss:$16 sps:$4 sm:$0xff]   ;;  %v5953_v42 = vld [vmem:[%s6928_s20 + $0xa4] ss:$16 sps:$4 sm:$0xff]   ;;  %v5999_v2 = vld [vmem:[%s6928_s20 + $0x2c] ss:$16 sps:$4 sm:$0xff]  }
  0xf8   : > { %v5955_v43 = vld [vmem:[%s6928_s20 + $0xa0] ss:$16 sps:$4 sm:$0xff]   ;;  %v5956_v44 = vld [vmem:[%s6928_s20 + $0xc4] ss:$16 sps:$4 sm:$0xff]   ;;  %v6001_v3 = vld [vmem:[%s6928_s20 + $0x28] ss:$16 sps:$4 sm:$0xff]  }
  0xf9   : > { %v5958_v45 = vld [vmem:[%s6928_s20 + $0xc0] ss:$16 sps:$4 sm:$0xff]   ;;  %v5961_v46 = vld [vmem:[%s6928_s20 + $0xe4] ss:$16 sps:$4 sm:$0xff]   ;;  %v6002_v4 = vld [vmem:[%s6928_s20 + $0x4c] ss:$16 sps:$4 sm:$0xff]  }
  0xfa   : > { %5359 = vmatpush3.bf16.msra.mxu0 %v5925_v9  ;;  %v5963_v47 = vld [vmem:[%s6928_s20 + $0xe0] ss:$16 sps:$4 sm:$0xff]   ;;  %v5964_v48 = vld [vmem:[%s6928_s20 + $0x104] ss:$16 sps:$4 sm:$0xff]   ;;  %v6004_v5 = vld [vmem:[%s6928_s20 + $0x48] ss:$16 sps:$4 sm:$0xff]  }
  0xfb   : > { %5360 = vmatprep.subr.bf16.mxu0 %v5926_v10  ;;  %v5966_v49 = vld [vmem:[%s6928_s20 + $0x100] ss:$16 sps:$4 sm:$0xff]   ;;  %v5969_v50 = vld [vmem:[%s6928_s20 + $0x124] ss:$16 sps:$4 sm:$0xff]   ;;  %v6005_v6 = vld [vmem:[%s6928_s20 + $0x6c] ss:$16 sps:$4 sm:$0xff]  }
  0xfc   : > { %v5971_v51 = vld [vmem:[%s6928_s20 + $0x120] ss:$16 sps:$4 sm:$0xff]   ;;  %v5972_v52 = vld [vmem:[%s6928_s20 + $0x144] ss:$16 sps:$4 sm:$0xff]   ;;  %v6007_v7 = vld [vmem:[%s6928_s20 + $0x68] ss:$16 sps:$4 sm:$0xff]  }
  0xfd   : > { %v5974_v53 = vld [vmem:[%s6928_s20 + $0x140] ss:$16 sps:$4 sm:$0xff]   ;;  %v5977_v54 = vld [vmem:[%s6928_s20 + $0x164] ss:$16 sps:$4 sm:$0xff]   ;;  %v6008_v8 = vld [vmem:[%s6928_s20 + $0x8c] ss:$16 sps:$4 sm:$0xff]  }
  0xfe   : > { %5361 = vmatpush3.bf16.msra.mxu0 %v5927_v12  ;;  %v5979_v55 = vld [vmem:[%s6928_s20 + $0x160] ss:$16 sps:$4 sm:$0xff]   ;;  %v5980_v56 = vld [vmem:[%s6928_s20 + $0x184] ss:$16 sps:$4 sm:$0xff]   ;;  %v6010_v9 = vld [vmem:[%s6928_s20 + $0x88] ss:$16 sps:$4 sm:$0xff]  }
  0xff   : > { %5362 = vmatprep.subr.bf16.mxu0 %v5928_v13  ;;  %v5982_v57 = vld [vmem:[%s6928_s20 + $0x180] ss:$16 sps:$4 sm:$0xff]   ;;  %v5985_v58 = vld [vmem:[%s6928_s20 + $0x1a4] ss:$16 sps:$4 sm:$0xff]   ;;  %v6011_v10 = vld [vmem:[%s6928_s20 + $0xac] ss:$16 sps:$4 sm:$0xff]  }
 0x100   : > { %v5987_v59 = vld [vmem:[%s6928_s20 + $0x1a0] ss:$16 sps:$4 sm:$0xff]   ;;  %v5988_v60 = vld [vmem:[%s6928_s20 + $0x1c4] ss:$16 sps:$4 sm:$0xff]   ;;  %v6013_v11 = vld [vmem:[%s6928_s20 + $0xa8] ss:$16 sps:$4 sm:$0xff]  }
 0x101   : > { %v5990_v61 = vld [vmem:[%s6928_s20 + $0x1c0] ss:$16 sps:$4 sm:$0xff]   ;;  %v5993_v62 = vld [vmem:[%s6928_s20 + $0x1e4] ss:$16 sps:$4 sm:$0xff]   ;;  %v6014_v12 = vld [vmem:[%s6928_s20 + $0xcc] ss:$16 sps:$4 sm:$0xff]  }
 0x102   : > { %5363 = vmatpush3.bf16.msra.mxu0 %v5929_v14  ;;  %v5995_v63 = vld [vmem:[%s6928_s20 + $0x1e0] ss:$16 sps:$4 sm:$0xff]   ;;  %v6016_v13 = vld [vmem:[%s6928_s20 + $0xc8] ss:$16 sps:$4 sm:$0xff]   ;;  %v6017_v14 = vld [vmem:[%s6928_s20 + $0xec] ss:$16 sps:$4 sm:$0xff]  }
 0x103   : > { %5364 = vmatprep.subr.bf16.mxu0 %v5930_v15  ;;  %v6019_v15 = vld [vmem:[%s6928_s20 + $0xe8] ss:$16 sps:$4 sm:$0xff]  }
 0x106   : > { %5365 = vmatpush3.bf16.msra.mxu0 %v5931_v16  ;;  %v6020_v16 = vld [vmem:[%s6928_s20 + $0x10c] ss:$16 sps:$4 sm:$0xff]  }
 0x107   : > { %5462 = vmatprep.subr.bf16.mxu0 %v5935_v17  ;;  %v6022_v17 = vld [vmem:[%s6928_s20 + $0x108] ss:$16 sps:$4 sm:$0xff]  }
 0x109   : > { %1101 = vmatmul.mubr.bf16.vlgmr.msra.gmra.mrb[0].mxu0 %v5932_v18  ;;  %v6023_v18 = vld [vmem:[%s6928_s20 + $0x12c] ss:$16 sps:$4 sm:$0xff]  }
 0x10a   : > { %5463 = vmatpush3.bf16.msra.mxu0 %v5936_v19  ;;  %1108 = vmatprep.mubr.bf16.mxu0 %v5937_v20  ;;  %v6025_v19 = vld [vmem:[%s6928_s20 + $0x128] ss:$16 sps:$4 sm:$0xff]   ;;  %v6026_v20 = vld [vmem:[%s6928_s20 + $0x14c] ss:$16 sps:$4 sm:$0xff]  }
 0x10b   : > { %5464 = vmatprep.subr.bf16.mxu0 %v5943_v21  ;;  %v6028_v21 = vld [vmem:[%s6928_s20 + $0x148] ss:$16 sps:$4 sm:$0xff]  }
 0x10e   : > { %5465 = vmatpush3.bf16.msra.mxu0 %v5944_v22  ;;  %v6029_v22 = vld [vmem:[%s6928_s20 + $0x16c] ss:$16 sps:$4 sm:$0xff]  }
 0x10f   : > { %5466 = vmatprep.subr.bf16.mxu0 %v5951_v23 }
 0x111   : > { %1109 = vmatmul.mubr.bf16.gmra.mrb[4].mxu0 %v5939_v24 }
 0x112   : > { %1116 = vmatprep.mubr.bf16.mxu0 %v5940_v25  ;;  %5467 = vmatpush3.bf16.msra.mxu0 %v5952_v26  ;;  %v6031_v25 = vld [vmem:[%s6928_s20 + $0x168] ss:$16 sps:$4 sm:$0xff]  }
 0x113   : > { %5468 = vmatprep.subr.bf16.mxu0 %v5959_v27 }
 0x116   : > { %5469 = vmatpush3.bf16.msra.mxu0 %v5960_v28  ;;  %v6032_v28 = vld [vmem:[%s6928_s20 + $0x18c] ss:$16 sps:$4 sm:$0xff]  }
 0x117   : > { %5470 = vmatprep.subr.bf16.mxu0 %v5967_v29 }
 0x119   : > { %1117 = vmatmul.mubr.bf16.gmra.mrb[8].mxu0 %v5942_v30 }
 0x11a   : > { %1124 = vmatprep.mubr.bf16.mxu0 %v5945_v31  ;;  %5471 = vmatpush3.bf16.msra.mxu0 %v5968_v32 }
 0x11b   : > { %5472 = vmatprep.subr.bf16.mxu0 %v5975_v33  ;;  %v6034_v33 = vld [vmem:[%s6928_s20 + $0x188] ss:$16 sps:$4 sm:$0xff]  }
 0x11e   : > { %5473 = vmatpush3.bf16.msra.mxu0 %v5976_v34 }
 0x11f   : > { %5474 = vmatprep.subr.bf16.mxu0 %v5983_v35 }
 0x121   : > { %1125 = vmatmul.mubr.bf16.gmra.mrb[12].mxu0 %v5947_v36  ;;  %v6035_v36 = vld [vmem:[%s6928_s20 + $0x1ac] ss:$16 sps:$4 sm:$0xff]  }
 0x122   : > { %1132 = vmatprep.mubr.bf16.mxu0 %v5948_v37  ;;  %5475 = vmatpush3.bf16.msra.mxu0 %v5984_v38  ;;  %v6593_v38 = vmov 0  }
 0x123   : > { %5476 = vmatprep.subr.bf16.mxu0 %v5991_v39 }
 0x126   : > { %5477 = vmatpush3.bf16.msra.mxu0 %v5992_v40 }
 0x127   : > { %2206 = vmatprep.subr.bf16.mxu0 %v6593_v38 }
 0x129   : > { %1133 = vmatmul.mubr.bf16.gmra.mrb[16].mxu0 %v5950_v41 }
 0x12a   : > { %1140 = vmatprep.mubr.bf16.mxu0 %v5953_v42  ;;  %v6037_v42 = vld [vmem:[%s6928_s20 + $0x1a8] ss:$16 sps:$4 sm:$0xff]  }
 0x131   : > { %1141 = vmatmul.mubr.bf16.gmra.mrb[20].mxu0 %v5955_v43 }
 0x132   : > { %1148 = vmatprep.mubr.bf16.mxu0 %v5956_v44 }
 0x139   : > { %1149 = vmatmul.mubr.bf16.gmra.mrb[24].mxu0 %v5958_v45  ;;  %v6038_v45 = vld [vmem:[%s6928_s20 + $0x1cc] ss:$16 sps:$4 sm:$0xff]  }
 0x13a   : > { %1156 = vmatprep.mubr.bf16.mxu0 %v5961_v46 }
 0x141   : > { %1157 = vmatmul.mubr.bf16.gmra.mrb[28].mxu0 %v5963_v47 }
 0x142   : > { %1164 = vmatprep.mubr.bf16.mxu0 %v5964_v48 }
 0x149   : > { %1165 = vmatmul.mubr.bf16.gmra.mrb[32].mxu0 %v5966_v49 }
 0x14a   : > { %1172 = vmatprep.mubr.bf16.mxu0 %v5969_v50  ;;  %v6040_v50 = vld [vmem:[%s6928_s20 + $0x1c8] ss:$16 sps:$4 sm:$0xff]  }
 0x151   : > { %1173 = vmatmul.mubr.bf16.gmra.mrb[36].mxu0 %v5971_v51 }
 0x152   : > { %1180 = vmatprep.mubr.bf16.mxu0 %v5972_v52 }
 0x159   : > { %1181 = vmatmul.mubr.bf16.gmra.mrb[40].mxu0 %v5974_v53  ;;  %v6041_v53 = vld [vmem:[%s6928_s20 + $0x1ec] ss:$16 sps:$4 sm:$0xff]  }
 0x15a   : > { %1188 = vmatprep.mubr.bf16.mxu0 %v5977_v54 }
 0x161   : > { %1189 = vmatmul.mubr.bf16.gmra.mrb[44].mxu0 %v5979_v55 }
 0x162   : > { %1196 = vmatprep.mubr.bf16.mxu0 %v5980_v56 }
 0x169   : > { %1197 = vmatmul.mubr.bf16.gmra.mrb[48].mxu0 %v5982_v57 }
 0x16a   : > { %1204 = vmatprep.mubr.bf16.mxu0 %v5985_v58  ;;  %v6043_v58 = vld [vmem:[%s6928_s20 + $0x1e8] ss:$16 sps:$4 sm:$0xff]  }
 0x171   : > { %1205 = vmatmul.mubr.bf16.gmra.mrb[52].mxu0 %v5987_v59 }
 0x172   : > { %1212 = vmatprep.mubr.bf16.mxu0 %v5988_v60 }
 0x179   : > { %1213 = vmatmul.mubr.bf16.gmra.mrb[56].mxu0 %v5990_v61 }
 0x17a   : > { %1220 = vmatprep.mubr.bf16.mxu0 %v5993_v62 }
 0x181   : > { %1221 = vmatmul.mubr.bf16.gmra.mrb[60].mxu0 %v5995_v63 }
 0x182   : > { %1261 = vmatprep.mubr.bf16.mxu0 %v5998_v0 }
 0x189   : > { %1262 = vmatmul.mubr.bf16.vlgmr.msra.gmra.mrb[64].mxu0 %v5996_v1 }
 0x18a   : > { %1269 = vmatprep.mubr.bf16.mxu0 %v5999_v2 }
 0x191   : > { %1270 = vmatmul.mubr.bf16.gmra.mrb[68].mxu0 %v6001_v3 }
 0x192   : > { %1277 = vmatprep.mubr.bf16.mxu0 %v6002_v4 }
 0x199   : > { %1278 = vmatmul.mubr.bf16.gmra.mrb[72].mxu0 %v6004_v5 }
 0x19a   : > { %1285 = vmatprep.mubr.bf16.mxu0 %v6005_v6 }
 0x1a1   : > { %1286 = vmatmul.mubr.bf16.gmra.mrb[76].mxu0 %v6007_v7 }
 0x1a2   : > { %1293 = vmatprep.mubr.bf16.mxu0 %v6008_v8 }
 0x1a9   : > { %1294 = vmatmul.mubr.bf16.gmra.mrb[80].mxu0 %v6010_v9 }
 0x1aa   : > { %1301 = vmatprep.mubr.bf16.mxu0 %v6011_v10 }
 0x1b1   : > { %1302 = vmatmul.mubr.bf16.gmra.mrb[84].mxu0 %v6013_v11 }
 0x1b2   : > { %1309 = vmatprep.mubr.bf16.mxu0 %v6014_v12 }
 0x1b9   : > { %1310 = vmatmul.mubr.bf16.gmra.mrb[88].mxu0 %v6016_v13 }
 0x1ba   : > { %1317 = vmatprep.mubr.bf16.mxu0 %v6017_v14 }
 0x1c1   : > { %1318 = vmatmul.mubr.bf16.gmra.mrb[92].mxu0 %v6019_v15 }
 0x1c2   : > { %1325 = vmatprep.mubr.bf16.mxu0 %v6020_v16 }
 0x1c9   : > { %1326 = vmatmul.mubr.bf16.gmra.mrb[96].mxu0 %v6022_v17 }
 0x1ca   : > { %1333 = vmatprep.mubr.bf16.mxu0 %v6023_v18 }
 0x1d1   : > { %1334 = vmatmul.mubr.bf16.gmra.mrb[100].mxu0 %v6025_v19 }
 0x1d2   : > { %1341 = vmatprep.mubr.bf16.mxu0 %v6026_v20 }
 0x1d9   : > { %1342 = vmatmul.mubr.bf16.gmra.mrb[104].mxu0 %v6028_v21 }
 0x1da   : > { %1349 = vmatprep.mubr.bf16.mxu0 %v6029_v22 }
 0x1dc   : > { %v5366_v23 = vpop.f32.mrb[0].mxu0 }
 0x1dd   : > { %v5367_v24 = vpop.f32.mrb[1].mxu0 }
 0x1de   : > { %v7006_v26 = vadd.f32 %v5367_v24, %v5366_v23  ;;  %v5369_v27 = vpop.f32.mrb[2].mxu0 }
 0x1df   : > { %v5370_v29 = vpop.f32.mrb[3].mxu0 }
 0x1e0   : > { %v7009_v30 = vadd.f32 %v5370_v29, %v5369_v27 }
 0x1e1   : > { %1350 = vmatmul.mubr.bf16.gmra.mrb[108].mxu0 %v6031_v25 }
 0x1e2   : > { %1357 = vmatprep.mubr.bf16.mxu0 %v6032_v28 }
 0x1e4   : > { %v5372_v31 = vpop.f32.mrb[4].mxu0 }
 0x1e5   : > { %v5373_v32 = vpop.f32.mrb[5].mxu0 }
 0x1e6   : > { %v7012_v34 = vadd.f32 %v5373_v32, %v5372_v31  ;;  %v5375_v35 = vpop.f32.mrb[6].mxu0 }
 0x1e7   : > { %v5376_v37 = vpop.f32.mrb[7].mxu0 }
 0x1e8   : > { %v7016_v39 = vadd.f32 %v5376_v37, %v5375_v35 }
 0x1e9   : > { %1358 = vmatmul.mubr.bf16.gmra.mrb[112].mxu0 %v6034_v33 }
 0x1ea   : > { %1365 = vmatprep.mubr.bf16.mxu0 %v6035_v36 }
 0x1ec   : > { %v5378_v40 = vpop.f32.mrb[8].mxu0 }
 0x1ed   : > { %v5379_v41 = vpop.f32.mrb[9].mxu0 }
 0x1ee   : > { %v7019_v43 = vadd.f32 %v5379_v41, %v5378_v40  ;;  %v5381_v44 = vpop.f32.mrb[10].mxu0 }
 0x1ef   : > { %v5382_v46 = vpop.f32.mrb[11].mxu0 }
 0x1f0   : > { %v7022_v47 = vadd.f32 %v5382_v46, %v5381_v44 }
 0x1f1   : > { %1366 = vmatmul.mubr.bf16.gmra.mrb[116].mxu0 %v6037_v42 }
 0x1f2   : > { %1373 = vmatprep.mubr.bf16.mxu0 %v6038_v45 }
 0x1f4   : > { %v5384_v48 = vpop.f32.mrb[12].mxu0 }
 0x1f5   : > { %v5385_v49 = vpop.f32.mrb[13].mxu0 }
 0x1f6   : > { %v7025_v51 = vadd.f32 %v5385_v49, %v5384_v48  ;;  %v5387_v52 = vpop.f32.mrb[14].mxu0 }
 0x1f7   : > { %v5388_v54 = vpop.f32.mrb[15].mxu0 }
 0x1f8   : > { %v7028_v55 = vadd.f32 %v5388_v54, %v5387_v52 }
 0x1f9   : > { %1374 = vmatmul.mubr.bf16.gmra.mrb[120].mxu0 %v6040_v50 }
 0x1fa   : > { %1381 = vmatprep.mubr.bf16.mxu0 %v6041_v53 }
 0x1fc   : > { %v5390_v56 = vpop.f32.mrb[16].mxu0 }
 0x1fd   : > { %v5391_v57 = vpop.f32.mrb[17].mxu0 }
 0x1fe   : > { %v7031_v59 = vadd.f32 %v5391_v57, %v5390_v56  ;;  %v5393_v60 = vpop.f32.mrb[18].mxu0 }
 0x1ff   : > { %v5394_v61 = vpop.f32.mrb[19].mxu0 }
 0x200   : > { %v7033_v62 = vadd.f32 %v5394_v61, %v5393_v60 }
 0x201   : > { %1382 = vmatmul.mubr.bf16.gmra.mrb[124].mxu0 %v6043_v58 }
 0x204   : > { %v5396_v63 = vpop.f32.mrb[20].mxu0 }
 0x205   : > { %v5397_v0 = vpop.f32.mrb[21].mxu0 }
 0x206   : > { %v7035_v1 = vadd.f32 %v5397_v0, %v5396_v63  ;;  %v5399_v2 = vpop.f32.mrb[22].mxu0 }
 0x207   : > { %v5400_v3 = vpop.f32.mrb[23].mxu0 }
 0x208   : > { %v7037_v4 = vadd.f32 %v5400_v3, %v5399_v2 }
 0x20c   : > { %v5402_v5 = vpop.f32.mrb[24].mxu0 }
 0x20d   : > { %v5403_v6 = vpop.f32.mrb[25].mxu0 }
 0x20e   : > { %v7039_v7 = vadd.f32 %v5403_v6, %v5402_v5  ;;  %v5405_v8 = vpop.f32.mrb[26].mxu0 }
 0x20f   : > { %v5406_v9 = vpop.f32.mrb[27].mxu0 }
 0x210   : > { %v7041_v10 = vadd.f32 %v5406_v9, %v5405_v8 }
 0x214   : > { %v5408_v11 = vpop.f32.mrb[28].mxu0 }
 0x215   : > { %v5409_v12 = vpop.f32.mrb[29].mxu0 }
 0x216   : > { %v7043_v13 = vadd.f32 %v5409_v12, %v5408_v11  ;;  %v5411_v14 = vpop.f32.mrb[30].mxu0 }
 0x217   : > { %v5412_v15 = vpop.f32.mrb[31].mxu0 }
 0x218   : > { %v7045_v16 = vadd.f32 %v5412_v15, %v5411_v14 }
 0x21c   : > { %v5414_v17 = vpop.f32.mrb[32].mxu0 }
 0x21d   : > { %v5415_v18 = vpop.f32.mrb[33].mxu0 }
 0x21e   : > { %v7047_v19 = vadd.f32 %v5415_v18, %v5414_v17  ;;  %v5417_v20 = vpop.f32.mrb[34].mxu0  ;;  %v7079_v18 = vld [vmem:[#allocation8] ss:$0 sm:$0xff] }
 0x21f   : > { %v5418_v21 = vpop.f32.mrb[35].mxu0 }
 0x220   : > { %v7049_v22 = vadd.f32 %v5418_v21, %v5417_v20 }
 0x224   : > { %v5420_v23 = vpop.f32.mrb[36].mxu0 }
 0x225   : > { %v5421_v24 = vpop.f32.mrb[37].mxu0 }
 0x226   : > { %v7051_v25 = vadd.f32 %v5421_v24, %v5420_v23  ;;  %v5423_v27 = vpop.f32.mrb[38].mxu0  ;;  %v1103_v23 = vadd.f32 %v7006_v26, %v7079_v18 }
 0x227   : > { %v5424_v28 = vpop.f32.mrb[39].mxu0 }
 0x228   : > { %v7053_v29 = vadd.f32 %v5424_v28, %v5423_v27 }
 0x22c   : > { %v5426_v31 = vpop.f32.mrb[40].mxu0 }
 0x22d   : > { %v5427_v32 = vpop.f32.mrb[41].mxu0 }
 0x22e   : > { %v7055_v33 = vadd.f32 %v5427_v32, %v5426_v31  ;;  %v5429_v35 = vpop.f32.mrb[42].mxu0  ;;  %v1106_v31 = vadd.f32 %v7009_v30, %v7079_v18 }
 0x22f   : > { %v5430_v36 = vpop.f32.mrb[43].mxu0 }
 0x230   : > { %v7057_v37 = vadd.f32 %v5430_v36, %v5429_v35  ;;  %v6046_v36 = vld [vmem:[#allocation5 + $0x4] ss:$8 sps:$4 sm:$0xff]  }
 0x231   : > { %2238 = vmatprep.mubr.bf16.mxu0 %v6046_v36 }
 0x234   : > { %v5432_v40 = vpop.f32.mrb[44].mxu0 }
 0x235   : > { %v5433_v41 = vpop.f32.mrb[45].mxu0 }
 0x236   : > { %v7059_v42 = vadd.f32 %v5433_v41, %v5432_v40  ;;  %v5435_v44 = vpop.f32.mrb[46].mxu0 }
 0x237   : > { %v5436_v45 = vpop.f32.mrb[47].mxu0 }
 0x238   : > { %v7061_v46 = vadd.f32 %v5436_v45, %v5435_v44 }
 0x23c   : > { %v5438_v48 = vpop.f32.mrb[48].mxu0 }
 0x23d   : > { %v5439_v49 = vpop.f32.mrb[49].mxu0 }
 0x23e   : > { %v7063_v50 = vadd.f32 %v5439_v49, %v5438_v48  ;;  %v5441_v52 = vpop.f32.mrb[50].mxu0  ;;  %v1111_v49 = vadd.f32 %v7012_v34, %v7079_v18  ;;  %v1119_v34 = vadd.f32 %v7019_v43, %v7079_v18  ;;  %v1127_v43 = vadd.f32 %v7025_v51, %v7079_v18 }
 0x23f   : > { %v5442_v53 = vpop.f32.mrb[51].mxu0  ;;  %v1135_v51 = vadd.f32 %v7031_v59, %v7079_v18  ;;  %v1143_v59 = vadd.f32 %v7035_v1, %v7079_v18  ;;  %v1151_v1 = vadd.f32 %v7039_v7, %v7079_v18  ;;  %v1159_v7 = vadd.f32 %v7043_v13, %v7079_v18 }
 0x240   : > { %v7065_v54 = vadd.f32 %v5442_v53, %v5441_v52  ;;  %v1167_v13 = vadd.f32 %v7047_v19, %v7079_v18  ;;  %v1175_v19 = vadd.f32 %v7051_v25, %v7079_v18  ;;  %v1183_v25 = vadd.f32 %v7055_v33, %v7079_v18 }
 0x241   : > { %v1191_v33 = vadd.f32 %v7059_v42, %v7079_v18  ;;  %v1199_v42 = vadd.f32 %v7063_v50, %v7079_v18 }
 0x244   : > { %v5444_v56 = vpop.f32.mrb[52].mxu0 }
 0x245   : > { %v5445_v57 = vpop.f32.mrb[53].mxu0 }
 0x246   : > { %v7067_v58 = vadd.f32 %v5445_v57, %v5444_v56  ;;  %v5447_v60 = vpop.f32.mrb[54].mxu0  ;;  %v1114_v57 = vadd.f32 %v7016_v39, %v7079_v18  ;;  %v1122_v39 = vadd.f32 %v7022_v47, %v7079_v18  ;;  %v1130_v47 = vadd.f32 %v7028_v55, %v7079_v18 }
 0x247   : > { %v5448_v61 = vpop.f32.mrb[55].mxu0  ;;  %v1138_v55 = vadd.f32 %v7033_v62, %v7079_v18  ;;  %v1146_v62 = vadd.f32 %v7037_v4, %v7079_v18  ;;  %v1154_v4 = vadd.f32 %v7041_v10, %v7079_v18  ;;  %v1162_v10 = vadd.f32 %v7045_v16, %v7079_v18 }
 0x248   : > { %v7069_v63 = vadd.f32 %v5448_v61, %v5447_v60  ;;  %v1170_v16 = vadd.f32 %v7049_v22, %v7079_v18  ;;  %v1178_v22 = vadd.f32 %v7053_v29, %v7079_v18  ;;  %v1186_v29 = vadd.f32 %v7057_v37, %v7079_v18 }
 0x249   : > { %v1194_v37 = vadd.f32 %v7061_v46, %v7079_v18  ;;  %v1202_v46 = vadd.f32 %v7065_v54, %v7079_v18  ;;  %v1207_v50 = vadd.f32 %v7067_v58, %v7079_v18 }
 0x24a   : > { %v1210_v54 = vadd.f32 %v7069_v63, %v7079_v18 }
 0x24c   : > { %v5450_v0 = vpop.f32.mrb[56].mxu0 }
 0x24d   : > { %v5451_v2 = vpop.f32.mrb[57].mxu0 }
 0x24e   : > { %v7071_v3 = vadd.f32 %v5451_v2, %v5450_v0  ;;  %v5453_v5 = vpop.f32.mrb[58].mxu0 }
 0x24f   : > { %v5454_v6 = vpop.f32.mrb[59].mxu0 }
 0x250   : > { %v7073_v8 = vadd.f32 %v5454_v6, %v5453_v5  ;;  %v1215_v58 = vadd.f32 %v7071_v3, %v7079_v18 }
 0x252   : > { %v1218_v63 = vadd.f32 %v7073_v8, %v7079_v18 }
 0x254   : > { %v5456_v9 = vpop.f32.mrb[60].mxu0 }
 0x255   : > { %v5457_v11 = vpop.f32.mrb[61].mxu0 }
 0x256   : > { %v7075_v12 = vadd.f32 %v5457_v11, %v5456_v9  ;;  %v5459_v14 = vpop.f32.mrb[62].mxu0 }
 0x257   : > { %v5460_v15 = vpop.f32.mrb[63].mxu0 }
 0x258   : > { %v7077_v17 = vadd.f32 %v5460_v15, %v5459_v14  ;;  %v1223_v3 = vadd.f32 %v7075_v12, %v7079_v18  ;;  %v6049_v12 = vld [vmem:[#allocation5 + $0x10] ss:$8 sps:$4 sm:$0xff]  }
 0x25a   : > { %v1226_v8 = vadd.f32 %v7077_v17, %v7079_v18  ;;  %v6053_v17 = vld [vmem:[#allocation5 + $0x34] ss:$8 sps:$4 sm:$0xff]   ;;  %v6055_v18 = vld [vmem:[#allocation5 + $0x30] ss:$8 sps:$4 sm:$0xff]  }
 0x25c   : > { %v5478_v20 = vpop.f32.mrb[64].mxu0 }
 0x25d   : > { %v5479_v21 = vpop.f32.mrb[65].mxu0 }
 0x25e   : > { %v5480_v24 = vadd.f32 %v5479_v21, %v5478_v20  ;;  %v5481_v27 = vpop.f32.mrb[66].mxu0 }
 0x25f   : > { %v5482_v28 = vpop.f32.mrb[67].mxu0 }
 0x260   : > { %v1264_v32 = vadd.f32 %v5480_v24, %v1103_v23  ;;  %v5483_v35 = vadd.f32 %v5482_v28, %v5481_v27 }
 0x262   : > { %v1267_v40 = vadd.f32 %v5483_v35, %v1106_v31  ;;  %v1390_v41 = vmax.f32 %v1264_v32, 0.0 }
 0x264   : > { %v1391_v44 = vmax.f32 %v1267_v40, 0.0  ;;  %v5484_v45 = vpop.f32.mrb[68].mxu0 }
 0x265   : > { %v5485_v48 = vpop.f32.mrb[69].mxu0 }
 0x266   : > { %v5486_v52 = vadd.f32 %v5485_v48, %v5484_v45  ;;  %v5487_v26 = vpop.f32.mrb[70].mxu0  ;;  %v1422_v53 = vpack.c.bf16 %v1391_v44, %v1390_v41 }
 0x267   : > { %v5488_v56 = vpop.f32.mrb[71].mxu0 }
 0x268   : > { %v1272_v30 = vadd.f32 %v5486_v52, %v1111_v49  ;;  %v5489_v60 = vadd.f32 %v5488_v56, %v5487_v26  ;;  %2207 = vmatpush1.bf16.msra.mxu0 %v1422_v53 }
 0x269   : > { %2208 = vmatprep.subr.bf16.mxu0 %v6593_v38 }
 0x26a   : > { %v1275_v61 = vadd.f32 %v5489_v60, %v1114_v57  ;;  %v1392_v0 = vmax.f32 %v1272_v30, 0.0 }
 0x26c   : > { %v1393_v2 = vmax.f32 %v1275_v61, 0.0  ;;  %v5490_v5 = vpop.f32.mrb[72].mxu0 }
 0x26d   : > { %v5491_v6 = vpop.f32.mrb[73].mxu0 }
 0x26e   : > { %v5492_v9 = vadd.f32 %v5491_v6, %v5490_v5  ;;  %v5493_v11 = vpop.f32.mrb[74].mxu0  ;;  %v1423_v14 = vpack.c.bf16 %v1393_v2, %v1392_v0 }
 0x26f   : > { %v5494_v15 = vpop.f32.mrb[75].mxu0 }
 0x270   : > { %v1280_v20 = vadd.f32 %v5492_v9, %v1119_v34  ;;  %v5495_v21 = vadd.f32 %v5494_v15, %v5493_v11  ;;  %2209 = vmatpush1.bf16.msra.mxu0 %v1423_v14 }
 0x271   : > { %2210 = vmatprep.subr.bf16.mxu0 %v6593_v38 }
 0x272   : > { %v1283_v23 = vadd.f32 %v5495_v21, %v1122_v39  ;;  %v1394_v24 = vmax.f32 %v1280_v20, 0.0 }
 0x274   : > { %v1395_v27 = vmax.f32 %v1283_v23, 0.0  ;;  %v5496_v28 = vpop.f32.mrb[76].mxu0 }
 0x275   : > { %v5497_v31 = vpop.f32.mrb[77].mxu0 }
 0x276   : > { %v5498_v32 = vadd.f32 %v5497_v31, %v5496_v28  ;;  %v5499_v35 = vpop.f32.mrb[78].mxu0  ;;  %v1424_v36 = vpack.c.bf16 %v1395_v27, %v1394_v24 }
 0x277   : > { %v5500_v40 = vpop.f32.mrb[79].mxu0 }
 0x278   : > { %v1288_v41 = vadd.f32 %v5498_v32, %v1127_v43  ;;  %v5501_v44 = vadd.f32 %v5500_v40, %v5499_v35  ;;  %2211 = vmatpush1.bf16.msra.mxu0 %v1424_v36 }
 0x279   : > { %2212 = vmatprep.subr.bf16.mxu0 %v6593_v38 }
 0x27a   : > { %v1291_v45 = vadd.f32 %v5501_v44, %v1130_v47  ;;  %v1396_v48 = vmax.f32 %v1288_v41, 0.0 }
 0x27c   : > { %v1397_v49 = vmax.f32 %v1291_v45, 0.0  ;;  %v5502_v52 = vpop.f32.mrb[80].mxu0 }
 0x27d   : > { %v5503_v26 = vpop.f32.mrb[81].mxu0 }
 0x27e   : > { %v5504_v53 = vadd.f32 %v5503_v26, %v5502_v52  ;;  %v5505_v56 = vpop.f32.mrb[82].mxu0  ;;  %v1425_v57 = vpack.c.bf16 %v1397_v49, %v1396_v48 }
 0x27f   : > { %v5506_v30 = vpop.f32.mrb[83].mxu0 }
 0x280   : > { %v1296_v60 = vadd.f32 %v5504_v53, %v1135_v51  ;;  %v5507_v61 = vadd.f32 %v5506_v30, %v5505_v56  ;;  %2213 = vmatpush1.bf16.msra.mxu0 %v1425_v57 }
 0x281   : > { %2214 = vmatprep.subr.bf16.mxu0 %v6593_v38 }
 0x282   : > { %v1299_v0 = vadd.f32 %v5507_v61, %v1138_v55  ;;  %v1398_v2 = vmax.f32 %v1296_v60, 0.0 }
 0x284   : > { %v1399_v5 = vmax.f32 %v1299_v0, 0.0  ;;  %v5508_v6 = vpop.f32.mrb[84].mxu0 }
 0x285   : > { %v5509_v34 = vpop.f32.mrb[85].mxu0 }
 0x286   : > { %v5510_v9 = vadd.f32 %v5509_v34, %v5508_v6  ;;  %v5511_v11 = vpop.f32.mrb[86].mxu0  ;;  %v1426_v14 = vpack.c.bf16 %v1399_v5, %v1398_v2 }
 0x287   : > { %v5512_v15 = vpop.f32.mrb[87].mxu0 }
 0x288   : > { %v1304_v39 = vadd.f32 %v5510_v9, %v1143_v59  ;;  %v5513_v20 = vadd.f32 %v5512_v15, %v5511_v11  ;;  %2215 = vmatpush1.bf16.msra.mxu0 %v1426_v14 }
 0x289   : > { %2216 = vmatprep.subr.bf16.mxu0 %v6593_v38 }
 0x28a   : > { %v1307_v21 = vadd.f32 %v5513_v20, %v1146_v62  ;;  %v1400_v23 = vmax.f32 %v1304_v39, 0.0 }
 0x28c   : > { %v1401_v24 = vmax.f32 %v1307_v21, 0.0  ;;  %v5514_v27 = vpop.f32.mrb[88].mxu0 }
 0x28d   : > { %v5515_v28 = vpop.f32.mrb[89].mxu0 }
 0x28e   : > { %v5516_v31 = vadd.f32 %v5515_v28, %v5514_v27  ;;  %v5517_v43 = vpop.f32.mrb[90].mxu0  ;;  %v1427_v32 = vpack.c.bf16 %v1401_v24, %v1400_v23 }
 0x28f   : > { %v5518_v35 = vpop.f32.mrb[91].mxu0 }
 0x290   : > { %v1312_v36 = vadd.f32 %v5516_v31, %v1151_v1  ;;  %v5519_v40 = vadd.f32 %v5518_v35, %v5517_v43  ;;  %2217 = vmatpush1.bf16.msra.mxu0 %v1427_v32 }
 0x291   : > { %2218 = vmatprep.subr.bf16.mxu0 %v6593_v38 }
 0x292   : > { %v1315_v47 = vadd.f32 %v5519_v40, %v1154_v4  ;;  %v1402_v41 = vmax.f32 %v1312_v36, 0.0 }
 0x294   : > { %v1403_v44 = vmax.f32 %v1315_v47, 0.0  ;;  %v5520_v45 = vpop.f32.mrb[92].mxu0 }
 0x295   : > { %v5521_v48 = vpop.f32.mrb[93].mxu0 }
 0x296   : > { %v5522_v49 = vadd.f32 %v5521_v48, %v5520_v45  ;;  %v5523_v52 = vpop.f32.mrb[94].mxu0  ;;  %v1428_v26 = vpack.c.bf16 %v1403_v44, %v1402_v41 }
 0x297   : > { %v5524_v51 = vpop.f32.mrb[95].mxu0 }
 0x298   : > { %v1320_v53 = vadd.f32 %v5522_v49, %v1159_v7  ;;  %v5525_v56 = vadd.f32 %v5524_v51, %v5523_v52  ;;  %2219 = vmatpush1.bf16.msra.mxu0 %v1428_v26 }
 0x299   : > { %2220 = vmatprep.subr.bf16.mxu0 %v6593_v38 }
 0x29a   : > { %v1323_v57 = vadd.f32 %v5525_v56, %v1162_v10  ;;  %v1404_v30 = vmax.f32 %v1320_v53, 0.0 }
 0x29c   : > { %v1405_v55 = vmax.f32 %v1323_v57, 0.0  ;;  %v5526_v60 = vpop.f32.mrb[96].mxu0 }
 0x29d   : > { %v5527_v61 = vpop.f32.mrb[97].mxu0 }
 0x29e   : > { %v5528_v0 = vadd.f32 %v5527_v61, %v5526_v60  ;;  %v5529_v2 = vpop.f32.mrb[98].mxu0  ;;  %v1429_v5 = vpack.c.bf16 %v1405_v55, %v1404_v30 }
 0x29f   : > { %v5530_v6 = vpop.f32.mrb[99].mxu0 }
 0x2a0   : > { %v1328_v34 = vadd.f32 %v5528_v0, %v1167_v13  ;;  %v5531_v59 = vadd.f32 %v5530_v6, %v5529_v2  ;;  %2221 = vmatpush1.bf16.msra.mxu0 %v1429_v5 }
 0x2a1   : > { %2222 = vmatprep.subr.bf16.mxu0 %v6593_v38 }
 0x2a2   : > { %v1331_v9 = vadd.f32 %v5531_v59, %v1170_v16  ;;  %v1406_v11 = vmax.f32 %v1328_v34, 0.0 }
 0x2a4   : > { %v1407_v14 = vmax.f32 %v1331_v9, 0.0  ;;  %v5532_v15 = vpop.f32.mrb[100].mxu0 }
 0x2a5   : > { %v5533_v62 = vpop.f32.mrb[101].mxu0 }
 0x2a6   : > { %v5534_v39 = vadd.f32 %v5533_v62, %v5532_v15  ;;  %v5535_v20 = vpop.f32.mrb[102].mxu0  ;;  %v1430_v21 = vpack.c.bf16 %v1407_v14, %v1406_v11 }
 0x2a7   : > { %v5536_v23 = vpop.f32.mrb[103].mxu0 }
 0x2a8   : > { %v1336_v24 = vadd.f32 %v5534_v39, %v1175_v19  ;;  %v5537_v27 = vadd.f32 %v5536_v23, %v5535_v20  ;;  %2223 = vmatpush1.bf16.msra.mxu0 %v1430_v21 }
 0x2a9   : > { %2224 = vmatprep.subr.bf16.mxu0 %v6593_v38 }
 0x2aa   : > { %v1339_v28 = vadd.f32 %v5537_v27, %v1178_v22  ;;  %v1408_v1 = vmax.f32 %v1336_v24, 0.0 }
 0x2ac   : > { %v1409_v31 = vmax.f32 %v1339_v28, 0.0  ;;  %v5538_v43 = vpop.f32.mrb[104].mxu0 }
 0x2ad   : > { %v5539_v32 = vpop.f32.mrb[105].mxu0 }
 0x2ae   : > { %v5540_v35 = vadd.f32 %v5539_v32, %v5538_v43  ;;  %v5541_v4 = vpop.f32.mrb[106].mxu0  ;;  %v1431_v36 = vpack.c.bf16 %v1409_v31, %v1408_v1 }
 0x2af   : > { %v5542_v40 = vpop.f32.mrb[107].mxu0 }
 0x2b0   : > { %v1344_v47 = vadd.f32 %v5540_v35, %v1183_v25  ;;  %v5543_v41 = vadd.f32 %v5542_v40, %v5541_v4  ;;  %2225 = vmatpush1.bf16.msra.mxu0 %v1431_v36 }
 0x2b1   : > { %2226 = vmatprep.subr.bf16.mxu0 %v6593_v38 }
 0x2b2   : > { %v1347_v44 = vadd.f32 %v5543_v41, %v1186_v29  ;;  %v1410_v45 = vmax.f32 %v1344_v47, 0.0 }
 0x2b4   : > { %v1411_v48 = vmax.f32 %v1347_v44, 0.0  ;;  %v5544_v7 = vpop.f32.mrb[108].mxu0 }
 0x2b5   : > { %v5545_v49 = vpop.f32.mrb[109].mxu0 }
 0x2b6   : > { %v5546_v52 = vadd.f32 %v5545_v49, %v5544_v7  ;;  %v5547_v26 = vpop.f32.mrb[110].mxu0  ;;  %v1432_v51 = vpack.c.bf16 %v1411_v48, %v1410_v45 }
 0x2b7   : > { %v5548_v10 = vpop.f32.mrb[111].mxu0 }
 0x2b8   : > { %v1352_v53 = vadd.f32 %v5546_v52, %v1191_v33  ;;  %v5549_v56 = vadd.f32 %v5548_v10, %v5547_v26  ;;  %2227 = vmatpush1.bf16.msra.mxu0 %v1432_v51  ;;  %v6044_v10 = vld [vmem:[#allocation5] ss:$8 sps:$4 sm:$0xff]  }
 0x2b9   : > { %2228 = vmatprep.subr.bf16.mxu0 %v6593_v38 }
 0x2ba   : > { %v1355_v57 = vadd.f32 %v5549_v56, %v1194_v37  ;;  %v1412_v30 = vmax.f32 %v1352_v53, 0.0  ;;  %v6047_v37 = vld [vmem:[#allocation5 + $0x14] ss:$8 sps:$4 sm:$0xff]   ;;  %v6050_v53 = vld [vmem:[#allocation5 + $0x24] ss:$8 sps:$4 sm:$0xff]  }
 0x2bb   : > { %v6052_v56 = vld [vmem:[#allocation5 + $0x20] ss:$8 sps:$4 sm:$0xff]  }
 0x2bc   : > { %v1413_v55 = vmax.f32 %v1355_v57, 0.0  ;;  %v5550_v60 = vpop.f32.mrb[112].mxu0  ;;  %v6056_v57 = vld [vmem:[#allocation5 + $0x44] ss:$8 sps:$4 sm:$0xff]  }
 0x2bd   : > { %v5551_v61 = vpop.f32.mrb[113].mxu0 }
 0x2be   : > { %v5552_v13 = vadd.f32 %v5551_v61, %v5550_v60  ;;  %v5553_v0 = vpop.f32.mrb[114].mxu0  ;;  %v1433_v2 = vpack.c.bf16 %v1413_v55, %v1412_v30  ;;  %v6058_v30 = vld [vmem:[#allocation5 + $0x40] ss:$8 sps:$4 sm:$0xff]   ;;  %v6059_v55 = vld [vmem:[#allocation5 + $0x54] ss:$8 sps:$4 sm:$0xff]  }
 0x2bf   : > { %v5554_v5 = vpop.f32.mrb[115].mxu0  ;;  %v6061_v60 = vld [vmem:[#allocation5 + $0x50] ss:$8 sps:$4 sm:$0xff]   ;;  %v6062_v61 = vld [vmem:[#allocation5 + $0x64] ss:$8 sps:$4 sm:$0xff]  }
 0x2c0   : > { %v1360_v6 = vadd.f32 %v5552_v13, %v1199_v42  ;;  %v5555_v16 = vadd.f32 %v5554_v5, %v5553_v0  ;;  %2229 = vmatpush1.bf16.msra.mxu0 %v1433_v2  ;;  %v6064_v42 = vld [vmem:[#allocation5 + $0x60] ss:$8 sps:$4 sm:$0xff]   ;;  %v6065_v13 = vld [vmem:[#allocation5 + $0x74] ss:$8 sps:$4 sm:$0xff]   ;;  %v6067_v0 = vld [vmem:[#allocation5 + $0x70] ss:$8 sps:$4 sm:$0xff]  }
 0x2c1   : > { %2230 = vmatprep.subr.bf16.mxu0 %v6593_v38  ;;  %v6068_v2 = vld [vmem:[#allocation5 + $0x84] ss:$8 sps:$4 sm:$0xff]   ;;  %v6070_v5 = vld [vmem:[#allocation5 + $0x80] ss:$8 sps:$4 sm:$0xff]  }
 0x2c2   : > { %v1363_v34 = vadd.f32 %v5555_v16, %v1202_v46  ;;  %v1414_v59 = vmax.f32 %v1360_v6, 0.0  ;;  %v6071_v46 = vld [vmem:[#allocation5 + $0x94] ss:$8 sps:$4 sm:$0xff]   ;;  %v6119_v6 = vld [vmem:[#allocation10] sm:$0xff]   ;;  %v6120_v16 = vld [vmem:[#allocation10 + $0x8] sm:$0xff]  }
 0x2c3   : > { %5646 = vmatprep.subr.bf16.mxu1 %v6119_v6 }
 0x2c4   : > { %v1415_v9 = vmax.f32 %v1363_v34, 0.0  ;;  %v5556_v11 = vpop.f32.mrb[116].mxu0  ;;  %5647 = vmatpush3.bf16.msra.mxu1 %v6119_v6  ;;  %v6073_v34 = vld [vmem:[#allocation5 + $0x90] ss:$8 sps:$4 sm:$0xff]  }
 0x2c5   : > { %v5557_v14 = vpop.f32.mrb[117].mxu0  ;;  %5648 = vmatprep.subr.bf16.mxu1 %v6120_v16 }
 0x2c6   : > { %v5558_v15 = vadd.f32 %v5557_v14, %v5556_v11  ;;  %v5559_v62 = vpop.f32.mrb[118].mxu0  ;;  %v1434_v19 = vpack.c.bf16 %v1415_v9, %v1414_v59  ;;  %v6074_v59 = vld [vmem:[#allocation5 + $0xa4] ss:$8 sps:$4 sm:$0xff]   ;;  %v6124_v9 = vld [vmem:[#allocation10 + $0x10] sm:$0xff]   ;;  %v6125_v11 = vld [vmem:[#allocation10 + $0x18] sm:$0xff]  }
 0x2c7   : > { %v5560_v39 = vpop.f32.mrb[119].mxu0  ;;  %v6076_v14 = vld [vmem:[#allocation5 + $0xa0] ss:$8 sps:$4 sm:$0xff]  }
 0x2c8   : > { %v1368_v20 = vadd.f32 %v5558_v15, %v1207_v50  ;;  %v5561_v21 = vadd.f32 %v5560_v39, %v5559_v62  ;;  %2231 = vmatpush1.bf16.msra.mxu0 %v1434_v19  ;;  %5649 = vmatpush3.bf16.msra.mxu1 %v6120_v16  ;;  %v6077_v50 = vld [vmem:[#allocation5 + $0xb4] ss:$8 sps:$4 sm:$0xff]   ;;  %v6129_v15 = vld [vmem:[#allocation10 + $0x20] sm:$0xff]   ;;  %v6130_v62 = vld [vmem:[#allocation10 + $0x28] sm:$0xff]  }
 0x2c9   : > { %2232 = vmatprep.subr.bf16.mxu0 %v6593_v38  ;;  %5650 = vmatprep.subr.bf16.mxu1 %v6124_v9  ;;  %v6079_v19 = vld [vmem:[#allocation5 + $0xb0] ss:$8 sps:$4 sm:$0xff]   ;;  %v6080_v39 = vld [vmem:[#allocation5 + $0xc4] ss:$8 sps:$4 sm:$0xff]  }
 0x2ca   : > { %v1371_v23 = vadd.f32 %v5561_v21, %v1210_v54  ;;  %v1416_v22 = vmax.f32 %v1368_v20, 0.0  ;;  %v6134_v54 = vld [vmem:[#allocation10 + $0x30] sm:$0xff]   ;;  %v6135_v20 = vld [vmem:[#allocation10 + $0x38] sm:$0xff]  }
 0x2cb   : > { %v6082_v21 = vld [vmem:[#allocation5 + $0xc0] ss:$8 sps:$4 sm:$0xff]  }
 0x2cc   : > { %v1417_v24 = vmax.f32 %v1371_v23, 0.0  ;;  %v5562_v27 = vpop.f32.mrb[120].mxu0  ;;  %5651 = vmatpush3.bf16.msra.mxu1 %v6124_v9  ;;  %v6083_v23 = vld [vmem:[#allocation5 + $0xd4] ss:$8 sps:$4 sm:$0xff]   ;;  %v6144_v9 = vld [vmem:[#allocation5 + $0x1e0] ss:$8 sps:$4 sm:$0xff]  }
 0x2cd   : > { %v5563_v28 = vpop.f32.mrb[121].mxu0  ;;  %5652 = vmatprep.subr.bf16.mxu1 %v6125_v11 }
 0x2ce   : > { %v5564_v1 = vadd.f32 %v5563_v28, %v5562_v27  ;;  %v5565_v31 = vpop.f32.mrb[122].mxu0  ;;  %v1435_v43 = vpack.c.bf16 %v1417_v24, %v1416_v22  ;;  %v6085_v22 = vld [vmem:[#allocation5 + $0xd0] ss:$8 sps:$4 sm:$0xff]   ;;  %v6086_v24 = vld [vmem:[#allocation5 + $0xe4] ss:$8 sps:$4 sm:$0xff]  }
 0x2cf   : > { %v5566_v32 = vpop.f32.mrb[123].mxu0  ;;  %v6088_v27 = vld [vmem:[#allocation5 + $0xe0] ss:$8 sps:$4 sm:$0xff]   ;;  %v6089_v28 = vld [vmem:[#allocation5 + $0xf4] ss:$8 sps:$4 sm:$0xff]  }
 0x2d0   : > { %v1376_v25 = vadd.f32 %v5564_v1, %v1215_v58  ;;  %v5567_v35 = vadd.f32 %v5566_v32, %v5565_v31  ;;  %2233 = vmatpush1.bf16.msra.mxu0 %v1435_v43  ;;  %5653 = vmatpush3.bf16.msra.mxu1 %v6125_v11  ;;  %v6091_v58 = vld [vmem:[#allocation5 + $0xf0] ss:$8 sps:$4 sm:$0xff]   ;;  %v6092_v1 = vld [vmem:[#allocation5 + $0x104] ss:$8 sps:$4 sm:$0xff]   ;;  %v6094_v31 = vld [vmem:[#allocation5 + $0x100] ss:$8 sps:$4 sm:$0xff]  }
 0x2d1   : > { %2234 = vmatprep.subr.bf16.mxu0 %v6593_v38  ;;  %5654 = vmatprep.subr.bf16.mxu1 %v6129_v15  ;;  %v6095_v43 = vld [vmem:[#allocation5 + $0x114] ss:$8 sps:$4 sm:$0xff]   ;;  %v6097_v32 = vld [vmem:[#allocation5 + $0x110] ss:$8 sps:$4 sm:$0xff]  }
 0x2d2   : > { %v1379_v4 = vadd.f32 %v5567_v35, %v1218_v63  ;;  %v1418_v36 = vmax.f32 %v1376_v25, 0.0  ;;  %v6098_v63 = vld [vmem:[#allocation5 + $0x124] ss:$8 sps:$4 sm:$0xff]   ;;  %v6100_v25 = vld [vmem:[#allocation5 + $0x120] ss:$8 sps:$4 sm:$0xff]  }
 0x2d3   : > { %v6101_v35 = vld [vmem:[#allocation5 + $0x134] ss:$8 sps:$4 sm:$0xff]  }
 0x2d4   : > { %v1419_v40 = vmax.f32 %v1379_v4, 0.0  ;;  %v5568_v29 = vpop.f32.mrb[124].mxu0  ;;  %5655 = vmatpush3.bf16.msra.mxu1 %v6129_v15  ;;  %v6103_v4 = vld [vmem:[#allocation5 + $0x130] ss:$8 sps:$4 sm:$0xff]  }
 0x2d5   : > { %v5569_v47 = vpop.f32.mrb[125].mxu0  ;;  %5656 = vmatprep.subr.bf16.mxu1 %v6130_v62 }
 0x2d6   : > { %v5570_v41 = vadd.f32 %v5569_v47, %v5568_v29  ;;  %v5571_v44 = vpop.f32.mrb[126].mxu0  ;;  %v1436_v45 = vpack.c.bf16 %v1419_v40, %v1418_v36  ;;  %v6104_v36 = vld [vmem:[#allocation5 + $0x144] ss:$8 sps:$4 sm:$0xff]   ;;  %v6106_v40 = vld [vmem:[#allocation5 + $0x140] ss:$8 sps:$4 sm:$0xff]  }
 0x2d7   : > { %v5572_v48 = vpop.f32.mrb[127].mxu0  ;;  %v6107_v29 = vld [vmem:[#allocation5 + $0x154] ss:$8 sps:$4 sm:$0xff]   ;;  %v6109_v47 = vld [vmem:[#allocation5 + $0x150] ss:$8 sps:$4 sm:$0xff]  }
 0x2d8   : > { %v1384_v7 = vadd.f32 %v5570_v41, %v1223_v3  ;;  %v5573_v49 = vadd.f32 %v5572_v48, %v5571_v44  ;;  %2235 = vmatpush1.bf16.msra.mxu0 %v1436_v45  ;;  %5657 = vmatpush3.bf16.msra.mxu1 %v6130_v62  ;;  %v6110_v3 = vld [vmem:[#allocation5 + $0x164] ss:$8 sps:$4 sm:$0xff]   ;;  %v6112_v41 = vld [vmem:[#allocation5 + $0x160] ss:$8 sps:$4 sm:$0xff]   ;;  %v6113_v44 = vld [vmem:[#allocation5 + $0x174] ss:$8 sps:$4 sm:$0xff]  }
 0x2d9   : > { %2236 = vmatprep.subr.bf16.mxu0 %v6593_v38  ;;  %5658 = vmatprep.subr.bf16.mxu1 %v6134_v54  ;;  %v6115_v45 = vld [vmem:[#allocation5 + $0x170] ss:$8 sps:$4 sm:$0xff]   ;;  %v6116_v48 = vld [vmem:[#allocation5 + $0x184] ss:$8 sps:$4 sm:$0xff]  }
 0x2da   : > { %v1387_v33 = vadd.f32 %v5573_v49, %v1226_v8  ;;  %v1420_v52 = vmax.f32 %v1384_v7, 0.0  ;;  %v6118_v8 = vld [vmem:[#allocation5 + $0x180] ss:$8 sps:$4 sm:$0xff]   ;;  %v6121_v7 = vld [vmem:[#allocation5 + $0x194] ss:$8 sps:$4 sm:$0xff]  }
 0x2db   : > { %v6123_v49 = vld [vmem:[#allocation5 + $0x190] ss:$8 sps:$4 sm:$0xff]  }
 0x2dc   : > { %v1421_v26 = vmax.f32 %v1387_v33, 0.0  ;;  %5659 = vmatpush3.bf16.msra.mxu1 %v6134_v54  ;;  %v6126_v33 = vld [vmem:[#allocation5 + $0x1a4] ss:$8 sps:$4 sm:$0xff]  }
 0x2dd   : > { %5660 = vmatprep.subr.bf16.mxu1 %v6135_v20 }
 0x2de   : > { %v1437_v51 = vpack.c.bf16 %v1421_v26, %v1420_v52  ;;  %v6128_v52 = vld [vmem:[#allocation5 + $0x1a0] ss:$8 sps:$4 sm:$0xff]   ;;  %v6131_v26 = vld [vmem:[#allocation5 + $0x1b4] ss:$8 sps:$4 sm:$0xff]  }
 0x2e0   : > { %2237 = vmatpush1.bf16.msra.mxu0 %v1437_v51  ;;  %5661 = vmatpush3.bf16.msra.mxu1 %v6135_v20  ;;  %v6150_v20 = vld [vmem:[#allocation5 + $0x204] ss:$8 sps:$4 sm:$0xff]  }
 0x2e3   : > { %2239 = vmatmul.mubr.bf16.vlgmr.msra.gmra.mrb[128].mxu0 %v6044_v10 }
 0x2e4   : > { %2246 = vmatprep.mubr.bf16.mxu0 %v6047_v37  ;;  %v6133_v37 = vld [vmem:[#allocation5 + $0x1b0] ss:$8 sps:$4 sm:$0xff]  }
 0x2eb   : > { %2247 = vmatmul.mubr.bf16.gmra.mrb[132].mxu0 %v6049_v12 }
 0x2ec   : > { %2254 = vmatprep.mubr.bf16.mxu0 %v6050_v53  ;;  %v6136_v53 = vld [vmem:[#allocation5 + $0x1c4] ss:$8 sps:$4 sm:$0xff]  }
 0x2f3   : > { %2255 = vmatmul.mubr.bf16.gmra.mrb[136].mxu0 %v6052_v56 }
 0x2f4   : > { %2262 = vmatprep.mubr.bf16.mxu0 %v6053_v17 }
 0x2fb   : > { %2263 = vmatmul.mubr.bf16.gmra.mrb[140].mxu0 %v6055_v18 }
 0x2fc   : > { %2270 = vmatprep.mubr.bf16.mxu0 %v6056_v57 }
 0x303   : > { %2271 = vmatmul.mubr.bf16.gmra.mrb[144].mxu0 %v6058_v30  ;;  %v6138_v30 = vld [vmem:[#allocation5 + $0x1c0] ss:$8 sps:$4 sm:$0xff]  }
 0x304   : > { %2278 = vmatprep.mubr.bf16.mxu0 %v6059_v55 }
 0x30b   : > { %2279 = vmatmul.mubr.bf16.gmra.mrb[148].mxu0 %v6061_v60  ;;  %v6139_v60 = vld [vmem:[#allocation5 + $0x1d4] ss:$8 sps:$4 sm:$0xff]  }
 0x30c   : > { %2286 = vmatprep.mubr.bf16.mxu0 %v6062_v61 }
 0x313   : > { %2287 = vmatmul.mubr.bf16.gmra.mrb[152].mxu0 %v6064_v42 }
 0x314   : > { %2294 = vmatprep.mubr.bf16.mxu0 %v6065_v13 }
 0x31b   : > { %2295 = vmatmul.mubr.bf16.gmra.mrb[156].mxu0 %v6067_v0 }
 0x31c   : > { %2302 = vmatprep.mubr.bf16.mxu0 %v6068_v2  ;;  %v6141_v2 = vld [vmem:[#allocation5 + $0x1d0] ss:$8 sps:$4 sm:$0xff]  }
 0x323   : > { %2303 = vmatmul.mubr.bf16.gmra.mrb[160].mxu0 %v6070_v5 }
 0x324   : > { %2310 = vmatprep.mubr.bf16.mxu0 %v6071_v46  ;;  %v6142_v46 = vld [vmem:[#allocation5 + $0x1e4] ss:$8 sps:$4 sm:$0xff]  }
 0x32b   : > { %2311 = vmatmul.mubr.bf16.gmra.mrb[164].mxu0 %v6073_v34 }
 0x32c   : > { %2318 = vmatprep.mubr.bf16.mxu0 %v6074_v59 }
 0x333   : > { %2319 = vmatmul.mubr.bf16.gmra.mrb[168].mxu0 %v6076_v14  ;;  %v6145_v14 = vld [vmem:[#allocation5 + $0x1f4] ss:$8 sps:$4 sm:$0xff]  }
 0x334   : > { %2326 = vmatprep.mubr.bf16.mxu0 %v6077_v50 }
 0x33b   : > { %2327 = vmatmul.mubr.bf16.gmra.mrb[172].mxu0 %v6079_v19 }
 0x33c   : > { %2334 = vmatprep.mubr.bf16.mxu0 %v6080_v39  ;;  %v6147_v39 = vld [vmem:[#allocation5 + $0x1f0] ss:$8 sps:$4 sm:$0xff]  }
 0x343   : > { %2335 = vmatmul.mubr.bf16.gmra.mrb[176].mxu0 %v6082_v21 }
 0x344   : > { %2342 = vmatprep.mubr.bf16.mxu0 %v6083_v23 }
 0x34b   : > { %2343 = vmatmul.mubr.bf16.gmra.mrb[180].mxu0 %v6085_v22 }
 0x34c   : > { %2350 = vmatprep.mubr.bf16.mxu0 %v6086_v24 }
 0x353   : > { %2351 = vmatmul.mubr.bf16.gmra.mrb[184].mxu0 %v6088_v27  ;;  %v6148_v27 = vld [vmem:[#allocation5 + $0x200] ss:$8 sps:$4 sm:$0xff]  }
 0x354   : > { %2358 = vmatprep.mubr.bf16.mxu0 %v6089_v28 }
 0x35b   : > { %2359 = vmatmul.mubr.bf16.gmra.mrb[188].mxu0 %v6091_v58  ;;  %v6153_v58 = vld [vmem:[#allocation5 + $0x214] ss:$8 sps:$4 sm:$0xff]  }
 0x35c   : > { %2366 = vmatprep.mubr.bf16.mxu0 %v6092_v1 }
 0x363   : > { %2367 = vmatmul.mubr.bf16.gmra.mrb[192].mxu0 %v6094_v31 }
 0x364   : > { %2374 = vmatprep.mubr.bf16.mxu0 %v6095_v43 }
 0x36b   : > { %2375 = vmatmul.mubr.bf16.gmra.mrb[196].mxu0 %v6097_v32 }
 0x36c   : > { %2382 = vmatprep.mubr.bf16.mxu0 %v6098_v63  ;;  %v6151_v63 = vld [vmem:[#allocation5 + $0x210] ss:$8 sps:$4 sm:$0xff]  }
 0x373   : > { %2383 = vmatmul.mubr.bf16.gmra.mrb[200].mxu0 %v6100_v25 }
 0x374   : > { %2390 = vmatprep.mubr.bf16.mxu0 %v6101_v35  ;;  %v6156_v35 = vld [vmem:[#allocation5 + $0x224] ss:$8 sps:$4 sm:$0xff]  }
 0x37b   : > { %2391 = vmatmul.mubr.bf16.gmra.mrb[204].mxu0 %v6103_v4 }
 0x37c   : > { %2398 = vmatprep.mubr.bf16.mxu0 %v6104_v36 }
 0x383   : > { %2399 = vmatmul.mubr.bf16.gmra.mrb[208].mxu0 %v6106_v40 }
 0x384   : > { %2406 = vmatprep.mubr.bf16.mxu0 %v6107_v29 }
 0x38b   : > { %2407 = vmatmul.mubr.bf16.gmra.mrb[212].mxu0 %v6109_v47  ;;  %v6154_v47 = vld [vmem:[#allocation5 + $0x220] ss:$8 sps:$4 sm:$0xff]  }
 0x38c   : > { %2414 = vmatprep.mubr.bf16.mxu0 %v6110_v3 }
 0x393   : > { %2415 = vmatmul.mubr.bf16.gmra.mrb[216].mxu0 %v6112_v41  ;;  %v6159_v41 = vld [vmem:[#allocation5 + $0x234] ss:$8 sps:$4 sm:$0xff]  }
 0x394   : > { %2422 = vmatprep.mubr.bf16.mxu0 %v6113_v44 }
 0x39b   : > { %2423 = vmatmul.mubr.bf16.gmra.mrb[220].mxu0 %v6115_v45 }
 0x39c   : > { %2430 = vmatprep.mubr.bf16.mxu0 %v6116_v48 }
 0x3a3   : > { %2431 = vmatmul.mubr.bf16.gmra.mrb[224].mxu0 %v6118_v8 }
 0x3a4   : > { %2438 = vmatprep.mubr.bf16.mxu0 %v6121_v7  ;;  %v6157_v7 = vld [vmem:[#allocation5 + $0x230] ss:$8 sps:$4 sm:$0xff]  }
 0x3ab   : > { %2439 = vmatmul.mubr.bf16.gmra.mrb[228].mxu0 %v6123_v49 }
 0x3ac   : > { %2446 = vmatprep.mubr.bf16.mxu0 %v6126_v33  ;;  %v6162_v33 = vld [vmem:[#allocation5 + $0x244] ss:$8 sps:$4 sm:$0xff]  }
 0x3b3   : > { %2447 = vmatmul.mubr.bf16.gmra.mrb[232].mxu0 %v6128_v52 }
 0x3b4   : > { %2454 = vmatprep.mubr.bf16.mxu0 %v6131_v26 }
 0x3b6   : > { %v2240_v51 = vpop.f32.mrb[128].mxu0 }
 0x3b7   : > { %v2242_v10 = vpop.f32.mrb[129].mxu0 }
 0x3b8   : > { %v2243_v12 = vpop.f32.mrb[130].mxu0 }
 0x3b9   : > { %v2245_v56 = vpop.f32.mrb[131].mxu0  ;;  %v2751_v17 = vpack.c.bf16 %v2243_v12, %v2240_v51 }
 0x3bb   : > { %2455 = vmatmul.mubr.bf16.gmra.mrb[236].mxu0 %v6133_v37  ;;  %5662 = vmatprep.mubr.bf16.mxu1 %v2751_v17  ;;  %v6160_v37 = vld [vmem:[#allocation5 + $0x240] ss:$8 sps:$4 sm:$0xff]  }
 0x3bc   : > { %2462 = vmatprep.mubr.bf16.mxu0 %v6136_v53  ;;  %v6165_v53 = vld [vmem:[#allocation5 + $0x254] ss:$8 sps:$4 sm:$0xff]  }
 0x3be   : > { %v2248_v18 = vpop.f32.mrb[132].mxu0 }
 0x3bf   : > { %v2250_v57 = vpop.f32.mrb[133].mxu0 }
 0x3c0   : > { %v2251_v55 = vpop.f32.mrb[134].mxu0 }
 0x3c1   : > { %v2752_v61 = vpack.c.bf16 %v2251_v55, %v2248_v18  ;;  %v2253_v42 = vpop.f32.mrb[135].mxu0 }
 0x3c3   : > { %2463 = vmatmul.mubr.bf16.gmra.mrb[240].mxu0 %v6138_v30  ;;  %5663 = vmatmul.mubr.bf16.vlgmr.msra.gmra.mrb[0].mxu1 %v2752_v61  ;;  %v6163_v30 = vld [vmem:[#allocation5 + $0x250] ss:$8 sps:$4 sm:$0xff]  }
 0x3c4   : > { %2470 = vmatprep.mubr.bf16.mxu0 %v6139_v60  ;;  %v6168_v60 = vld [vmem:[#allocation5 + $0x264] ss:$8 sps:$4 sm:$0xff]  }
 0x3c6   : > { %v2256_v13 = vpop.f32.mrb[136].mxu0 }
 0x3c7   : > { %v2258_v0 = vpop.f32.mrb[137].mxu0 }
 0x3c8   : > { %v2259_v5 = vpop.f32.mrb[138].mxu0 }
 0x3c9   : > { %v2753_v6 = vpack.c.bf16 %v2259_v5, %v2256_v13  ;;  %v2261_v16 = vpop.f32.mrb[139].mxu0 }
 0x3cb   : > { %2471 = vmatmul.mubr.bf16.gmra.mrb[244].mxu0 %v6141_v2  ;;  %5666 = vmatprep.mubr.bf16.mxu1 %v2753_v6  ;;  %v6166_v2 = vld [vmem:[#allocation5 + $0x260] ss:$8 sps:$4 sm:$0xff]  }
 0x3cc   : > { %2478 = vmatprep.mubr.bf16.mxu0 %v6142_v46  ;;  %v6171_v46 = vld [vmem:[#allocation5 + $0x274] ss:$8 sps:$4 sm:$0xff]  }
 0x3ce   : > { %v2264_v34 = vpop.f32.mrb[140].mxu0 }
 0x3cf   : > { %v2266_v59 = vpop.f32.mrb[141].mxu0 }
 0x3d0   : > { %v2267_v11 = vpop.f32.mrb[142].mxu0 }
 0x3d1   : > { %v2754_v50 = vpack.c.bf16 %v2267_v11, %v2264_v34  ;;  %v2269_v15 = vpop.f32.mrb[143].mxu0 }
 0x3d3   : > { %2479 = vmatmul.mubr.bf16.gmra.mrb[248].mxu0 %v6144_v9  ;;  %5667 = vmatmul.mubr.bf16.gmra.mrb[4].mxu1 %v2754_v50  ;;  %v6169_v9 = vld [vmem:[#allocation5 + $0x270] ss:$8 sps:$4 sm:$0xff]  }
 0x3d4   : > { %2486 = vmatprep.mubr.bf16.mxu0 %v6145_v14  ;;  %v6174_v14 = vld [vmem:[#allocation5 + $0x284] ss:$8 sps:$4 sm:$0xff]  }
 0x3d6   : > { %v2272_v62 = vpop.f32.mrb[144].mxu0 }
 0x3d7   : > { %v2274_v19 = vpop.f32.mrb[145].mxu0 }
 0x3d8   : > { %v2275_v54 = vpop.f32.mrb[146].mxu0 }
 0x3d9   : > { %v2755_v21 = vpack.c.bf16 %v2275_v54, %v2272_v62  ;;  %v2277_v23 = vpop.f32.mrb[147].mxu0 }
 0x3db   : > { %2487 = vmatmul.mubr.bf16.gmra.mrb[252].mxu0 %v6147_v39  ;;  %5670 = vmatprep.mubr.bf16.mxu1 %v2755_v21  ;;  %v6172_v39 = vld [vmem:[#allocation5 + $0x280] ss:$8 sps:$4 sm:$0xff]  }
 0x3dc   : > { %2494 = vmatprep.mubr.bf16.mxu0 %v6150_v20  ;;  %v6177_v20 = vld [vmem:[#allocation5 + $0x294] ss:$8 sps:$4 sm:$0xff]  }
 0x3de   : > { %v2280_v22 = vpop.f32.mrb[148].mxu0 }
 0x3df   : > { %v2282_v24 = vpop.f32.mrb[149].mxu0 }
 0x3e0   : > { %v2283_v28 = vpop.f32.mrb[150].mxu0 }
 0x3e1   : > { %v2756_v1 = vpack.c.bf16 %v2283_v28, %v2280_v22  ;;  %v2285_v31 = vpop.f32.mrb[151].mxu0 }
 0x3e3   : > { %2495 = vmatmul.mubr.bf16.gmra.mrb[0].mxu0 %v6148_v27  ;;  %5671 = vmatmul.mubr.bf16.gmra.mrb[8].mxu1 %v2756_v1  ;;  %v6175_v27 = vld [vmem:[#allocation5 + $0x290] ss:$8 sps:$4 sm:$0xff]  }
 0x3e4   : > { %2502 = vmatprep.mubr.bf16.mxu0 %v6153_v58  ;;  %v6180_v58 = vld [vmem:[#allocation5 + $0x2a4] ss:$8 sps:$4 sm:$0xff]  }
 0x3e6   : > { %v2288_v43 = vpop.f32.mrb[152].mxu0 }
 0x3e7   : > { %v2290_v32 = vpop.f32.mrb[153].mxu0 }
 0x3e8   : > { %v2291_v25 = vpop.f32.mrb[154].mxu0 }
 0x3e9   : > { %v2757_v4 = vpack.c.bf16 %v2291_v25, %v2288_v43  ;;  %v2293_v36 = vpop.f32.mrb[155].mxu0 }
 0x3eb   : > { %2503 = vmatmul.mubr.bf16.gmra.mrb[4].mxu0 %v6151_v63  ;;  %5674 = vmatprep.mubr.bf16.mxu1 %v2757_v4  ;;  %v6178_v63 = vld [vmem:[#allocation5 + $0x2a0] ss:$8 sps:$4 sm:$0xff]  }
 0x3ec   : > { %2510 = vmatprep.mubr.bf16.mxu0 %v6156_v35  ;;  %v6183_v35 = vld [vmem:[#allocation5 + $0x2b4] ss:$8 sps:$4 sm:$0xff]  }
 0x3ee   : > { %v2296_v40 = vpop.f32.mrb[156].mxu0 }
 0x3ef   : > { %v2298_v29 = vpop.f32.mrb[157].mxu0 }
 0x3f0   : > { %v2299_v3 = vpop.f32.mrb[158].mxu0 }
 0x3f1   : > { %v2758_v44 = vpack.c.bf16 %v2299_v3, %v2296_v40  ;;  %v2301_v45 = vpop.f32.mrb[159].mxu0 }
 0x3f3   : > { %2511 = vmatmul.mubr.bf16.gmra.mrb[8].mxu0 %v6154_v47  ;;  %5675 = vmatmul.mubr.bf16.gmra.mrb[12].mxu1 %v2758_v44  ;;  %v6181_v47 = vld [vmem:[#allocation5 + $0x2b0] ss:$8 sps:$4 sm:$0xff]  }
 0x3f4   : > { %2518 = vmatprep.mubr.bf16.mxu0 %v6159_v41  ;;  %v6186_v41 = vld [vmem:[#allocation5 + $0x2c4] ss:$8 sps:$4 sm:$0xff]  }
 0x3f6   : > { %v2304_v48 = vpop.f32.mrb[160].mxu0 }
 0x3f7   : > { %v2306_v8 = vpop.f32.mrb[161].mxu0 }
 0x3f8   : > { %v2307_v49 = vpop.f32.mrb[162].mxu0  ;;  %v6184_v8 = vld [vmem:[#allocation5 + $0x2c0] ss:$8 sps:$4 sm:$0xff]  }
 0x3f9   : > { %v2759_v52 = vpack.c.bf16 %v2307_v49, %v2304_v48  ;;  %v2309_v26 = vpop.f32.mrb[163].mxu0  ;;  %v6232_v49 = vld [vmem:[#allocation13] ss:$8 sps:$4 sm:$0xff]  }
 0x3fa   : > { %v6189_v26 = vld [vmem:[#allocation5 + $0x2d4] ss:$8 sps:$4 sm:$0xff]  }
 0x3fb   : > { %2519 = vmatmul.mubr.bf16.gmra.mrb[12].mxu0 %v6157_v7  ;;  %5678 = vmatprep.mubr.bf16.mxu1 %v2759_v52 }
 0x3fc   : > { %2526 = vmatprep.mubr.bf16.mxu0 %v6162_v33  ;;  %v6234_v33 = vld [vmem:[#allocation13 + $0x4] ss:$8 sps:$4 sm:$0xff]  }
 0x3fd   : > { %3731 = vmatprep.subr.bf16.mxu1 %v6234_v33 }
 0x3fe   : > { %v2312_v51 = vpop.f32.mrb[164].mxu0  ;;  %3732 = vmatpush1.bf16.msra.mxu1 %v6232_v49  ;;  %v6213_v49 = vld [vmem:[#allocation5 + $0x354] ss:$8 sps:$4 sm:$0xff]  }
 0x3ff   : > { %v2314_v10 = vpop.f32.mrb[165].mxu0 }
 0x400   : > { %v2315_v12 = vpop.f32.mrb[166].mxu0 }
 0x401   : > { %v2760_v56 = vpack.c.bf16 %v2315_v12, %v2312_v51  ;;  %v2317_v17 = vpop.f32.mrb[167].mxu0 }
 0x402   : > { %v6192_v17 = vld [vmem:[#allocation5 + $0x2e4] ss:$8 sps:$4 sm:$0xff]  }
 0x403   : > { %2527 = vmatmul.mubr.bf16.gmra.mrb[16].mxu0 %v6160_v37  ;;  %5679 = vmatmul.mubr.bf16.gmra.mrb[16].mxu1 %v2760_v56 }
 0x404   : > { %2534 = vmatprep.mubr.bf16.mxu0 %v6165_v53  ;;  %v6187_v53 = vld [vmem:[#allocation5 + $0x2d0] ss:$8 sps:$4 sm:$0xff]  }
 0x406   : > { %v2320_v18 = vpop.f32.mrb[168].mxu0 }
 0x407   : > { %v2322_v57 = vpop.f32.mrb[169].mxu0 }
 0x408   : > { %v2323_v55 = vpop.f32.mrb[170].mxu0 }
 0x409   : > { %v2761_v61 = vpack.c.bf16 %v2323_v55, %v2320_v18  ;;  %v2325_v42 = vpop.f32.mrb[171].mxu0 }
 0x40a   : > { %v6195_v42 = vld [vmem:[#allocation5 + $0x2f4] ss:$8 sps:$4 sm:$0xff]  }
 0x40b   : > { %2535 = vmatmul.mubr.bf16.gmra.mrb[20].mxu0 %v6163_v30  ;;  %5682 = vmatprep.mubr.bf16.mxu1 %v2761_v61 }
 0x40c   : > { %2542 = vmatprep.mubr.bf16.mxu0 %v6168_v60  ;;  %v6190_v60 = vld [vmem:[#allocation5 + $0x2e0] ss:$8 sps:$4 sm:$0xff]  }
 0x40e   : > { %v2328_v13 = vpop.f32.mrb[172].mxu0 }
 0x40f   : > { %v2330_v0 = vpop.f32.mrb[173].mxu0 }
 0x410   : > { %v2331_v5 = vpop.f32.mrb[174].mxu0 }
 0x411   : > { %v2762_v6 = vpack.c.bf16 %v2331_v5, %v2328_v13  ;;  %v2333_v16 = vpop.f32.mrb[175].mxu0 }
 0x412   : > { %v6198_v16 = vld [vmem:[#allocation5 + $0x304] ss:$8 sps:$4 sm:$0xff]  }
 0x413   : > { %2543 = vmatmul.mubr.bf16.gmra.mrb[24].mxu0 %v6166_v2  ;;  %5683 = vmatmul.mubr.bf16.gmra.mrb[20].mxu1 %v2762_v6 }
 0x414   : > { %2550 = vmatprep.mubr.bf16.mxu0 %v6171_v46  ;;  %v6193_v46 = vld [vmem:[#allocation5 + $0x2f0] ss:$8 sps:$4 sm:$0xff]  }
 0x416   : > { %v2336_v34 = vpop.f32.mrb[176].mxu0 }
 0x417   : > { %v2338_v59 = vpop.f32.mrb[177].mxu0 }
 0x418   : > { %v2339_v11 = vpop.f32.mrb[178].mxu0 }
 0x419   : > { %v2763_v50 = vpack.c.bf16 %v2339_v11, %v2336_v34  ;;  %v2341_v15 = vpop.f32.mrb[179].mxu0  ;;  %v6196_v11 = vld [vmem:[#allocation5 + $0x300] ss:$8 sps:$4 sm:$0xff]  }
 0x41a   : > { %v6249_v15 = vld [vmem:[#allocation13 + $0x14] ss:$8 sps:$4 sm:$0xff]  }
 0x41b   : > { %2551 = vmatmul.mubr.bf16.gmra.mrb[28].mxu0 %v6169_v9  ;;  %5686 = vmatprep.mubr.bf16.mxu1 %v2763_v50  ;;  %v6247_v50 = vld [vmem:[#allocation13 + $0x10] ss:$8 sps:$4 sm:$0xff]  }
 0x41c   : > { %2558 = vmatprep.mubr.bf16.mxu0 %v6174_v14  ;;  %3733 = vmatprep.subr.bf16.mxu1 %v6249_v15 }
 0x41d   : > { %3734 = vmatpush1.bf16.msra.mxu1 %v6247_v50 }
 0x41e   : > { %v2344_v62 = vpop.f32.mrb[180].mxu0 }
 0x41f   : > { %v2346_v19 = vpop.f32.mrb[181].mxu0 }
 0x420   : > { %v2347_v54 = vpop.f32.mrb[182].mxu0  ;;  %v6201_v19 = vld [vmem:[#allocation5 + $0x314] ss:$8 sps:$4 sm:$0xff]  }
 0x421   : > { %v2764_v21 = vpack.c.bf16 %v2347_v54, %v2344_v62  ;;  %v2349_v23 = vpop.f32.mrb[183].mxu0 }
 0x422   : > { %v6199_v23 = vld [vmem:[#allocation5 + $0x310] ss:$8 sps:$4 sm:$0xff]  }
 0x423   : > { %2559 = vmatmul.mubr.bf16.gmra.mrb[32].mxu0 %v6172_v39  ;;  %5687 = vmatmul.mubr.bf16.gmra.mrb[24].mxu1 %v2764_v21 }
 0x424   : > { %2566 = vmatprep.mubr.bf16.mxu0 %v6177_v20 }
 0x426   : > { %v2352_v22 = vpop.f32.mrb[184].mxu0 }
 0x427   : > { %v2354_v24 = vpop.f32.mrb[185].mxu0 }
 0x428   : > { %v2355_v28 = vpop.f32.mrb[186].mxu0  ;;  %v6204_v24 = vld [vmem:[#allocation5 + $0x324] ss:$8 sps:$4 sm:$0xff]  }
 0x429   : > { %v2765_v1 = vpack.c.bf16 %v2355_v28, %v2352_v22  ;;  %v2357_v31 = vpop.f32.mrb[187].mxu0 }
 0x42a   : > { %v6202_v31 = vld [vmem:[#allocation5 + $0x320] ss:$8 sps:$4 sm:$0xff]  }
 0x42b   : > { %2567 = vmatmul.mubr.bf16.gmra.mrb[36].mxu0 %v6175_v27  ;;  %5690 = vmatprep.mubr.bf16.mxu1 %v2765_v1 }
 0x42c   : > { %2574 = vmatprep.mubr.bf16.mxu0 %v6180_v58 }
 0x42e   : > { %v2360_v43 = vpop.f32.mrb[188].mxu0 }
 0x42f   : > { %v2362_v32 = vpop.f32.mrb[189].mxu0 }
 0x430   : > { %v2363_v25 = vpop.f32.mrb[190].mxu0  ;;  %v6207_v32 = vld [vmem:[#allocation5 + $0x334] ss:$8 sps:$4 sm:$0xff]  }
 0x431   : > { %v2766_v4 = vpack.c.bf16 %v2363_v25, %v2360_v43  ;;  %v2365_v36 = vpop.f32.mrb[191].mxu0 }
 0x432   : > { %v6205_v36 = vld [vmem:[#allocation5 + $0x330] ss:$8 sps:$4 sm:$0xff]  }
 0x433   : > { %2575 = vmatmul.mubr.bf16.gmra.mrb[40].mxu0 %v6178_v63  ;;  %5691 = vmatmul.mubr.bf16.gmra.mrb[28].mxu1 %v2766_v4 }
 0x434   : > { %2582 = vmatprep.mubr.bf16.mxu0 %v6183_v35 }
 0x436   : > { %v2368_v40 = vpop.f32.mrb[192].mxu0 }
 0x437   : > { %v2370_v29 = vpop.f32.mrb[193].mxu0 }
 0x438   : > { %v2371_v3 = vpop.f32.mrb[194].mxu0  ;;  %v6210_v29 = vld [vmem:[#allocation5 + $0x344] ss:$8 sps:$4 sm:$0xff]  }
 0x439   : > { %v2767_v44 = vpack.c.bf16 %v2371_v3, %v2368_v40  ;;  %v2373_v45 = vpop.f32.mrb[195].mxu0 }
 0x43b   : > { %2583 = vmatmul.mubr.bf16.gmra.mrb[44].mxu0 %v6181_v47  ;;  %5694 = vmatprep.mubr.bf16.mxu1 %v2767_v44  ;;  %v6208_v44 = vld [vmem:[#allocation5 + $0x340] ss:$8 sps:$4 sm:$0xff]  }
 0x43c   : > { %2590 = vmatprep.mubr.bf16.mxu0 %v6186_v41 }
 0x43e   : > { %v2376_v48 = vpop.f32.mrb[196].mxu0 }
 0x43f   : > { %v2378_v7 = vpop.f32.mrb[197].mxu0 }
 0x440   : > { %v2379_v52 = vpop.f32.mrb[198].mxu0 }
 0x441   : > { %v2768_v51 = vpack.c.bf16 %v2379_v52, %v2376_v48  ;;  %v2381_v10 = vpop.f32.mrb[199].mxu0  ;;  %v6250_v48 = vld [vmem:[#allocation13 + $0x20] ss:$8 sps:$4 sm:$0xff]  }
 0x442   : > { %v6211_v10 = vld [vmem:[#allocation5 + $0x350] ss:$8 sps:$4 sm:$0xff]  }
 0x443   : > { %2591 = vmatmul.mubr.bf16.gmra.mrb[48].mxu0 %v6184_v8  ;;  %5695 = vmatmul.mubr.bf16.gmra.mrb[32].mxu1 %v2768_v51  ;;  %v6252_v8 = vld [vmem:[#allocation13 + $0x24] ss:$8 sps:$4 sm:$0xff]  }
 0x444   : > { %2598 = vmatprep.mubr.bf16.mxu0 %v6189_v26  ;;  %3735 = vmatprep.subr.bf16.mxu1 %v6252_v8 }
 0x445   : > { %3736 = vmatpush1.bf16.msra.mxu1 %v6250_v48 }
 0x446   : > { %v2384_v37 = vpop.f32.mrb[200].mxu0 }
 0x447   : > { %v2386_v12 = vpop.f32.mrb[201].mxu0 }
 0x448   : > { %v2387_v56 = vpop.f32.mrb[202].mxu0  ;;  %v6216_v12 = vld [vmem:[#allocation5 + $0x364] ss:$8 sps:$4 sm:$0xff]  }
 0x449   : > { %v2769_v18 = vpack.c.bf16 %v2387_v56, %v2384_v37  ;;  %v2389_v57 = vpop.f32.mrb[203].mxu0 }
 0x44a   : > { %v6214_v57 = vld [vmem:[#allocation5 + $0x360] ss:$8 sps:$4 sm:$0xff]  }
 0x44b   : > { %2599 = vmatmul.mubr.bf16.gmra.mrb[52].mxu0 %v6187_v53  ;;  %5698 = vmatprep.mubr.bf16.mxu1 %v2769_v18 }
 0x44c   : > { %2606 = vmatprep.mubr.bf16.mxu0 %v6192_v17 }
 0x44e   : > { %v2392_v30 = vpop.f32.mrb[204].mxu0 }
 0x44f   : > { %v2394_v55 = vpop.f32.mrb[205].mxu0 }
 0x450   : > { %v2395_v61 = vpop.f32.mrb[206].mxu0  ;;  %v6219_v55 = vld [vmem:[#allocation5 + $0x374] ss:$8 sps:$4 sm:$0xff]  }
 0x451   : > { %v2770_v13 = vpack.c.bf16 %v2395_v61, %v2392_v30  ;;  %v2397_v0 = vpop.f32.mrb[207].mxu0 }
 0x453   : > { %2607 = vmatmul.mubr.bf16.gmra.mrb[56].mxu0 %v6190_v60  ;;  %5699 = vmatmul.mubr.bf16.gmra.mrb[36].mxu1 %v2770_v13 }
 0x454   : > { %2614 = vmatprep.mubr.bf16.mxu0 %v6195_v42  ;;  %v7160_v42 = vld [vmem:[#allocation11] ss:$0 sm:$0xff] }
 0x456   : > { %v2400_v2 = vpop.f32.mrb[208].mxu0 }
 0x457   : > { %v2402_v5 = vpop.f32.mrb[209].mxu0 }
 0x458   : > { %v2403_v6 = vpop.f32.mrb[210].mxu0 }
 0x459   : > { %v2771_v34 = vpack.c.bf16 %v2403_v6, %v2400_v2  ;;  %v2405_v59 = vpop.f32.mrb[211].mxu0  ;;  %v6217_v6 = vld [vmem:[#allocation5 + $0x370] ss:$8 sps:$4 sm:$0xff]  }
 0x45b   : > { %2615 = vmatmul.mubr.bf16.gmra.mrb[60].mxu0 %v6193_v46  ;;  %5702 = vmatprep.mubr.bf16.mxu1 %v2771_v34 }
 0x45c   : > { %2622 = vmatprep.mubr.bf16.mxu0 %v6198_v16 }
 0x45e   : > { %v2408_v9 = vpop.f32.mrb[212].mxu0 }
 0x45f   : > { %v2410_v14 = vpop.f32.mrb[213].mxu0 }
 0x460   : > { %v2411_v62 = vpop.f32.mrb[214].mxu0 }
 0x461   : > { %v2772_v39 = vpack.c.bf16 %v2411_v62, %v2408_v9  ;;  %v2413_v54 = vpop.f32.mrb[215].mxu0  ;;  %v6222_v9 = vld [vmem:[#allocation5 + $0x384] ss:$8 sps:$4 sm:$0xff]  }
 0x463   : > { %2623 = vmatmul.mubr.bf16.gmra.mrb[64].mxu0 %v6196_v11  ;;  %5703 = vmatmul.mubr.bf16.gmra.mrb[40].mxu1 %v2772_v39 }
 0x464   : > { %2630 = vmatprep.mubr.bf16.mxu0 %v6201_v19 }
 0x466   : > { %v2416_v20 = vpop.f32.mrb[216].mxu0 }
 0x467   : > { %v2418_v21 = vpop.f32.mrb[217].mxu0 }
 0x468   : > { %v2419_v22 = vpop.f32.mrb[218].mxu0 }
 0x469   : > { %v2773_v27 = vpack.c.bf16 %v2419_v22, %v2416_v20  ;;  %v2421_v28 = vpop.f32.mrb[219].mxu0 }
 0x46a   : > { %v6253_v28 = vld [vmem:[#allocation13 + $0x30] ss:$8 sps:$4 sm:$0xff]  }
 0x46b   : > { %2631 = vmatmul.mubr.bf16.gmra.mrb[68].mxu0 %v6199_v23  ;;  %5706 = vmatprep.mubr.bf16.mxu1 %v2773_v27 }
 0x46c   : > { %2638 = vmatprep.mubr.bf16.mxu0 %v6204_v24  ;;  %v6220_v24 = vld [vmem:[#allocation5 + $0x380] ss:$8 sps:$4 sm:$0xff]  }
 0x46e   : > { %v2424_v58 = vpop.f32.mrb[220].mxu0 }
 0x46f   : > { %v2426_v1 = vpop.f32.mrb[221].mxu0 }
 0x470   : > { %v2427_v43 = vpop.f32.mrb[222].mxu0 }
 0x471   : > { %v2774_v63 = vpack.c.bf16 %v2427_v43, %v2424_v58  ;;  %v2429_v25 = vpop.f32.mrb[223].mxu0  ;;  %v6255_v58 = vld [vmem:[#allocation13 + $0x34] ss:$8 sps:$4 sm:$0xff]  }
 0x472   : > { %3737 = vmatprep.subr.bf16.mxu1 %v6255_v58  ;;  %v6240_v58 = vld [vmem:[#allocation5 + $0x3d4] ss:$8 sps:$4 sm:$0xff]  }
 0x473   : > { %2639 = vmatmul.mubr.bf16.gmra.mrb[72].mxu0 %v6202_v31  ;;  %5707 = vmatmul.mubr.bf16.gmra.mrb[44].mxu1 %v2774_v63  ;;  %v6225_v31 = vld [vmem:[#allocation5 + $0x394] ss:$8 sps:$4 sm:$0xff]  }
 0x474   : > { %2646 = vmatprep.mubr.bf16.mxu0 %v6207_v32  ;;  %3738 = vmatpush1.bf16.msra.mxu1 %v6253_v28 }
 0x476   : > { %v2432_v35 = vpop.f32.mrb[224].mxu0 }
 0x477   : > { %v2434_v4 = vpop.f32.mrb[225].mxu0 }
 0x478   : > { %v2435_v40 = vpop.f32.mrb[226].mxu0 }
 0x479   : > { %v2775_v47 = vpack.c.bf16 %v2435_v40, %v2432_v35  ;;  %v2437_v3 = vpop.f32.mrb[227].mxu0  ;;  %v6223_v40 = vld [vmem:[#allocation5 + $0x390] ss:$8 sps:$4 sm:$0xff]  }
 0x47b   : > { %2647 = vmatmul.mubr.bf16.gmra.mrb[76].mxu0 %v6205_v36  ;;  %5710 = vmatprep.mubr.bf16.mxu1 %v2775_v47 }
 0x47c   : > { %2654 = vmatprep.mubr.bf16.mxu0 %v6210_v29 }
 0x47e   : > { %v2440_v41 = vpop.f32.mrb[228].mxu0 }
 0x47f   : > { %v2442_v45 = vpop.f32.mrb[229].mxu0 }
 0x480   : > { %v2443_v7 = vpop.f32.mrb[230].mxu0 }
 0x481   : > { %v2776_v33 = vpack.c.bf16 %v2443_v7, %v2440_v41  ;;  %v2445_v52 = vpop.f32.mrb[231].mxu0  ;;  %v6228_v41 = vld [vmem:[#allocation5 + $0x3a4] ss:$8 sps:$4 sm:$0xff]  }
 0x483   : > { %2655 = vmatmul.mubr.bf16.gmra.mrb[80].mxu0 %v6208_v44  ;;  %5711 = vmatmul.mubr.bf16.gmra.mrb[48].mxu1 %v2776_v33 }
 0x484   : > { %2662 = vmatprep.mubr.bf16.mxu0 %v6213_v49 }
 0x486   : > { %v2448_v26 = vpop.f32.mrb[232].mxu0 }
 0x487   : > { %v2450_v51 = vpop.f32.mrb[233].mxu0 }
 0x488   : > { %v2451_v37 = vpop.f32.mrb[234].mxu0 }
 0x489   : > { %v2777_v53 = vpack.c.bf16 %v2451_v37, %v2448_v26  ;;  %v2453_v56 = vpop.f32.mrb[235].mxu0 }
 0x48b   : > { %2663 = vmatmul.mubr.bf16.gmra.mrb[84].mxu0 %v6211_v10  ;;  %5714 = vmatprep.mubr.bf16.mxu1 %v2777_v53  ;;  %v6226_v53 = vld [vmem:[#allocation5 + $0x3a0] ss:$8 sps:$4 sm:$0xff]  }
 0x48c   : > { %2670 = vmatprep.mubr.bf16.mxu0 %v6216_v12 }
 0x48e   : > { %v2456_v17 = vpop.f32.mrb[236].mxu0 }
 0x48f   : > { %v2458_v18 = vpop.f32.mrb[237].mxu0 }
 0x490   : > { %v2459_v30 = vpop.f32.mrb[238].mxu0 }
 0x491   : > { %v2778_v60 = vpack.c.bf16 %v2459_v30, %v2456_v17  ;;  %v2461_v61 = vpop.f32.mrb[239].mxu0  ;;  %v6231_v17 = vld [vmem:[#allocation5 + $0x3b4] ss:$8 sps:$4 sm:$0xff]  }
 0x493   : > { %2671 = vmatmul.mubr.bf16.gmra.mrb[88].mxu0 %v6214_v57  ;;  %5715 = vmatmul.mubr.bf16.gmra.mrb[52].mxu1 %v2778_v60 }
 0x494   : > { %2678 = vmatprep.mubr.bf16.mxu0 %v6219_v55 }
 0x496   : > { %v5664_v13 = vpop.f32.mrb[0].mxu1  ;;  %v2464_v0 = vpop.f32.mrb[240].mxu0 }
 0x497   : > { %v2929_v2 = vadd.f32 %v5664_v13, %v7160_v42  ;;  %v2920_v5 = vpop.f32.mrb[1].mxu1  ;;  %v2466_v46 = vpop.f32.mrb[241].mxu0 }
 0x498   : > { %v2921_v16 = vadd.f32 %v7160_v42, %v2920_v5  ;;  %v5665_v34 = vpop.f32.mrb[2].mxu1  ;;  %v2467_v59 = vpop.f32.mrb[242].mxu0 }
 0x499   : > { %v2932_v11 = vadd.f32 %v5665_v34, %v7160_v42  ;;  %v2923_v14 = vpop.f32.mrb[3].mxu1  ;;  %v2779_v50 = vpack.c.bf16 %v2467_v59, %v2464_v0  ;;  %v2469_v15 = vpop.f32.mrb[243].mxu0  ;;  %v3433_v19 = vmax.f32 %v2929_v2, 0.0  ;;  %v6229_v0 = vld [vmem:[#allocation5 + $0x3b0] ss:$8 sps:$4 sm:$0xff]  }
 0x49a   : > { %v2924_v62 = vadd.f32 %v7160_v42, %v2923_v14  ;;  %v3431_v54 = vmax.f32 %v2921_v16, 0.0 }
 0x49b   : > { %v3434_v39 = vmax.f32 %v2932_v11, 0.0  ;;  %2679 = vmatmul.mubr.bf16.gmra.mrb[92].mxu0 %v6217_v6  ;;  %5718 = vmatprep.mubr.bf16.mxu1 %v2779_v50  ;;  %v6237_v6 = vld [vmem:[#allocation5 + $0x3c4] ss:$8 sps:$4 sm:$0xff]  }
 0x49c   : > { %v3432_v20 = vmax.f32 %v2924_v62, 0.0  ;;  %2686 = vmatprep.mubr.bf16.mxu0 %v6222_v9 }
 0x49d   : > { %v7166_v21 = vpack.c.bf16 %v3434_v39, %v3433_v19 }
 0x49e   : > { %v7168_v23 = vpack.c.bf16 %v3432_v20, %v3431_v54  ;;  %v2472_v22 = vpop.f32.mrb[244].mxu0  ;;  %v6235_v54 = vld [vmem:[#allocation5 + $0x3c0] ss:$8 sps:$4 sm:$0xff]  }
 0x49f   : > { %v2474_v27 = vpop.f32.mrb[245].mxu0 }
 0x4a0   : > { %v2475_v1 = vpop.f32.mrb[246].mxu0  ;;  %v6258_v27 = vld [vmem:[#allocation13 + $0x44] ss:$8 sps:$4 sm:$0xff]  }
 0x4a1   : > { %v2780_v43 = vpack.c.bf16 %v2475_v1, %v2472_v22  ;;  %v2477_v32 = vpop.f32.mrb[247].mxu0  ;;  %3739 = vmatprep.subr.bf16.mxu1 %v6258_v27  ;;  %v6261_v27 = vld [vmem:[#allocation13 + $0x54] ss:$8 sps:$4 sm:$0xff]  }
 0x4a3   : > { %2687 = vmatmul.mubr.bf16.gmra.mrb[96].mxu0 %v6220_v24  ;;  %5719 = vmatmul.mubr.bf16.gmra.mrb[56].mxu1 %v2780_v43  ;;  %v6256_v24 = vld [vmem:[#allocation13 + $0x40] ss:$8 sps:$4 sm:$0xff]  }
 0x4a4   : > { %2694 = vmatprep.mubr.bf16.mxu0 %v6225_v31  ;;  %3740 = vmatpush1.bf16.msra.mxu1 %v6256_v24  ;;  %v6259_v24 = vld [vmem:[#allocation13 + $0x50] ss:$8 sps:$4 sm:$0xff]  }
 0x4a5   : > { %3741 = vmatprep.subr.bf16.mxu1 %v6261_v27 }
 0x4a6   : > { %v5668_v63 = vpop.f32.mrb[4].mxu1  ;;  %v2480_v25 = vpop.f32.mrb[248].mxu0 }
 0x4a7   : > { %v2945_v35 = vadd.f32 %v5668_v63, %v7160_v42  ;;  %v2936_v4 = vpop.f32.mrb[5].mxu1  ;;  %v2482_v36 = vpop.f32.mrb[249].mxu0 }
 0x4a8   : > { %v2937_v29 = vadd.f32 %v7160_v42, %v2936_v4  ;;  %v5669_v47 = vpop.f32.mrb[6].mxu1  ;;  %v2483_v3 = vpop.f32.mrb[250].mxu0  ;;  %v6238_v4 = vld [vmem:[#allocation5 + $0x3d0] ss:$8 sps:$4 sm:$0xff]   ;;  %3742 = vmatpush1.bf16.msra.mxu1 %v6259_v24 }
 0x4a9   : > { %v2948_v44 = vadd.f32 %v5669_v47, %v7160_v42  ;;  %v2939_v45 = vpop.f32.mrb[7].mxu1  ;;  %v2781_v48 = vpack.c.bf16 %v2483_v3, %v2480_v25  ;;  %v2485_v8 = vpop.f32.mrb[251].mxu0  ;;  %v3437_v49 = vmax.f32 %v2945_v35, 0.0  ;;  %v6243_v47 = vld [vmem:[#allocation5 + $0x3e4] ss:$8 sps:$4 sm:$0xff]  }
 0x4aa   : > { %v2940_v7 = vadd.f32 %v7160_v42, %v2939_v45  ;;  %v3435_v52 = vmax.f32 %v2937_v29, 0.0 }
 0x4ab   : > { %v3438_v33 = vmax.f32 %v2948_v44, 0.0  ;;  %2695 = vmatmul.mubr.bf16.gmra.mrb[100].mxu0 %v6223_v40  ;;  %5722 = vmatprep.mubr.bf16.mxu1 %v2781_v48 }
 0x4ac   : > { %v3436_v26 = vmax.f32 %v2940_v7, 0.0  ;;  %2702 = vmatprep.mubr.bf16.mxu0 %v6228_v41 }
 0x4ad   : > { %v7174_v51 = vpack.c.bf16 %v3438_v33, %v3437_v49 }
 0x4ae   : > { %v2488_v10 = vpop.f32.mrb[252].mxu0  ;;  %v7176_v37 = vpack.c.bf16 %v3436_v26, %v3435_v52 }
 0x4af   : > { %v2490_v12 = vpop.f32.mrb[253].mxu0 }
 0x4b0   : > { %v2491_v56 = vpop.f32.mrb[254].mxu0 }
 0x4b1   : > { %v2782_v18 = vpack.c.bf16 %v2491_v56, %v2488_v10  ;;  %v2493_v57 = vpop.f32.mrb[255].mxu0 }
 0x4b3   : > { %2703 = vmatmul.mubr.bf16.gmra.mrb[104].mxu0 %v6226_v53  ;;  %5723 = vmatmul.mubr.bf16.gmra.mrb[60].mxu1 %v2782_v18  ;;  %v6241_v53 = vld [vmem:[#allocation5 + $0x3e0] ss:$8 sps:$4 sm:$0xff]  }
 0x4b4   : > { %2710 = vmatprep.mubr.bf16.mxu0 %v6231_v17  ;;  %v6246_v17 = vld [vmem:[#allocation5 + $0x3f4] ss:$8 sps:$4 sm:$0xff]  }
 0x4b6   : > { %v5672_v30 = vpop.f32.mrb[8].mxu1  ;;  %v2496_v55 = vpop.f32.mrb[0].mxu0 }
 0x4b7   : > { %v2961_v60 = vadd.f32 %v5672_v30, %v7160_v42  ;;  %v2952_v61 = vpop.f32.mrb[9].mxu1  ;;  %v2498_v13 = vpop.f32.mrb[1].mxu0 }
 0x4b8   : > { %v2953_v2 = vadd.f32 %v7160_v42, %v2952_v61  ;;  %v5673_v5 = vpop.f32.mrb[10].mxu1  ;;  %v2499_v46 = vpop.f32.mrb[2].mxu0 }
 0x4b9   : > { %v2964_v16 = vadd.f32 %v5673_v5, %v7160_v42  ;;  %v2955_v34 = vpop.f32.mrb[11].mxu1  ;;  %v2783_v59 = vpack.c.bf16 %v2499_v46, %v2496_v55  ;;  %v2501_v9 = vpop.f32.mrb[3].mxu0  ;;  %v3441_v14 = vmax.f32 %v2961_v60, 0.0 }
 0x4ba   : > { %v2956_v11 = vadd.f32 %v7160_v42, %v2955_v34  ;;  %v3439_v15 = vmax.f32 %v2953_v2, 0.0 }
 0x4bb   : > { %v3442_v50 = vmax.f32 %v2964_v16, 0.0  ;;  %2711 = vmatmul.mubr.bf16.gmra.mrb[108].mxu0 %v6229_v0  ;;  %5726 = vmatprep.mubr.bf16.mxu1 %v2783_v59  ;;  %v6244_v0 = vld [vmem:[#allocation5 + $0x3f0] ss:$8 sps:$4 sm:$0xff]  }
 0x4bc   : > { %v3440_v62 = vmax.f32 %v2956_v11, 0.0  ;;  %2718 = vmatprep.mubr.bf16.mxu0 %v6237_v6 }
 0x4bd   : > { %v7182_v19 = vpack.c.bf16 %v3442_v50, %v3441_v14 }
 0x4be   : > { %v2504_v39 = vpop.f32.mrb[4].mxu0  ;;  %v7184_v20 = vpack.c.bf16 %v3440_v62, %v3439_v15 }
 0x4bf   : > { %v2506_v22 = vpop.f32.mrb[5].mxu0 }
 0x4c0   : > { %v2507_v28 = vpop.f32.mrb[6].mxu0 }
 0x4c1   : > { %v2784_v1 = vpack.c.bf16 %v2507_v28, %v2504_v39  ;;  %v2509_v31 = vpop.f32.mrb[7].mxu0 }
 0x4c3   : > { %2719 = vmatmul.mubr.bf16.gmra.mrb[112].mxu0 %v6235_v54  ;;  %5727 = vmatmul.mubr.bf16.gmra.mrb[64].mxu1 %v2784_v1 }
 0x4c4   : > { %2726 = vmatprep.mubr.bf16.mxu0 %v6240_v58 }
 0x4c6   : > { %v5676_v43 = vpop.f32.mrb[12].mxu1  ;;  %v2512_v32 = vpop.f32.mrb[8].mxu0 }
 0x4c7   : > { %v2977_v63 = vadd.f32 %v5676_v43, %v7160_v42  ;;  %v2968_v25 = vpop.f32.mrb[13].mxu1  ;;  %v2514_v35 = vpop.f32.mrb[9].mxu0 }
 0x4c8   : > { %v2969_v36 = vadd.f32 %v7160_v42, %v2968_v25  ;;  %v5677_v40 = vpop.f32.mrb[14].mxu1  ;;  %v2515_v29 = vpop.f32.mrb[10].mxu0 }
 0x4c9   : > { %v2980_v3 = vadd.f32 %v5677_v40, %v7160_v42  ;;  %v2971_v41 = vpop.f32.mrb[15].mxu1  ;;  %v2785_v44 = vpack.c.bf16 %v2515_v29, %v2512_v32  ;;  %v2517_v45 = vpop.f32.mrb[11].mxu0  ;;  %v3445_v8 = vmax.f32 %v2977_v63, 0.0 }
 0x4ca   : > { %v2972_v48 = vadd.f32 %v7160_v42, %v2971_v41  ;;  %v3443_v49 = vmax.f32 %v2969_v36, 0.0 }
 0x4cb   : > { %v3446_v7 = vmax.f32 %v2980_v3, 0.0  ;;  %2727 = vmatmul.mubr.bf16.gmra.mrb[116].mxu0 %v6238_v4  ;;  %5730 = vmatprep.mubr.bf16.mxu1 %v2785_v44 }
 0x4cc   : > { %v3444_v33 = vmax.f32 %v2972_v48, 0.0  ;;  %2734 = vmatprep.mubr.bf16.mxu0 %v6243_v47 }
 0x4cd   : > { %v7190_v52 = vpack.c.bf16 %v3446_v7, %v3445_v8 }
 0x4ce   : > { %v2520_v26 = vpop.f32.mrb[12].mxu0  ;;  %v7192_v10 = vpack.c.bf16 %v3444_v33, %v3443_v49 }
 0x4cf   : > { %v2522_v12 = vpop.f32.mrb[13].mxu0 }
 0x4d0   : > { %v2523_v56 = vpop.f32.mrb[14].mxu0 }
 0x4d1   : > { %v2786_v18 = vpack.c.bf16 %v2523_v56, %v2520_v26  ;;  %v2525_v57 = vpop.f32.mrb[15].mxu0 }
 0x4d3   : > { %2735 = vmatmul.mubr.bf16.gmra.mrb[120].mxu0 %v6241_v53  ;;  %5731 = vmatmul.mubr.bf16.gmra.mrb[68].mxu1 %v2786_v18 }
 0x4d4   : > { %2742 = vmatprep.mubr.bf16.mxu0 %v6246_v17 }
 0x4d6   : > { %v5680_v30 = vpop.f32.mrb[16].mxu1  ;;  %v2528_v55 = vpop.f32.mrb[16].mxu0 }
 0x4d7   : > { %v2993_v60 = vadd.f32 %v5680_v30, %v7160_v42  ;;  %v2984_v61 = vpop.f32.mrb[17].mxu1  ;;  %v2530_v13 = vpop.f32.mrb[17].mxu0 }
 0x4d8   : > { %v2985_v2 = vadd.f32 %v7160_v42, %v2984_v61  ;;  %v5681_v5 = vpop.f32.mrb[18].mxu1  ;;  %v2531_v46 = vpop.f32.mrb[18].mxu0 }
 0x4d9   : > { %v2996_v6 = vadd.f32 %v5681_v5, %v7160_v42  ;;  %v2987_v16 = vpop.f32.mrb[19].mxu1  ;;  %v2787_v34 = vpack.c.bf16 %v2531_v46, %v2528_v55  ;;  %v2533_v59 = vpop.f32.mrb[19].mxu0  ;;  %v3449_v11 = vmax.f32 %v2993_v60, 0.0 }
 0x4da   : > { %v2988_v9 = vadd.f32 %v7160_v42, %v2987_v16  ;;  %v3447_v50 = vmax.f32 %v2985_v2, 0.0 }
 0x4db   : > { %v3450_v14 = vmax.f32 %v2996_v6, 0.0  ;;  %2743 = vmatmul.mubr.bf16.gmra.mrb[124].mxu0 %v6244_v0  ;;  %5734 = vmatprep.mubr.bf16.mxu1 %v2787_v34 }
 0x4dc   : > { %v3448_v15 = vmax.f32 %v2988_v9, 0.0 }
 0x4dd   : > { %v7198_v62 = vpack.c.bf16 %v3450_v14, %v3449_v11 }
 0x4de   : > { %v2536_v39 = vpop.f32.mrb[20].mxu0  ;;  %v7200_v54 = vpack.c.bf16 %v3448_v15, %v3447_v50 }
 0x4df   : > { %v2538_v22 = vpop.f32.mrb[21].mxu0 }
 0x4e0   : > { %v2539_v28 = vpop.f32.mrb[22].mxu0  ;;  %v6264_v22 = vld [vmem:[#allocation13 + $0x64] ss:$8 sps:$4 sm:$0xff]  }
 0x4e1   : > { %v2788_v58 = vpack.c.bf16 %v2539_v28, %v2536_v39  ;;  %v2541_v1 = vpop.f32.mrb[23].mxu0  ;;  %v6262_v39 = vld [vmem:[#allocation13 + $0x60] ss:$8 sps:$4 sm:$0xff]   ;;  %3743 = vmatprep.subr.bf16.mxu1 %v6264_v22 }
 0x4e2   : > { %3744 = vmatpush1.bf16.msra.mxu1 %v6262_v39 }
 0x4e3   : > { %5735 = vmatmul.mubr.bf16.gmra.mrb[72].mxu1 %v2788_v58 }
 0x4e6   : > { %v5684_v31 = vpop.f32.mrb[20].mxu1  ;;  %v2544_v43 = vpop.f32.mrb[24].mxu0 }
 0x4e7   : > { %v3009_v32 = vadd.f32 %v5684_v31, %v7160_v42  ;;  %v3000_v63 = vpop.f32.mrb[21].mxu1  ;;  %v2546_v25 = vpop.f32.mrb[25].mxu0 }
 0x4e8   : > { %v3001_v35 = vadd.f32 %v7160_v42, %v3000_v63  ;;  %v5685_v4 = vpop.f32.mrb[22].mxu1  ;;  %v2547_v36 = vpop.f32.mrb[26].mxu0 }
 0x4e9   : > { %v3012_v40 = vadd.f32 %v5685_v4, %v7160_v42  ;;  %v3003_v29 = vpop.f32.mrb[23].mxu1  ;;  %v2789_v47 = vpack.c.bf16 %v2547_v36, %v2544_v43  ;;  %v2549_v3 = vpop.f32.mrb[27].mxu0  ;;  %v3453_v44 = vmax.f32 %v3009_v32, 0.0 }
 0x4ea   : > { %v3004_v41 = vadd.f32 %v7160_v42, %v3003_v29  ;;  %v3451_v48 = vmax.f32 %v3001_v35, 0.0 }
 0x4eb   : > { %v3454_v45 = vmax.f32 %v3012_v40, 0.0  ;;  %5738 = vmatprep.mubr.bf16.mxu1 %v2789_v47 }
 0x4ec   : > { %v3452_v8 = vmax.f32 %v3004_v41, 0.0 }
 0x4ed   : > { %v7206_v7 = vpack.c.bf16 %v3454_v45, %v3453_v44 }
 0x4ee   : > { %v2552_v49 = vpop.f32.mrb[28].mxu0  ;;  %v7208_v33 = vpack.c.bf16 %v3452_v8, %v3451_v48 }
 0x4ef   : > { %v2554_v26 = vpop.f32.mrb[29].mxu0 }
 0x4f0   : > { %v2555_v12 = vpop.f32.mrb[30].mxu0 }
 0x4f1   : > { %v2790_v53 = vpack.c.bf16 %v2555_v12, %v2552_v49  ;;  %v2557_v56 = vpop.f32.mrb[31].mxu0 }
 0x4f3   : > { %5739 = vmatmul.mubr.bf16.gmra.mrb[76].mxu1 %v2790_v53 }
 0x4f6   : > { %v5688_v17 = vpop.f32.mrb[24].mxu1  ;;  %v2560_v18 = vpop.f32.mrb[32].mxu0 }
 0x4f7   : > { %v3025_v57 = vadd.f32 %v5688_v17, %v7160_v42  ;;  %v3016_v30 = vpop.f32.mrb[25].mxu1  ;;  %v2562_v55 = vpop.f32.mrb[33].mxu0 }
 0x4f8   : > { %v3017_v60 = vadd.f32 %v7160_v42, %v3016_v30  ;;  %v5689_v61 = vpop.f32.mrb[26].mxu1  ;;  %v2563_v13 = vpop.f32.mrb[34].mxu0 }
 0x4f9   : > { %v3028_v0 = vadd.f32 %v5689_v61, %v7160_v42  ;;  %v3019_v2 = vpop.f32.mrb[27].mxu1  ;;  %v2791_v5 = vpack.c.bf16 %v2563_v13, %v2560_v18  ;;  %v2565_v46 = vpop.f32.mrb[35].mxu0  ;;  %v3457_v16 = vmax.f32 %v3025_v57, 0.0 }
 0x4fa   : > { %v3020_v6 = vadd.f32 %v7160_v42, %v3019_v2  ;;  %v3455_v59 = vmax.f32 %v3017_v60, 0.0 }
 0x4fb   : > { %v3458_v34 = vmax.f32 %v3028_v0, 0.0  ;;  %5742 = vmatprep.mubr.bf16.mxu1 %v2791_v5 }
 0x4fc   : > { %v3456_v9 = vmax.f32 %v3020_v6, 0.0 }
 0x4fd   : > { %v7214_v11 = vpack.c.bf16 %v3458_v34, %v3457_v16 }
 0x4fe   : > { %v2568_v14 = vpop.f32.mrb[36].mxu0  ;;  %v7216_v50 = vpack.c.bf16 %v3456_v9, %v3455_v59 }
 0x4ff   : > { %v2570_v15 = vpop.f32.mrb[37].mxu0 }
 0x500   : > { %v2571_v24 = vpop.f32.mrb[38].mxu0 }
 0x501   : > { %v2792_v27 = vpack.c.bf16 %v2571_v24, %v2568_v14  ;;  %v2573_v28 = vpop.f32.mrb[39].mxu0  ;;  %v6265_v24 = vld [vmem:[#allocation13 + $0x70] ss:$8 sps:$4 sm:$0xff]  }
 0x503   : > { %5743 = vmatmul.mubr.bf16.gmra.mrb[80].mxu1 %v2792_v27  ;;  %v6267_v27 = vld [vmem:[#allocation13 + $0x74] ss:$8 sps:$4 sm:$0xff]  }
 0x504   : > { %3745 = vmatprep.subr.bf16.mxu1 %v6267_v27 }
 0x505   : > { %3746 = vmatpush1.bf16.msra.mxu1 %v6265_v24 }
 0x506   : > { %v5692_v58 = vpop.f32.mrb[28].mxu1  ;;  %v2576_v1 = vpop.f32.mrb[40].mxu0 }
 0x507   : > { %v3041_v31 = vadd.f32 %v5692_v58, %v7160_v42  ;;  %v3032_v43 = vpop.f32.mrb[29].mxu1  ;;  %v2578_v32 = vpop.f32.mrb[41].mxu0 }
 0x508   : > { %v3033_v63 = vadd.f32 %v7160_v42, %v3032_v43  ;;  %v5693_v25 = vpop.f32.mrb[30].mxu1  ;;  %v2579_v35 = vpop.f32.mrb[42].mxu0 }
 0x509   : > { %v3044_v4 = vadd.f32 %v5693_v25, %v7160_v42  ;;  %v3035_v36 = vpop.f32.mrb[31].mxu1  ;;  %v2793_v40 = vpack.c.bf16 %v2579_v35, %v2576_v1  ;;  %v2581_v29 = vpop.f32.mrb[43].mxu0  ;;  %v3461_v3 = vmax.f32 %v3041_v31, 0.0 }
 0x50a   : > { %v3036_v47 = vadd.f32 %v7160_v42, %v3035_v36  ;;  %v3459_v44 = vmax.f32 %v3033_v63, 0.0 }
 0x50b   : > { %v3462_v41 = vmax.f32 %v3044_v4, 0.0  ;;  %5746 = vmatprep.mubr.bf16.mxu1 %v2793_v40 }
 0x50c   : > { %v3460_v45 = vmax.f32 %v3036_v47, 0.0 }
 0x50d   : > { %v7222_v48 = vpack.c.bf16 %v3462_v41, %v3461_v3 }
 0x50e   : > { %v2584_v8 = vpop.f32.mrb[44].mxu0  ;;  %v7224_v49 = vpack.c.bf16 %v3460_v45, %v3459_v44 }
 0x50f   : > { %v2586_v26 = vpop.f32.mrb[45].mxu0 }
 0x510   : > { %v2587_v12 = vpop.f32.mrb[46].mxu0 }
 0x511   : > { %v2794_v53 = vpack.c.bf16 %v2587_v12, %v2584_v8  ;;  %v2589_v56 = vpop.f32.mrb[47].mxu0 }
 0x513   : > { %5747 = vmatmul.mubr.bf16.gmra.mrb[84].mxu1 %v2794_v53 }
 0x516   : > { %v5696_v17 = vpop.f32.mrb[32].mxu1  ;;  %v2592_v18 = vpop.f32.mrb[48].mxu0 }
 0x517   : > { %v3057_v57 = vadd.f32 %v5696_v17, %v7160_v42  ;;  %v3048_v30 = vpop.f32.mrb[33].mxu1  ;;  %v2594_v55 = vpop.f32.mrb[49].mxu0 }
 0x518   : > { %v3049_v60 = vadd.f32 %v7160_v42, %v3048_v30  ;;  %v5697_v61 = vpop.f32.mrb[34].mxu1  ;;  %v2595_v13 = vpop.f32.mrb[50].mxu0 }
 0x519   : > { %v3060_v0 = vadd.f32 %v5697_v61, %v7160_v42  ;;  %v3051_v2 = vpop.f32.mrb[35].mxu1  ;;  %v2795_v5 = vpack.c.bf16 %v2595_v13, %v2592_v18  ;;  %v2597_v46 = vpop.f32.mrb[51].mxu0  ;;  %v3465_v16 = vmax.f32 %v3057_v57, 0.0 }
 0x51a   : > { %v3052_v6 = vadd.f32 %v7160_v42, %v3051_v2  ;;  %v3463_v59 = vmax.f32 %v3049_v60, 0.0 }
 0x51b   : > { %v3466_v34 = vmax.f32 %v3060_v0, 0.0  ;;  %5750 = vmatprep.mubr.bf16.mxu1 %v2795_v5 }
 0x51c   : > { %v3464_v9 = vmax.f32 %v3052_v6, 0.0 }
 0x51d   : > { %v7230_v14 = vpack.c.bf16 %v3466_v34, %v3465_v16 }
 0x51e   : > { %v2600_v15 = vpop.f32.mrb[52].mxu0  ;;  %v7232_v39 = vpack.c.bf16 %v3464_v9, %v3463_v59 }
 0x51f   : > { %v2602_v22 = vpop.f32.mrb[53].mxu0 }
 0x520   : > { %v2603_v28 = vpop.f32.mrb[54].mxu0 }
 0x521   : > { %v2796_v58 = vpack.c.bf16 %v2603_v28, %v2600_v15  ;;  %v2605_v1 = vpop.f32.mrb[55].mxu0 }
 0x523   : > { %5751 = vmatmul.mubr.bf16.gmra.mrb[88].mxu1 %v2796_v58 }
 0x526   : > { %v5700_v31 = vpop.f32.mrb[36].mxu1  ;;  %v2608_v43 = vpop.f32.mrb[56].mxu0 }
 0x527   : > { %v3073_v32 = vadd.f32 %v5700_v31, %v7160_v42  ;;  %v3064_v63 = vpop.f32.mrb[37].mxu1  ;;  %v2610_v25 = vpop.f32.mrb[57].mxu0 }
 0x528   : > { %v3065_v35 = vadd.f32 %v7160_v42, %v3064_v63  ;;  %v5701_v4 = vpop.f32.mrb[38].mxu1  ;;  %v2611_v36 = vpop.f32.mrb[58].mxu0 }
 0x529   : > { %v3076_v40 = vadd.f32 %v5701_v4, %v7160_v42  ;;  %v3067_v29 = vpop.f32.mrb[39].mxu1  ;;  %v2797_v47 = vpack.c.bf16 %v2611_v36, %v2608_v43  ;;  %v2613_v3 = vpop.f32.mrb[59].mxu0  ;;  %v3469_v44 = vmax.f32 %v3073_v32, 0.0 }
 0x52a   : > { %v3068_v41 = vadd.f32 %v7160_v42, %v3067_v29  ;;  %v3467_v8 = vmax.f32 %v3065_v35, 0.0 }
 0x52b   : > { %v3470_v45 = vmax.f32 %v3076_v40, 0.0  ;;  %5754 = vmatprep.mubr.bf16.mxu1 %v2797_v47 }
 0x52c   : > { %v3468_v26 = vmax.f32 %v3068_v41, 0.0 }
 0x52d   : > { %v7238_v12 = vpack.c.bf16 %v3470_v45, %v3469_v44 }
 0x52e   : > { %v2616_v53 = vpop.f32.mrb[60].mxu0  ;;  %v7240_v56 = vpack.c.bf16 %v3468_v26, %v3467_v8 }
 0x52f   : > { %v2618_v17 = vpop.f32.mrb[61].mxu0 }
 0x530   : > { %v2619_v18 = vpop.f32.mrb[62].mxu0 }
 0x531   : > { %v2798_v57 = vpack.c.bf16 %v2619_v18, %v2616_v53  ;;  %v2621_v30 = vpop.f32.mrb[63].mxu0 }
 0x533   : > { %5755 = vmatmul.mubr.bf16.gmra.mrb[92].mxu1 %v2798_v57 }
 0x536   : > { %v5704_v55 = vpop.f32.mrb[40].mxu1  ;;  %v2624_v60 = vpop.f32.mrb[64].mxu0 }
 0x537   : > { %v3089_v61 = vadd.f32 %v5704_v55, %v7160_v42  ;;  %v3080_v13 = vpop.f32.mrb[41].mxu1  ;;  %v2626_v0 = vpop.f32.mrb[65].mxu0 }
 0x538   : > { %v3081_v2 = vadd.f32 %v7160_v42, %v3080_v13  ;;  %v5705_v5 = vpop.f32.mrb[42].mxu1  ;;  %v2627_v46 = vpop.f32.mrb[66].mxu0 }
 0x539   : > { %v3092_v6 = vadd.f32 %v5705_v5, %v7160_v42  ;;  %v3083_v16 = vpop.f32.mrb[43].mxu1  ;;  %v2799_v34 = vpack.c.bf16 %v2627_v46, %v2624_v60  ;;  %v2629_v59 = vpop.f32.mrb[67].mxu0  ;;  %v3473_v15 = vmax.f32 %v3089_v61, 0.0 }
 0x53a   : > { %v3084_v9 = vadd.f32 %v7160_v42, %v3083_v16  ;;  %v3471_v24 = vmax.f32 %v3081_v2, 0.0 }
 0x53b   : > { %v3474_v22 = vmax.f32 %v3092_v6, 0.0  ;;  %5758 = vmatprep.mubr.bf16.mxu1 %v2799_v34 }
 0x53c   : > { %v3472_v27 = vmax.f32 %v3084_v9, 0.0 }
 0x53d   : > { %v7246_v28 = vpack.c.bf16 %v3474_v22, %v3473_v15 }
 0x53e   : > { %v2632_v58 = vpop.f32.mrb[68].mxu0  ;;  %v7248_v1 = vpack.c.bf16 %v3472_v27, %v3471_v24 }
 0x53f   : > { %v2634_v31 = vpop.f32.mrb[69].mxu0 }
 0x540   : > { %v2635_v43 = vpop.f32.mrb[70].mxu0 }
 0x541   : > { %v2800_v32 = vpack.c.bf16 %v2635_v43, %v2632_v58  ;;  %v2637_v63 = vpop.f32.mrb[71].mxu0 }
 0x543   : > { %5759 = vmatmul.mubr.bf16.gmra.mrb[96].mxu1 %v2800_v32 }
 0x546   : > { %v5708_v25 = vpop.f32.mrb[44].mxu1  ;;  %v2640_v35 = vpop.f32.mrb[72].mxu0 }
 0x547   : > { %v3105_v4 = vadd.f32 %v5708_v25, %v7160_v42  ;;  %v3096_v36 = vpop.f32.mrb[45].mxu1  ;;  %v2642_v40 = vpop.f32.mrb[73].mxu0 }
 0x548   : > { %v3097_v29 = vadd.f32 %v7160_v42, %v3096_v36  ;;  %v5709_v47 = vpop.f32.mrb[46].mxu1  ;;  %v2643_v3 = vpop.f32.mrb[74].mxu0 }
 0x549   : > { %v3108_v41 = vadd.f32 %v5709_v47, %v7160_v42  ;;  %v3099_v44 = vpop.f32.mrb[47].mxu1  ;;  %v2801_v45 = vpack.c.bf16 %v2643_v3, %v2640_v35  ;;  %v2645_v8 = vpop.f32.mrb[75].mxu0  ;;  %v3477_v53 = vmax.f32 %v3105_v4, 0.0 }
 0x54a   : > { %v3100_v26 = vadd.f32 %v7160_v42, %v3099_v44  ;;  %v3475_v18 = vmax.f32 %v3097_v29, 0.0 }
 0x54b   : > { %v3478_v17 = vmax.f32 %v3108_v41, 0.0  ;;  %5762 = vmatprep.mubr.bf16.mxu1 %v2801_v45 }
 0x54c   : > { %v3476_v57 = vmax.f32 %v3100_v26, 0.0 }
 0x54d   : > { %v7254_v30 = vpack.c.bf16 %v3478_v17, %v3477_v53 }
 0x54e   : > { %v2648_v55 = vpop.f32.mrb[76].mxu0  ;;  %v7256_v60 = vpack.c.bf16 %v3476_v57, %v3475_v18 }
 0x54f   : > { %v2650_v61 = vpop.f32.mrb[77].mxu0 }
 0x550   : > { %v2651_v13 = vpop.f32.mrb[78].mxu0 }
 0x551   : > { %v2802_v0 = vpack.c.bf16 %v2651_v13, %v2648_v55  ;;  %v2653_v2 = vpop.f32.mrb[79].mxu0 }
 0x553   : > { %5763 = vmatmul.mubr.bf16.gmra.mrb[100].mxu1 %v2802_v0 }
 0x556   : > { %v5712_v5 = vpop.f32.mrb[48].mxu1  ;;  %v2656_v46 = vpop.f32.mrb[80].mxu0 }
 0x557   : > { %v3121_v6 = vadd.f32 %v5712_v5, %v7160_v42  ;;  %v3112_v16 = vpop.f32.mrb[49].mxu1  ;;  %v2658_v34 = vpop.f32.mrb[81].mxu0 }
 0x558   : > { %v3113_v59 = vadd.f32 %v7160_v42, %v3112_v16  ;;  %v5713_v9 = vpop.f32.mrb[50].mxu1  ;;  %v2659_v15 = vpop.f32.mrb[82].mxu0 }
 0x559   : > { %v3124_v22 = vadd.f32 %v5713_v9, %v7160_v42  ;;  %v3115_v24 = vpop.f32.mrb[51].mxu1  ;;  %v2803_v27 = vpack.c.bf16 %v2659_v15, %v2656_v46  ;;  %v2661_v58 = vpop.f32.mrb[83].mxu0  ;;  %v3481_v43 = vmax.f32 %v3121_v6, 0.0 }
 0x55a   : > { %v3116_v31 = vadd.f32 %v7160_v42, %v3115_v24  ;;  %v3479_v63 = vmax.f32 %v3113_v59, 0.0 }
 0x55b   : > { %v3482_v32 = vmax.f32 %v3124_v22, 0.0  ;;  %5766 = vmatprep.mubr.bf16.mxu1 %v2803_v27 }
 0x55c   : > { %v3480_v25 = vmax.f32 %v3116_v31, 0.0 }
 0x55d   : > { %v7262_v35 = vpack.c.bf16 %v3482_v32, %v3481_v43 }
 0x55e   : > { %v2664_v4 = vpop.f32.mrb[84].mxu0  ;;  %v7264_v36 = vpack.c.bf16 %v3480_v25, %v3479_v63 }
 0x55f   : > { %v2666_v40 = vpop.f32.mrb[85].mxu0 }
 0x560   : > { %v2667_v29 = vpop.f32.mrb[86].mxu0 }
 0x561   : > { %v2804_v47 = vpack.c.bf16 %v2667_v29, %v2664_v4  ;;  %v2669_v3 = vpop.f32.mrb[87].mxu0 }
 0x563   : > { %5767 = vmatmul.mubr.bf16.gmra.mrb[104].mxu1 %v2804_v47 }
 0x566   : > { %v5716_v41 = vpop.f32.mrb[52].mxu1  ;;  %v2672_v44 = vpop.f32.mrb[88].mxu0 }
 0x567   : > { %v3137_v45 = vadd.f32 %v5716_v41, %v7160_v42  ;;  %v3128_v8 = vpop.f32.mrb[53].mxu1  ;;  %v2674_v26 = vpop.f32.mrb[89].mxu0 }
 0x568   : > { %v3129_v53 = vadd.f32 %v7160_v42, %v3128_v8  ;;  %v5717_v17 = vpop.f32.mrb[54].mxu1  ;;  %v2675_v18 = vpop.f32.mrb[90].mxu0 }
 0x569   : > { %v3140_v57 = vadd.f32 %v5717_v17, %v7160_v42  ;;  %v3131_v55 = vpop.f32.mrb[55].mxu1  ;;  %v2805_v61 = vpack.c.bf16 %v2675_v18, %v2672_v44  ;;  %v2677_v13 = vpop.f32.mrb[91].mxu0  ;;  %v3485_v2 = vmax.f32 %v3137_v45, 0.0 }
 0x56a   : > { %v3132_v0 = vadd.f32 %v7160_v42, %v3131_v55  ;;  %v3483_v46 = vmax.f32 %v3129_v53, 0.0 }
 0x56b   : > { %v3486_v5 = vmax.f32 %v3140_v57, 0.0  ;;  %5770 = vmatprep.mubr.bf16.mxu1 %v2805_v61 }
 0x56c   : > { %v3484_v6 = vmax.f32 %v3132_v0, 0.0 }
 0x56d   : > { %v7270_v16 = vpack.c.bf16 %v3486_v5, %v3485_v2 }
 0x56e   : > { %v2680_v34 = vpop.f32.mrb[92].mxu0  ;;  %v7272_v59 = vpack.c.bf16 %v3484_v6, %v3483_v46 }
 0x56f   : > { %v2682_v9 = vpop.f32.mrb[93].mxu0 }
 0x570   : > { %v2683_v15 = vpop.f32.mrb[94].mxu0 }
 0x571   : > { %v2806_v22 = vpack.c.bf16 %v2683_v15, %v2680_v34  ;;  %v2685_v24 = vpop.f32.mrb[95].mxu0 }
 0x573   : > { %5771 = vmatmul.mubr.bf16.gmra.mrb[108].mxu1 %v2806_v22 }
 0x576   : > { %v5720_v27 = vpop.f32.mrb[56].mxu1  ;;  %v2688_v58 = vpop.f32.mrb[96].mxu0 }
 0x577   : > { %v3153_v31 = vadd.f32 %v5720_v27, %v7160_v42  ;;  %v3144_v43 = vpop.f32.mrb[57].mxu1  ;;  %v2690_v32 = vpop.f32.mrb[97].mxu0 }
 0x578   : > { %v3145_v63 = vadd.f32 %v7160_v42, %v3144_v43  ;;  %v5721_v25 = vpop.f32.mrb[58].mxu1  ;;  %v2691_v4 = vpop.f32.mrb[98].mxu0 }
 0x579   : > { %v3156_v40 = vadd.f32 %v5721_v25, %v7160_v42  ;;  %v3147_v29 = vpop.f32.mrb[59].mxu1  ;;  %v2807_v47 = vpack.c.bf16 %v2691_v4, %v2688_v58  ;;  %v2693_v3 = vpop.f32.mrb[99].mxu0  ;;  %v3489_v44 = vmax.f32 %v3153_v31, 0.0 }
 0x57a   : > { %v3148_v41 = vadd.f32 %v7160_v42, %v3147_v29  ;;  %v3487_v8 = vmax.f32 %v3145_v63, 0.0 }
 0x57b   : > { %v3490_v45 = vmax.f32 %v3156_v40, 0.0  ;;  %5774 = vmatprep.mubr.bf16.mxu1 %v2807_v47 }
 0x57c   : > { %v3488_v26 = vmax.f32 %v3148_v41, 0.0 }
 0x57d   : > { %v7278_v53 = vpack.c.bf16 %v3490_v45, %v3489_v44 }
 0x57e   : > { %v2696_v17 = vpop.f32.mrb[100].mxu0  ;;  %v7280_v18 = vpack.c.bf16 %v3488_v26, %v3487_v8 }
 0x57f   : > { %v2698_v57 = vpop.f32.mrb[101].mxu0 }
 0x580   : > { %v2699_v55 = vpop.f32.mrb[102].mxu0 }
 0x581   : > { %v2808_v61 = vpack.c.bf16 %v2699_v55, %v2696_v17  ;;  %v2701_v13 = vpop.f32.mrb[103].mxu0 }
 0x583   : > { %5775 = vmatmul.mubr.bf16.gmra.mrb[112].mxu1 %v2808_v61 }
 0x586   : > { %v5724_v0 = vpop.f32.mrb[60].mxu1  ;;  %v2704_v2 = vpop.f32.mrb[104].mxu0 }
 0x587   : > { %v3169_v5 = vadd.f32 %v5724_v0, %v7160_v42  ;;  %v3160_v46 = vpop.f32.mrb[61].mxu1  ;;  %v2706_v6 = vpop.f32.mrb[105].mxu0 }
 0x588   : > { %v3161_v34 = vadd.f32 %v7160_v42, %v3160_v46  ;;  %v5725_v9 = vpop.f32.mrb[62].mxu1  ;;  %v2707_v15 = vpop.f32.mrb[106].mxu0 }
 0x589   : > { %v3172_v22 = vadd.f32 %v5725_v9, %v7160_v42  ;;  %v3163_v24 = vpop.f32.mrb[63].mxu1  ;;  %v2809_v27 = vpack.c.bf16 %v2707_v15, %v2704_v2  ;;  %v2709_v58 = vpop.f32.mrb[107].mxu0  ;;  %v3493_v43 = vmax.f32 %v3169_v5, 0.0 }
 0x58a   : > { %v3164_v31 = vadd.f32 %v7160_v42, %v3163_v24  ;;  %v3491_v63 = vmax.f32 %v3161_v34, 0.0 }
 0x58b   : > { %v3494_v32 = vmax.f32 %v3172_v22, 0.0  ;;  %5778 = vmatprep.mubr.bf16.mxu1 %v2809_v27 }
 0x58c   : > { %v3492_v25 = vmax.f32 %v3164_v31, 0.0 }
 0x58d   : > { %v7286_v4 = vpack.c.bf16 %v3494_v32, %v3493_v43 }
 0x58e   : > { %v2712_v40 = vpop.f32.mrb[108].mxu0  ;;  %v7288_v29 = vpack.c.bf16 %v3492_v25, %v3491_v63 }
 0x58f   : > { %v2714_v47 = vpop.f32.mrb[109].mxu0 }
 0x590   : > { %v2715_v3 = vpop.f32.mrb[110].mxu0 }
 0x591   : > { %v2810_v41 = vpack.c.bf16 %v2715_v3, %v2712_v40  ;;  %v2717_v44 = vpop.f32.mrb[111].mxu0 }
 0x593   : > { %5779 = vmatmul.mubr.bf16.gmra.mrb[116].mxu1 %v2810_v41 }
 0x596   : > { %v5728_v45 = vpop.f32.mrb[64].mxu1  ;;  %v2720_v8 = vpop.f32.mrb[112].mxu0 }
 0x597   : > { %v3185_v26 = vadd.f32 %v5728_v45, %v7160_v42  ;;  %v3176_v17 = vpop.f32.mrb[65].mxu1  ;;  %v2722_v57 = vpop.f32.mrb[113].mxu0 }
 0x598   : > { %v3177_v55 = vadd.f32 %v7160_v42, %v3176_v17  ;;  %v5729_v61 = vpop.f32.mrb[66].mxu1  ;;  %v2723_v13 = vpop.f32.mrb[114].mxu0 }
 0x599   : > { %v3188_v0 = vadd.f32 %v5729_v61, %v7160_v42  ;;  %v3179_v2 = vpop.f32.mrb[67].mxu1  ;;  %v2811_v5 = vpack.c.bf16 %v2723_v13, %v2720_v8  ;;  %v2725_v46 = vpop.f32.mrb[115].mxu0  ;;  %v3497_v34 = vmax.f32 %v3185_v26, 0.0 }
 0x59a   : > { %v3180_v6 = vadd.f32 %v7160_v42, %v3179_v2  ;;  %v3495_v15 = vmax.f32 %v3177_v55, 0.0 }
 0x59b   : > { %v3498_v9 = vmax.f32 %v3188_v0, 0.0  ;;  %5782 = vmatprep.mubr.bf16.mxu1 %v2811_v5 }
 0x59c   : > { %v3496_v22 = vmax.f32 %v3180_v6, 0.0 }
 0x59d   : > { %v7294_v24 = vpack.c.bf16 %v3498_v9, %v3497_v34 }
 0x59e   : > { %v7296_v27 = vpack.c.bf16 %v3496_v22, %v3495_v15  ;;  %v2728_v58 = vpop.f32.mrb[116].mxu0 }
 0x59f   : > { %v2730_v31 = vpop.f32.mrb[117].mxu0 }
 0x5a0   : > { %v2731_v43 = vpop.f32.mrb[118].mxu0 }
 0x5a1   : > { %v2812_v32 = vpack.c.bf16 %v2731_v43, %v2728_v58  ;;  %v2733_v63 = vpop.f32.mrb[119].mxu0  ;;  %v7307_v43 = vld [vmem:[#allocation11] ss:$0 sm:$0xff] }
 0x5a3   : > { %5783 = vmatmul.mubr.bf16.gmra.mrb[120].mxu1 %v2812_v32 }
 0x5a6   : > { %v5732_v25 = vpop.f32.mrb[68].mxu1  ;;  %v2736_v40 = vpop.f32.mrb[120].mxu0 }
 0x5a7   : > { %v3201_v47 = vadd.f32 %v5732_v25, %v7160_v42  ;;  %v3192_v3 = vpop.f32.mrb[69].mxu1  ;;  %v2738_v41 = vpop.f32.mrb[121].mxu0 }
 0x5a8   : > { %v3193_v44 = vadd.f32 %v7160_v42, %v3192_v3  ;;  %v5733_v45 = vpop.f32.mrb[70].mxu1  ;;  %v2739_v8 = vpop.f32.mrb[122].mxu0 }
 0x5a9   : > { %v3204_v26 = vadd.f32 %v5733_v45, %v7160_v42  ;;  %v3195_v17 = vpop.f32.mrb[71].mxu1  ;;  %v2813_v57 = vpack.c.bf16 %v2739_v8, %v2736_v40  ;;  %v2741_v55 = vpop.f32.mrb[123].mxu0  ;;  %v3501_v13 = vmax.f32 %v3201_v47, 0.0 }
 0x5aa   : > { %v3196_v61 = vadd.f32 %v7160_v42, %v3195_v17  ;;  %v3499_v2 = vmax.f32 %v3193_v44, 0.0 }
 0x5ab   : > { %v3502_v0 = vmax.f32 %v3204_v26, 0.0  ;;  %5786 = vmatprep.mubr.bf16.mxu1 %v2813_v57 }
 0x5ac   : > { %v3500_v5 = vmax.f32 %v3196_v61, 0.0 }
 0x5ad   : > { %v7302_v46 = vpack.c.bf16 %v3502_v0, %v3501_v13 }
 0x5ae   : > { %v7304_v6 = vpack.c.bf16 %v3500_v5, %v3499_v2  ;;  %v2744_v34 = vpop.f32.mrb[124].mxu0 }
 0x5af   : > { %v2746_v9 = vpop.f32.mrb[125].mxu0 }
 0x5b0   : > { %v2747_v15 = vpop.f32.mrb[126].mxu0 }
 0x5b1   : > { %v2814_v22 = vpack.c.bf16 %v2747_v15, %v2744_v34  ;;  %v2749_v58 = vpop.f32.mrb[127].mxu0 }
 0x5b3   : > { %5787 = vmatmul.mubr.bf16.gmra.mrb[124].mxu1 %v2814_v22 }
 0x5b4   : > { %3763 = vmatprep.mubr.bf16.mxu1 %v6593_v38 }
 0x5b6   : > { %v5736_v31 = vpop.f32.mrb[72].mxu1 }
 0x5b7   : > { %v3217_v42 = vadd.f32 %v7307_v43, %v5736_v31  ;;  %v3208_v32 = vpop.f32.mrb[73].mxu1 }
 0x5b8   : > { %v3209_v63 = vadd.f32 %v7307_v43, %v3208_v32  ;;  %v5737_v25 = vpop.f32.mrb[74].mxu1 }
 0x5b9   : > { %v3220_v40 = vadd.f32 %v7307_v43, %v5737_v25  ;;  %v3211_v47 = vpop.f32.mrb[75].mxu1  ;;  %v3505_v41 = vmax.f32 %v3217_v42, 0.0 }
 0x5ba   : > { %v3212_v3 = vadd.f32 %v7307_v43, %v3211_v47  ;;  %v3503_v45 = vmax.f32 %v3209_v63, 0.0 }
 0x5bb   : > { %v3506_v44 = vmax.f32 %v3220_v40, 0.0  ;;  %3764 = vmatmul.mubr.bf16.vlgmr.msra.gmra.mrb[128].mxu1 %v7168_v23 }
 0x5bc   : > { %v3504_v8 = vmax.f32 %v3212_v3, 0.0  ;;  %3773 = vmatprep.mubr.bf16.mxu1 %v6593_v38 }
 0x5bd   : > { %v7315_v26 = vpack.c.bf16 %v3506_v44, %v3505_v41 }
 0x5be   : > { %v7317_v17 = vpack.c.bf16 %v3504_v8, %v3503_v45 }
 0x5c3   : > { %3774 = vmatmul.mubr.bf16.gmra.mrb[132].mxu1 %v7166_v21 }
 0x5c4   : > { %3783 = vmatprep.mubr.bf16.mxu1 %v6593_v38 }
 0x5c6   : > { %v5740_v57 = vpop.f32.mrb[76].mxu1 }
 0x5c7   : > { %v3233_v55 = vadd.f32 %v7307_v43, %v5740_v57  ;;  %v3224_v61 = vpop.f32.mrb[77].mxu1 }
 0x5c8   : > { %v3225_v13 = vadd.f32 %v7307_v43, %v3224_v61  ;;  %v5741_v0 = vpop.f32.mrb[78].mxu1 }
 0x5c9   : > { %v3236_v23 = vadd.f32 %v7307_v43, %v5741_v0  ;;  %v3227_v2 = vpop.f32.mrb[79].mxu1  ;;  %v3509_v34 = vmax.f32 %v3233_v55, 0.0 }
 0x5ca   : > { %v3228_v5 = vadd.f32 %v7307_v43, %v3227_v2  ;;  %v3507_v15 = vmax.f32 %v3225_v13, 0.0 }
 0x5cb   : > { %v3510_v9 = vmax.f32 %v3236_v23, 0.0  ;;  %3784 = vmatmul.mubr.bf16.gmra.mrb[136].mxu1 %v7176_v37 }
 0x5cc   : > { %v3508_v21 = vmax.f32 %v3228_v5, 0.0  ;;  %3793 = vmatprep.mubr.bf16.mxu1 %v6593_v38 }
 0x5cd   : > { %v7327_v22 = vpack.c.bf16 %v3510_v9, %v3509_v34 }
 0x5ce   : > { %v7329_v58 = vpack.c.bf16 %v3508_v21, %v3507_v15 }
 0x5d3   : > { %3794 = vmatmul.mubr.bf16.gmra.mrb[140].mxu1 %v7174_v51 }
 0x5d4   : > { %3803 = vmatprep.mubr.bf16.mxu1 %v6593_v38 }
 0x5d6   : > { %v5744_v31 = vpop.f32.mrb[80].mxu1 }
 0x5d7   : > { %v3249_v42 = vadd.f32 %v7307_v43, %v5744_v31  ;;  %v3240_v32 = vpop.f32.mrb[81].mxu1 }
 0x5d8   : > { %v3241_v63 = vadd.f32 %v7307_v43, %v3240_v32  ;;  %v5745_v25 = vpop.f32.mrb[82].mxu1 }
 0x5d9   : > { %v3252_v37 = vadd.f32 %v7307_v43, %v5745_v25  ;;  %v3243_v40 = vpop.f32.mrb[83].mxu1  ;;  %v3513_v3 = vmax.f32 %v3249_v42, 0.0 }
 0x5da   : > { %v3244_v47 = vadd.f32 %v7307_v43, %v3243_v40  ;;  %v3511_v44 = vmax.f32 %v3241_v63, 0.0 }
 0x5db   : > { %v3514_v41 = vmax.f32 %v3252_v37, 0.0  ;;  %3804 = vmatmul.mubr.bf16.gmra.mrb[144].mxu1 %v7184_v20 }
 0x5dc   : > { %v3512_v51 = vmax.f32 %v3244_v47, 0.0  ;;  %3813 = vmatprep.mubr.bf16.mxu1 %v6593_v38 }
 0x5dd   : > { %v7339_v45 = vpack.c.bf16 %v3514_v41, %v3513_v3 }
 0x5de   : > { %v7341_v8 = vpack.c.bf16 %v3512_v51, %v3511_v44 }
 0x5e3   : > { %3814 = vmatmul.mubr.bf16.gmra.mrb[148].mxu1 %v7182_v19 }
 0x5e4   : > { %3823 = vmatprep.mubr.bf16.mxu1 %v6593_v38 }
 0x5e6   : > { %v5748_v57 = vpop.f32.mrb[84].mxu1 }
 0x5e7   : > { %v3265_v55 = vadd.f32 %v7307_v43, %v5748_v57  ;;  %v3256_v61 = vpop.f32.mrb[85].mxu1 }
 0x5e8   : > { %v3257_v13 = vadd.f32 %v7307_v43, %v3256_v61  ;;  %v5749_v0 = vpop.f32.mrb[86].mxu1 }
 0x5e9   : > { %v3268_v20 = vadd.f32 %v7307_v43, %v5749_v0  ;;  %v3259_v23 = vpop.f32.mrb[87].mxu1  ;;  %v3517_v5 = vmax.f32 %v3265_v55, 0.0 }
 0x5ea   : > { %v3260_v2 = vadd.f32 %v7307_v43, %v3259_v23  ;;  %v3515_v9 = vmax.f32 %v3257_v13, 0.0 }
 0x5eb   : > { %v3518_v34 = vmax.f32 %v3268_v20, 0.0  ;;  %3824 = vmatmul.mubr.bf16.gmra.mrb[152].mxu1 %v7192_v10 }
 0x5ec   : > { %v3516_v19 = vmax.f32 %v3260_v2, 0.0  ;;  %3833 = vmatprep.mubr.bf16.mxu1 %v6593_v38 }
 0x5ed   : > { %v7351_v15 = vpack.c.bf16 %v3518_v34, %v3517_v5 }
 0x5ee   : > { %v7353_v21 = vpack.c.bf16 %v3516_v19, %v3515_v9 }
 0x5f3   : > { %3834 = vmatmul.mubr.bf16.gmra.mrb[156].mxu1 %v7190_v52 }
 0x5f4   : > { %3843 = vmatprep.mubr.bf16.mxu1 %v6593_v38 }
 0x5f6   : > { %v5752_v31 = vpop.f32.mrb[88].mxu1 }
 0x5f7   : > { %v3281_v42 = vadd.f32 %v7307_v43, %v5752_v31  ;;  %v3272_v32 = vpop.f32.mrb[89].mxu1 }
 0x5f8   : > { %v3273_v63 = vadd.f32 %v7307_v43, %v3272_v32  ;;  %v5753_v25 = vpop.f32.mrb[90].mxu1 }
 0x5f9   : > { %v3284_v10 = vadd.f32 %v7307_v43, %v5753_v25  ;;  %v3275_v37 = vpop.f32.mrb[91].mxu1  ;;  %v3521_v47 = vmax.f32 %v3281_v42, 0.0 }
 0x5fa   : > { %v3276_v40 = vadd.f32 %v7307_v43, %v3275_v37  ;;  %v3519_v41 = vmax.f32 %v3273_v63, 0.0 }
 0x5fb   : > { %v3522_v3 = vmax.f32 %v3284_v10, 0.0  ;;  %3844 = vmatmul.mubr.bf16.gmra.mrb[160].mxu1 %v7200_v54 }
 0x5fc   : > { %v3520_v52 = vmax.f32 %v3276_v40, 0.0  ;;  %3853 = vmatprep.mubr.bf16.mxu1 %v6593_v38 }
 0x5fd   : > { %v7363_v44 = vpack.c.bf16 %v3522_v3, %v3521_v47 }
 0x5fe   : > { %v7365_v51 = vpack.c.bf16 %v3520_v52, %v3519_v41 }
 0x603   : > { %3854 = vmatmul.mubr.bf16.gmra.mrb[164].mxu1 %v7198_v62 }
 0x604   : > { %3863 = vmatprep.mubr.bf16.mxu1 %v6593_v38 }
 0x606   : > { %v5756_v57 = vpop.f32.mrb[92].mxu1 }
 0x607   : > { %v3297_v55 = vadd.f32 %v7307_v43, %v5756_v57  ;;  %v3288_v61 = vpop.f32.mrb[93].mxu1 }
 0x608   : > { %v3289_v13 = vadd.f32 %v7307_v43, %v3288_v61  ;;  %v5757_v0 = vpop.f32.mrb[94].mxu1 }
 0x609   : > { %v3300_v54 = vadd.f32 %v7307_v43, %v5757_v0  ;;  %v3291_v20 = vpop.f32.mrb[95].mxu1  ;;  %v3525_v2 = vmax.f32 %v3297_v55, 0.0 }
 0x60a   : > { %v3292_v23 = vadd.f32 %v7307_v43, %v3291_v20  ;;  %v3523_v34 = vmax.f32 %v3289_v13, 0.0 }
 0x60b   : > { %v3526_v5 = vmax.f32 %v3300_v54, 0.0  ;;  %3864 = vmatmul.mubr.bf16.gmra.mrb[168].mxu1 %v7208_v33 }
 0x60c   : > { %v3524_v62 = vmax.f32 %v3292_v23, 0.0  ;;  %3873 = vmatprep.mubr.bf16.mxu1 %v6593_v38 }
 0x60d   : > { %v7375_v9 = vpack.c.bf16 %v3526_v5, %v3525_v2 }
 0x60e   : > { %v7377_v19 = vpack.c.bf16 %v3524_v62, %v3523_v34 }
 0x613   : > { %3874 = vmatmul.mubr.bf16.gmra.mrb[172].mxu1 %v7206_v7 }
 0x614   : > { %3883 = vmatprep.mubr.bf16.mxu1 %v6593_v38 }
 0x616   : > { %v5760_v31 = vpop.f32.mrb[96].mxu1 }
 0x617   : > { %v3313_v42 = vadd.f32 %v7307_v43, %v5760_v31  ;;  %v3304_v32 = vpop.f32.mrb[97].mxu1 }
 0x618   : > { %v3305_v63 = vadd.f32 %v7307_v43, %v3304_v32  ;;  %v5761_v25 = vpop.f32.mrb[98].mxu1 }
 0x619   : > { %v3316_v33 = vadd.f32 %v7307_v43, %v5761_v25  ;;  %v3307_v10 = vpop.f32.mrb[99].mxu1  ;;  %v3529_v40 = vmax.f32 %v3313_v42, 0.0 }
 0x61a   : > { %v3308_v37 = vadd.f32 %v7307_v43, %v3307_v10  ;;  %v3527_v3 = vmax.f32 %v3305_v63, 0.0 }
 0x61b   : > { %v3530_v47 = vmax.f32 %v3316_v33, 0.0  ;;  %3884 = vmatmul.mubr.bf16.gmra.mrb[176].mxu1 %v7216_v50 }
 0x61c   : > { %v3528_v7 = vmax.f32 %v3308_v37, 0.0  ;;  %3893 = vmatprep.mubr.bf16.mxu1 %v6593_v38 }
 0x61d   : > { %v7387_v41 = vpack.c.bf16 %v3530_v47, %v3529_v40 }
 0x61e   : > { %v7389_v52 = vpack.c.bf16 %v3528_v7, %v3527_v3 }
 0x623   : > { %3894 = vmatmul.mubr.bf16.gmra.mrb[180].mxu1 %v7214_v11 }
 0x624   : > { %3903 = vmatprep.mubr.bf16.mxu1 %v6593_v38 }
 0x626   : > { %v5764_v57 = vpop.f32.mrb[100].mxu1 }
 0x627   : > { %v3329_v55 = vadd.f32 %v7307_v43, %v5764_v57  ;;  %v3320_v61 = vpop.f32.mrb[101].mxu1 }
 0x628   : > { %v3321_v13 = vadd.f32 %v7307_v43, %v3320_v61  ;;  %v5765_v0 = vpop.f32.mrb[102].mxu1 }
 0x629   : > { %v3332_v50 = vadd.f32 %v7307_v43, %v5765_v0  ;;  %v3323_v54 = vpop.f32.mrb[103].mxu1  ;;  %v3533_v23 = vmax.f32 %v3329_v55, 0.0 }
 0x62a   : > { %v3324_v20 = vadd.f32 %v7307_v43, %v3323_v54  ;;  %v3531_v5 = vmax.f32 %v3321_v13, 0.0 }
 0x62b   : > { %v3534_v2 = vmax.f32 %v3332_v50, 0.0  ;;  %3904 = vmatmul.mubr.bf16.gmra.mrb[184].mxu1 %v7224_v49 }
 0x62c   : > { %v3532_v11 = vmax.f32 %v3324_v20, 0.0  ;;  %3913 = vmatprep.mubr.bf16.mxu1 %v6593_v38 }
 0x62d   : > { %v7399_v34 = vpack.c.bf16 %v3534_v2, %v3533_v23 }
 0x62e   : > { %v7401_v62 = vpack.c.bf16 %v3532_v11, %v3531_v5 }
 0x633   : > { %3914 = vmatmul.mubr.bf16.gmra.mrb[188].mxu1 %v7222_v48 }
 0x634   : > { %3923 = vmatprep.mubr.bf16.mxu1 %v6593_v38 }
 0x636   : > { %v5768_v31 = vpop.f32.mrb[104].mxu1 }
 0x637   : > { %v3345_v42 = vadd.f32 %v7307_v43, %v5768_v31  ;;  %v3336_v32 = vpop.f32.mrb[105].mxu1 }
 0x638   : > { %v3337_v63 = vadd.f32 %v7307_v43, %v3336_v32  ;;  %v5769_v25 = vpop.f32.mrb[106].mxu1 }
 0x639   : > { %v3348_v49 = vadd.f32 %v7307_v43, %v5769_v25  ;;  %v3339_v33 = vpop.f32.mrb[107].mxu1  ;;  %v3537_v37 = vmax.f32 %v3345_v42, 0.0 }
 0x63a   : > { %v3340_v10 = vadd.f32 %v7307_v43, %v3339_v33  ;;  %v3535_v47 = vmax.f32 %v3337_v63, 0.0 }
 0x63b   : > { %v3538_v40 = vmax.f32 %v3348_v49, 0.0  ;;  %3924 = vmatmul.mubr.bf16.gmra.mrb[192].mxu1 %v7232_v39 }
 0x63c   : > { %v3536_v48 = vmax.f32 %v3340_v10, 0.0  ;;  %3933 = vmatprep.mubr.bf16.mxu1 %v6593_v38 }
 0x63d   : > { %v7411_v3 = vpack.c.bf16 %v3538_v40, %v3537_v37 }
 0x63e   : > { %v7413_v7 = vpack.c.bf16 %v3536_v48, %v3535_v47 }
 0x643   : > { %3934 = vmatmul.mubr.bf16.gmra.mrb[196].mxu1 %v7230_v14 }
 0x644   : > { %3943 = vmatprep.mubr.bf16.mxu1 %v6593_v38 }
 0x646   : > { %v5772_v57 = vpop.f32.mrb[108].mxu1 }
 0x647   : > { %v3361_v55 = vadd.f32 %v7307_v43, %v5772_v57  ;;  %v3352_v61 = vpop.f32.mrb[109].mxu1 }
 0x648   : > { %v3353_v13 = vadd.f32 %v7307_v43, %v3352_v61  ;;  %v5773_v0 = vpop.f32.mrb[110].mxu1 }
 0x649   : > { %v3364_v39 = vadd.f32 %v7307_v43, %v5773_v0  ;;  %v3355_v50 = vpop.f32.mrb[111].mxu1  ;;  %v3541_v20 = vmax.f32 %v3361_v55, 0.0 }
 0x64a   : > { %v3356_v54 = vadd.f32 %v7307_v43, %v3355_v50  ;;  %v3539_v2 = vmax.f32 %v3353_v13, 0.0 }
 0x64b   : > { %v3542_v23 = vmax.f32 %v3364_v39, 0.0  ;;  %3944 = vmatmul.mubr.bf16.gmra.mrb[200].mxu1 %v7240_v56 }
 0x64c   : > { %v3540_v14 = vmax.f32 %v3356_v54, 0.0  ;;  %3953 = vmatprep.mubr.bf16.mxu1 %v6593_v38 }
 0x64d   : > { %v7423_v5 = vpack.c.bf16 %v3542_v23, %v3541_v20 }
 0x64e   : > { %v7425_v11 = vpack.c.bf16 %v3540_v14, %v3539_v2 }
 0x653   : > { %3954 = vmatmul.mubr.bf16.gmra.mrb[204].mxu1 %v7238_v12 }
 0x654   : > { %3963 = vmatprep.mubr.bf16.mxu1 %v6593_v38 }
 0x656   : > { %v5776_v31 = vpop.f32.mrb[112].mxu1 }
 0x657   : > { %v3377_v42 = vadd.f32 %v7307_v43, %v5776_v31  ;;  %v3368_v32 = vpop.f32.mrb[113].mxu1 }
 0x658   : > { %v3369_v63 = vadd.f32 %v7307_v43, %v3368_v32  ;;  %v5777_v25 = vpop.f32.mrb[114].mxu1 }
 0x659   : > { %v3380_v56 = vadd.f32 %v7307_v43, %v5777_v25  ;;  %v3371_v49 = vpop.f32.mrb[115].mxu1  ;;  %v3545_v10 = vmax.f32 %v3377_v42, 0.0 }
 0x65a   : > { %v3372_v33 = vadd.f32 %v7307_v43, %v3371_v49  ;;  %v3543_v40 = vmax.f32 %v3369_v63, 0.0 }
 0x65b   : > { %v3546_v37 = vmax.f32 %v3380_v56, 0.0  ;;  %3964 = vmatmul.mubr.bf16.gmra.mrb[208].mxu1 %v7248_v1 }
 0x65c   : > { %v3544_v12 = vmax.f32 %v3372_v33, 0.0  ;;  %3973 = vmatprep.mubr.bf16.mxu1 %v6593_v38 }
 0x65d   : > { %v7435_v47 = vpack.c.bf16 %v3546_v37, %v3545_v10 }
 0x65e   : > { %v7437_v48 = vpack.c.bf16 %v3544_v12, %v3543_v40 }
 0x663   : > { %3974 = vmatmul.mubr.bf16.gmra.mrb[212].mxu1 %v7246_v28 }
 0x664   : > { %3983 = vmatprep.mubr.bf16.mxu1 %v6593_v38 }
 0x666   : > { %v5780_v57 = vpop.f32.mrb[116].mxu1 }
 0x667   : > { %v3393_v55 = vadd.f32 %v7307_v43, %v5780_v57  ;;  %v3384_v61 = vpop.f32.mrb[117].mxu1  ;;  %v3641_v57 = vlaneseq }
 0x668   : > { %v3385_v13 = vadd.f32 %v7307_v43, %v3384_v61  ;;  %v5781_v0 = vpop.f32.mrb[118].mxu1 }
 0x669   : > { %v3396_v1 = vadd.f32 %v7307_v43, %v5781_v0  ;;  %v3387_v39 = vpop.f32.mrb[119].mxu1  ;;  %v3549_v54 = vmax.f32 %v3393_v55, 0.0  ;;  %v3642_v55 = vshrl.u32 %v3641_v57, 7 }
 0x66a   : > { %v3388_v50 = vadd.f32 %v7307_v43, %v3387_v39  ;;  %v3547_v23 = vmax.f32 %v3385_v13, 0.0 }
 0x66b   : > { %v3550_v20 = vmax.f32 %v3396_v1, 0.0  ;;  %3984 = vmatmul.mubr.bf16.gmra.mrb[216].mxu1 %v7256_v60  ;;  %v3643_v1 = vsub.s32 0, %v3642_v55 }
 0x66c   : > { %v3548_v28 = vmax.f32 %v3388_v50, 0.0  ;;  %3993 = vmatprep.mubr.bf16.mxu1 %v6593_v38  ;;  %v3639_v50 = vld [vmem:[#allocation14] sm:$0x3] }
 0x66d   : > { %v7447_v2 = vpack.c.bf16 %v3550_v20, %v3549_v54  ;;  %v3647_v54 = vsub.s32 1, %v3642_v55 }
 0x66e   : > { %v7449_v14 = vpack.c.bf16 %v3548_v28, %v3547_v23 }
 0x673   : > { %3994 = vmatmul.mubr.bf16.gmra.mrb[220].mxu1 %v7254_v30 }
 0x674   : > { %4003 = vmatprep.mubr.bf16.mxu1 %v6593_v38 }
 0x676   : > { %v5784_v31 = vpop.f32.mrb[120].mxu1 }
 0x677   : > { %v3409_v42 = vadd.f32 %v7307_v43, %v5784_v31  ;;  %v3400_v32 = vpop.f32.mrb[121].mxu1 }
 0x678   : > { %v3401_v63 = vadd.f32 %v7307_v43, %v3400_v32  ;;  %v5785_v25 = vpop.f32.mrb[122].mxu1 }
 0x679   : > { %v3412_v60 = vadd.f32 %v7307_v43, %v5785_v25  ;;  %v3403_v56 = vpop.f32.mrb[123].mxu1  ;;  %v3553_v33 = vmax.f32 %v3409_v42, 0.0  ;;  %v7470_v42 = vrot.slane %v3639_v50, %v3643_v1  ;;  %v7472_v25 = vrot.slane %v3639_v50, %v3647_v54 }
 0x67a   : > { %v3404_v49 = vadd.f32 %v7307_v43, %v3403_v56  ;;  %v3551_v37 = vmax.f32 %v3401_v63, 0.0 }
 0x67b   : > { %v3554_v10 = vmax.f32 %v3412_v60, 0.0  ;;  %4004 = vmatmul.mubr.bf16.gmra.mrb[224].mxu1 %v7264_v36 }
 0x67c   : > { %v3552_v30 = vmax.f32 %v3404_v49, 0.0  ;;  %4013 = vmatprep.mubr.bf16.mxu1 %v6593_v38 }
 0x67d   : > { %v7459_v40 = vpack.c.bf16 %v3554_v10, %v3553_v33 }
 0x67e   : > { %v7461_v12 = vpack.c.bf16 %v3552_v30, %v3551_v37 }
 0x683   : > { %4014 = vmatmul.mubr.bf16.gmra.mrb[228].mxu1 %v7262_v35 }
 0x684   : > { %4023 = vmatprep.mubr.bf16.mxu1 %v6593_v38 }
 0x686   : > { %v5788_v61 = vpop.f32.mrb[124].mxu1 }
 0x687   : > { %v3425_v13 = vadd.f32 %v7307_v43, %v5788_v61  ;;  %v3416_v0 = vpop.f32.mrb[125].mxu1 }
 0x688   : > { %v3417_v36 = vadd.f32 %v7307_v43, %v3416_v0  ;;  %v5789_v39 = vpop.f32.mrb[126].mxu1 }
 0x689   : > { %v3428_v20 = vadd.f32 %v7307_v43, %v5789_v39  ;;  %v3419_v23 = vpop.f32.mrb[127].mxu1  ;;  %v3557_v35 = vmax.f32 %v3425_v13, 0.0 }
 0x68a   : > { %v3420_v28 = vadd.f32 %v7307_v43, %v3419_v23  ;;  %v3555_v32 = vmax.f32 %v3417_v36, 0.0 }
 0x68b   : > { %v3558_v31 = vmax.f32 %v3428_v20, 0.0  ;;  %4024 = vmatmul.mubr.bf16.gmra.mrb[232].mxu1 %v7272_v59 }
 0x68c   : > { %v3556_v63 = vmax.f32 %v3420_v28, 0.0  ;;  %4033 = vmatprep.mubr.bf16.mxu1 %v6593_v38 }
 0x68d   : > { %v7475_v60 = vpack.c.bf16 %v3558_v31, %v3557_v35 }
 0x68e   : > { %v7478_v56 = vpack.c.bf16 %v3556_v63, %v3555_v32  ;;  %v3765_v49 = vpop.f32.mrb[128].mxu1 }
 0x68f   : > { %v3766_v43 = vadd.f32 %v3765_v49, %v7470_v42  ;;  %v3767_v33 = vpop.f32.mrb[129].mxu1 }
 0x690   : > { %v3768_v10 = vadd.f32 %v3767_v33, %v7472_v25  ;;  %v3769_v59 = vpop.f32.mrb[130].mxu1 }
 0x691   : > { %v4404_v37 = vmax.f32 %v3766_v43, 0.0  ;;  %v3770_v30 = vadd.f32 %v3769_v59, %v7470_v42  ;;  %v3771_v57 = vpop.f32.mrb[131].mxu1 }
 0x692   : > { %v4405_v55 = vmax.f32 %v3768_v10, 0.0  ;;  %v3772_v61 = vadd.f32 %v3771_v57, %v7472_v25 }
 0x693   : > { %4660 = vst [vmem:[%s7484_s26] sm:$0xff] %v4404_v37  ;;  %v4406_v13 = vmax.f32 %v3770_v30, 0.0  ;;  %4034 = vmatmul.mubr.bf16.gmra.mrb[236].mxu1 %v7270_v16 }
 0x694   : > { %4661 = vst [vmem:[%s7484_s26 + $0x8] sm:$0xff] %v4405_v55  ;;  %v4407_v0 = vmax.f32 %v3772_v61, 0.0  ;;  %4043 = vmatprep.mubr.bf16.mxu1 %v6593_v38 }
 0x695   : > { %4662 = vst [vmem:[%s7484_s26 + $0x10] sm:$0xff] %v4406_v13 }
 0x696   : > { %4663 = vst [vmem:[%s7484_s26 + $0x18] sm:$0xff] %v4407_v0  ;;  %v3775_v1 = vpop.f32.mrb[132].mxu1 }
 0x697   : > { %v3776_v36 = vadd.f32 %v3775_v1, %v7470_v42  ;;  %v3777_v39 = vpop.f32.mrb[133].mxu1 }
 0x698   : > { %v3778_v50 = vadd.f32 %v3777_v39, %v7472_v25  ;;  %v3779_v54 = vpop.f32.mrb[134].mxu1 }
 0x699   : > { %v4408_v20 = vmax.f32 %v3776_v36, 0.0  ;;  %v3780_v16 = vadd.f32 %v3779_v54, %v7470_v42  ;;  %v3781_v23 = vpop.f32.mrb[135].mxu1 }
 0x69a   : > { %v4409_v28 = vmax.f32 %v3778_v50, 0.0  ;;  %v3782_v35 = vadd.f32 %v3781_v23, %v7472_v25 }
 0x69b   : > { %4664 = vst [vmem:[%s7484_s26 + $0x20] sm:$0xff] %v4408_v20  ;;  %v4410_v31 = vmax.f32 %v3780_v16, 0.0  ;;  %4044 = vmatmul.mubr.bf16.gmra.mrb[240].mxu1 %v7280_v18 }
 0x69c   : > { %4665 = vst [vmem:[%s7484_s26 + $0x28] sm:$0xff] %v4409_v28  ;;  %v4411_v32 = vmax.f32 %v3782_v35, 0.0  ;;  %4053 = vmatprep.mubr.bf16.mxu1 %v6593_v38 }
 0x69d   : > { %4666 = vst [vmem:[%s7484_s26 + $0x30] sm:$0xff] %v4410_v31 }
 0x69e   : > { %4667 = vst [vmem:[%s7484_s26 + $0x38] sm:$0xff] %v4411_v32  ;;  %v3785_v63 = vpop.f32.mrb[136].mxu1 }
 0x69f   : > { %v3786_v49 = vadd.f32 %v3785_v63, %v7470_v42  ;;  %v3787_v43 = vpop.f32.mrb[137].mxu1 }
 0x6a0   : > { %v3788_v33 = vadd.f32 %v3787_v43, %v7472_v25  ;;  %v3789_v10 = vpop.f32.mrb[138].mxu1 }
 0x6a1   : > { %v4412_v59 = vmax.f32 %v3786_v49, 0.0  ;;  %v3790_v18 = vadd.f32 %v3789_v10, %v7470_v42  ;;  %v3791_v37 = vpop.f32.mrb[139].mxu1 }
 0x6a2   : > { %v4413_v30 = vmax.f32 %v3788_v33, 0.0  ;;  %v3792_v57 = vadd.f32 %v3791_v37, %v7472_v25 }
 0x6a3   : > { %4668 = vst [vmem:[%s7484_s26 + $0x40] sm:$0xff] %v4412_v59  ;;  %v4414_v55 = vmax.f32 %v3790_v18, 0.0  ;;  %4054 = vmatmul.mubr.bf16.gmra.mrb[244].mxu1 %v7278_v53 }
 0x6a4   : > { %4669 = vst [vmem:[%s7484_s26 + $0x48] sm:$0xff] %v4413_v30  ;;  %v4415_v61 = vmax.f32 %v3792_v57, 0.0  ;;  %4063 = vmatprep.mubr.bf16.mxu1 %v6593_v38 }
 0x6a5   : > { %4670 = vst [vmem:[%s7484_s26 + $0x50] sm:$0xff] %v4414_v55 }
 0x6a6   : > { %4671 = vst [vmem:[%s7484_s26 + $0x58] sm:$0xff] %v4415_v61  ;;  %v3795_v13 = vpop.f32.mrb[140].mxu1 }
 0x6a7   : > { %v3796_v0 = vadd.f32 %v3795_v13, %v7470_v42  ;;  %v3797_v1 = vpop.f32.mrb[141].mxu1 }
 0x6a8   : > { %v3798_v36 = vadd.f32 %v3797_v1, %v7472_v25  ;;  %v3799_v39 = vpop.f32.mrb[142].mxu1 }
 0x6a9   : > { %v4416_v50 = vmax.f32 %v3796_v0, 0.0  ;;  %v3800_v53 = vadd.f32 %v3799_v39, %v7470_v42  ;;  %v3801_v54 = vpop.f32.mrb[143].mxu1 }
 0x6aa   : > { %v4417_v20 = vmax.f32 %v3798_v36, 0.0  ;;  %v3802_v16 = vadd.f32 %v3801_v54, %v7472_v25 }
 0x6ab   : > { %4672 = vst [vmem:[%s7484_s26 + $0x60] sm:$0xff] %v4416_v50  ;;  %v4418_v23 = vmax.f32 %v3800_v53, 0.0  ;;  %4064 = vmatmul.mubr.bf16.gmra.mrb[248].mxu1 %v7288_v29 }
 0x6ac   : > { %4673 = vst [vmem:[%s7484_s26 + $0x68] sm:$0xff] %v4417_v20  ;;  %v4419_v28 = vmax.f32 %v3802_v16, 0.0  ;;  %4073 = vmatprep.mubr.bf16.mxu1 %v6593_v38 }
 0x6ad   : > { %4674 = vst [vmem:[%s7484_s26 + $0x70] sm:$0xff] %v4418_v23 }
 0x6ae   : > { %4675 = vst [vmem:[%s7484_s26 + $0x78] sm:$0xff] %v4419_v28  ;;  %v3805_v35 = vpop.f32.mrb[144].mxu1 }
 0x6af   : > { %v3806_v31 = vadd.f32 %v3805_v35, %v7470_v42  ;;  %v3807_v32 = vpop.f32.mrb[145].mxu1 }
 0x6b0   : > { %v3808_v63 = vadd.f32 %v3807_v32, %v7472_v25  ;;  %v3809_v49 = vpop.f32.mrb[146].mxu1 }
 0x6b1   : > { %v4420_v43 = vmax.f32 %v3806_v31, 0.0  ;;  %v3810_v29 = vadd.f32 %v3809_v49, %v7470_v42  ;;  %v3811_v33 = vpop.f32.mrb[147].mxu1 }
 0x6b2   : > { %v4421_v10 = vmax.f32 %v3808_v63, 0.0  ;;  %v3812_v59 = vadd.f32 %v3811_v33, %v7472_v25 }
 0x6b3   : > { %4676 = vst [vmem:[%s7484_s26 + $0x80] sm:$0xff] %v4420_v43  ;;  %v4422_v18 = vmax.f32 %v3810_v29, 0.0  ;;  %4074 = vmatmul.mubr.bf16.gmra.mrb[252].mxu1 %v7286_v4 }
 0x6b4   : > { %4677 = vst [vmem:[%s7484_s26 + $0x88] sm:$0xff] %v4421_v10  ;;  %v4423_v37 = vmax.f32 %v3812_v59, 0.0  ;;  %4083 = vmatprep.mubr.bf16.mxu1 %v6593_v38 }
 0x6b5   : > { %4678 = vst [vmem:[%s7484_s26 + $0x90] sm:$0xff] %v4422_v18 }
 0x6b6   : > { %4679 = vst [vmem:[%s7484_s26 + $0x98] sm:$0xff] %v4423_v37  ;;  %v3815_v30 = vpop.f32.mrb[148].mxu1 }
 0x6b7   : > { %v3816_v57 = vadd.f32 %v3815_v30, %v7470_v42  ;;  %v3817_v55 = vpop.f32.mrb[149].mxu1 }
 0x6b8   : > { %v3818_v61 = vadd.f32 %v3817_v55, %v7472_v25  ;;  %v3819_v13 = vpop.f32.mrb[150].mxu1 }
 0x6b9   : > { %v4424_v0 = vmax.f32 %v3816_v57, 0.0  ;;  %v3820_v4 = vadd.f32 %v3819_v13, %v7470_v42  ;;  %v3821_v1 = vpop.f32.mrb[151].mxu1 }
 0x6ba   : > { %v4425_v36 = vmax.f32 %v3818_v61, 0.0  ;;  %v3822_v39 = vadd.f32 %v3821_v1, %v7472_v25 }
 0x6bb   : > { %4680 = vst [vmem:[%s7484_s26 + $0xa0] sm:$0xff] %v4424_v0  ;;  %v4426_v50 = vmax.f32 %v3820_v4, 0.0  ;;  %4084 = vmatmul.mubr.bf16.gmra.mrb[0].mxu1 %v7296_v27 }
 0x6bc   : > { %4681 = vst [vmem:[%s7484_s26 + $0xa8] sm:$0xff] %v4425_v36  ;;  %v4427_v53 = vmax.f32 %v3822_v39, 0.0  ;;  %4093 = vmatprep.mubr.bf16.mxu1 %v6593_v38 }
 0x6bd   : > { %4682 = vst [vmem:[%s7484_s26 + $0xb0] sm:$0xff] %v4426_v50 }
 0x6be   : > { %4683 = vst [vmem:[%s7484_s26 + $0xb8] sm:$0xff] %v4427_v53  ;;  %v3825_v54 = vpop.f32.mrb[152].mxu1 }
 0x6bf   : > { %v3826_v20 = vadd.f32 %v3825_v54, %v7470_v42  ;;  %v3827_v16 = vpop.f32.mrb[153].mxu1 }
 0x6c0   : > { %v3828_v23 = vadd.f32 %v3827_v16, %v7472_v25  ;;  %v3829_v28 = vpop.f32.mrb[154].mxu1 }
 0x6c1   : > { %v4428_v35 = vmax.f32 %v3826_v20, 0.0  ;;  %v3830_v27 = vadd.f32 %v3829_v28, %v7470_v42  ;;  %v3831_v31 = vpop.f32.mrb[155].mxu1 }
 0x6c2   : > { %v4429_v32 = vmax.f32 %v3828_v23, 0.0  ;;  %v3832_v63 = vadd.f32 %v3831_v31, %v7472_v25 }
 0x6c3   : > { %4684 = vst [vmem:[%s7484_s26 + $0xc0] sm:$0xff] %v4428_v35  ;;  %v4430_v49 = vmax.f32 %v3830_v27, 0.0  ;;  %4094 = vmatmul.mubr.bf16.gmra.mrb[4].mxu1 %v7294_v24 }
 0x6c4   : > { %4685 = vst [vmem:[%s7484_s26 + $0xc8] sm:$0xff] %v4429_v32  ;;  %v4431_v43 = vmax.f32 %v3832_v63, 0.0  ;;  %4103 = vmatprep.mubr.bf16.mxu1 %v6593_v38 }
 0x6c5   : > { %4686 = vst [vmem:[%s7484_s26 + $0xd0] sm:$0xff] %v4430_v49 }
 0x6c6   : > { %4687 = vst [vmem:[%s7484_s26 + $0xd8] sm:$0xff] %v4431_v43  ;;  %v3835_v29 = vpop.f32.mrb[156].mxu1 }
 0x6c7   : > { %v3836_v33 = vadd.f32 %v3835_v29, %v7470_v42  ;;  %v3837_v10 = vpop.f32.mrb[157].mxu1 }
 0x6c8   : > { %v3838_v59 = vadd.f32 %v3837_v10, %v7472_v25  ;;  %v3839_v18 = vpop.f32.mrb[158].mxu1 }
 0x6c9   : > { %v4432_v37 = vmax.f32 %v3836_v33, 0.0  ;;  %v3840_v24 = vadd.f32 %v3839_v18, %v7470_v42  ;;  %v3841_v30 = vpop.f32.mrb[159].mxu1 }
 0x6ca   : > { %v4433_v57 = vmax.f32 %v3838_v59, 0.0  ;;  %v3842_v55 = vadd.f32 %v3841_v30, %v7472_v25 }
 0x6cb   : > { %4688 = vst [vmem:[%s7484_s26 + $0xe0] sm:$0xff] %v4432_v37  ;;  %v4434_v61 = vmax.f32 %v3840_v24, 0.0  ;;  %4104 = vmatmul.mubr.bf16.gmra.mrb[8].mxu1 %v7304_v6 }
 0x6cc   : > { %4689 = vst [vmem:[%s7484_s26 + $0xe8] sm:$0xff] %v4433_v57  ;;  %v4435_v13 = vmax.f32 %v3842_v55, 0.0  ;;  %4113 = vmatprep.mubr.bf16.mxu1 %v6593_v38 }
 0x6cd   : > { %4690 = vst [vmem:[%s7484_s26 + $0xf0] sm:$0xff] %v4434_v61 }
 0x6ce   : > { %4691 = vst [vmem:[%s7484_s26 + $0xf8] sm:$0xff] %v4435_v13  ;;  %v3845_v0 = vpop.f32.mrb[160].mxu1 }
 0x6cf   : > { %v3846_v4 = vadd.f32 %v3845_v0, %v7470_v42  ;;  %v3847_v1 = vpop.f32.mrb[161].mxu1 }
 0x6d0   : > { %v3848_v36 = vadd.f32 %v3847_v1, %v7472_v25  ;;  %v3849_v39 = vpop.f32.mrb[162].mxu1 }
 0x6d1   : > { %v4436_v50 = vmax.f32 %v3846_v4, 0.0  ;;  %v3850_v6 = vadd.f32 %v3849_v39, %v7470_v42  ;;  %v3851_v53 = vpop.f32.mrb[163].mxu1 }
 0x6d2   : > { %v4437_v54 = vmax.f32 %v3848_v36, 0.0  ;;  %v3852_v20 = vadd.f32 %v3851_v53, %v7472_v25 }
 0x6d3   : > { %4692 = vst [vmem:[%s7484_s26 + $0x100] sm:$0xff] %v4436_v50  ;;  %v4438_v16 = vmax.f32 %v3850_v6, 0.0  ;;  %4114 = vmatmul.mubr.bf16.gmra.mrb[12].mxu1 %v7302_v46 }
 0x6d4   : > { %4693 = vst [vmem:[%s7484_s26 + $0x108] sm:$0xff] %v4437_v54  ;;  %v4439_v23 = vmax.f32 %v3852_v20, 0.0  ;;  %4123 = vmatprep.mubr.bf16.mxu1 %v6593_v38 }
 0x6d5   : > { %4694 = vst [vmem:[%s7484_s26 + $0x110] sm:$0xff] %v4438_v16 }
 0x6d6   : > { %4695 = vst [vmem:[%s7484_s26 + $0x118] sm:$0xff] %v4439_v23  ;;  %v3855_v28 = vpop.f32.mrb[164].mxu1 }
 0x6d7   : > { %v3856_v35 = vadd.f32 %v3855_v28, %v7470_v42  ;;  %v3857_v27 = vpop.f32.mrb[165].mxu1 }
 0x6d8   : > { %v3858_v31 = vadd.f32 %v3857_v27, %v7472_v25  ;;  %v3859_v32 = vpop.f32.mrb[166].mxu1 }
 0x6d9   : > { %v4440_v63 = vmax.f32 %v3856_v35, 0.0  ;;  %v3860_v46 = vadd.f32 %v3859_v32, %v7470_v42  ;;  %v3861_v49 = vpop.f32.mrb[167].mxu1 }
 0x6da   : > { %v4441_v43 = vmax.f32 %v3858_v31, 0.0  ;;  %v3862_v29 = vadd.f32 %v3861_v49, %v7472_v25 }
 0x6db   : > { %4696 = vst [vmem:[%s7484_s26 + $0x120] sm:$0xff] %v4440_v63  ;;  %v4442_v33 = vmax.f32 %v3860_v46, 0.0  ;;  %4124 = vmatmul.mubr.bf16.gmra.mrb[16].mxu1 %v7317_v17 }
 0x6dc   : > { %4697 = vst [vmem:[%s7484_s26 + $0x128] sm:$0xff] %v4441_v43  ;;  %v4443_v10 = vmax.f32 %v3862_v29, 0.0  ;;  %4133 = vmatprep.mubr.bf16.mxu1 %v6593_v38 }
 0x6dd   : > { %4698 = vst [vmem:[%s7484_s26 + $0x130] sm:$0xff] %v4442_v33 }
 0x6de   : > { %4699 = vst [vmem:[%s7484_s26 + $0x138] sm:$0xff] %v4443_v10  ;;  %v3865_v59 = vpop.f32.mrb[168].mxu1 }
 0x6df   : > { %v3866_v18 = vadd.f32 %v3865_v59, %v7470_v42  ;;  %v3867_v37 = vpop.f32.mrb[169].mxu1 }
 0x6e0   : > { %v3868_v24 = vadd.f32 %v3867_v37, %v7472_v25  ;;  %v3869_v30 = vpop.f32.mrb[170].mxu1 }
 0x6e1   : > { %v4444_v57 = vmax.f32 %v3866_v18, 0.0  ;;  %v3870_v17 = vadd.f32 %v3869_v30, %v7470_v42  ;;  %v3871_v55 = vpop.f32.mrb[171].mxu1 }
 0x6e2   : > { %v4445_v61 = vmax.f32 %v3868_v24, 0.0  ;;  %v3872_v13 = vadd.f32 %v3871_v55, %v7472_v25 }
 0x6e3   : > { %4700 = vst [vmem:[%s7484_s26 + $0x140] sm:$0xff] %v4444_v57  ;;  %v4446_v0 = vmax.f32 %v3870_v17, 0.0  ;;  %4134 = vmatmul.mubr.bf16.gmra.mrb[20].mxu1 %v7315_v26 }
 0x6e4   : > { %4701 = vst [vmem:[%s7484_s26 + $0x148] sm:$0xff] %v4445_v61  ;;  %v4447_v4 = vmax.f32 %v3872_v13, 0.0  ;;  %4143 = vmatprep.mubr.bf16.mxu1 %v6593_v38 }
 0x6e5   : > { %4702 = vst [vmem:[%s7484_s26 + $0x150] sm:$0xff] %v4446_v0 }
 0x6e6   : > { %4703 = vst [vmem:[%s7484_s26 + $0x158] sm:$0xff] %v4447_v4  ;;  %v3875_v1 = vpop.f32.mrb[172].mxu1 }
 0x6e7   : > { %v3876_v36 = vadd.f32 %v3875_v1, %v7470_v42  ;;  %v3877_v39 = vpop.f32.mrb[173].mxu1 }
 0x6e8   : > { %v3878_v50 = vadd.f32 %v3877_v39, %v7472_v25  ;;  %v3879_v6 = vpop.f32.mrb[174].mxu1 }
 0x6e9   : > { %v4448_v53 = vmax.f32 %v3876_v36, 0.0  ;;  %v3880_v26 = vadd.f32 %v3879_v6, %v7470_v42  ;;  %v3881_v54 = vpop.f32.mrb[175].mxu1 }
 0x6ea   : > { %v4449_v20 = vmax.f32 %v3878_v50, 0.0  ;;  %v3882_v16 = vadd.f32 %v3881_v54, %v7472_v25 }
 0x6eb   : > { %4704 = vst [vmem:[%s7484_s26 + $0x160] sm:$0xff] %v4448_v53  ;;  %v4450_v23 = vmax.f32 %v3880_v26, 0.0  ;;  %4144 = vmatmul.mubr.bf16.gmra.mrb[24].mxu1 %v7329_v58 }
 0x6ec   : > { %4705 = vst [vmem:[%s7484_s26 + $0x168] sm:$0xff] %v4449_v20  ;;  %v4451_v28 = vmax.f32 %v3882_v16, 0.0  ;;  %4153 = vmatprep.mubr.bf16.mxu1 %v6593_v38 }
 0x6ed   : > { %4706 = vst [vmem:[%s7484_s26 + $0x170] sm:$0xff] %v4450_v23 }
 0x6ee   : > { %4707 = vst [vmem:[%s7484_s26 + $0x178] sm:$0xff] %v4451_v28  ;;  %v3885_v35 = vpop.f32.mrb[176].mxu1 }
 0x6ef   : > { %v3886_v27 = vadd.f32 %v3885_v35, %v7470_v42  ;;  %v3887_v31 = vpop.f32.mrb[177].mxu1 }
 0x6f0   : > { %v3888_v32 = vadd.f32 %v3887_v31, %v7472_v25  ;;  %v3889_v63 = vpop.f32.mrb[178].mxu1 }
 0x6f1   : > { %v4452_v46 = vmax.f32 %v3886_v27, 0.0  ;;  %v3890_v58 = vadd.f32 %v3889_v63, %v7470_v42  ;;  %v3891_v49 = vpop.f32.mrb[179].mxu1 }
 0x6f2   : > { %v4453_v43 = vmax.f32 %v3888_v32, 0.0  ;;  %v3892_v29 = vadd.f32 %v3891_v49, %v7472_v25 }
 0x6f3   : > { %4708 = vst [vmem:[%s7484_s26 + $0x180] sm:$0xff] %v4452_v46  ;;  %v4454_v33 = vmax.f32 %v3890_v58, 0.0  ;;  %4154 = vmatmul.mubr.bf16.gmra.mrb[28].mxu1 %v7327_v22 }
 0x6f4   : > { %4709 = vst [vmem:[%s7484_s26 + $0x188] sm:$0xff] %v4453_v43  ;;  %v4455_v10 = vmax.f32 %v3892_v29, 0.0  ;;  %4163 = vmatprep.mubr.bf16.mxu1 %v6593_v38 }
 0x6f5   : > { %4710 = vst [vmem:[%s7484_s26 + $0x190] sm:$0xff] %v4454_v33 }
 0x6f6   : > { %4711 = vst [vmem:[%s7484_s26 + $0x198] sm:$0xff] %v4455_v10  ;;  %v3895_v59 = vpop.f32.mrb[180].mxu1 }
 0x6f7   : > { %v3896_v18 = vadd.f32 %v3895_v59, %v7470_v42  ;;  %v3897_v37 = vpop.f32.mrb[181].mxu1 }
 0x6f8   : > { %v3898_v24 = vadd.f32 %v3897_v37, %v7472_v25  ;;  %v3899_v30 = vpop.f32.mrb[182].mxu1 }
 0x6f9   : > { %v4456_v57 = vmax.f32 %v3896_v18, 0.0  ;;  %v3900_v22 = vadd.f32 %v3899_v30, %v7470_v42  ;;  %v3901_v17 = vpop.f32.mrb[183].mxu1 }
 0x6fa   : > { %v4457_v55 = vmax.f32 %v3898_v24, 0.0  ;;  %v3902_v61 = vadd.f32 %v3901_v17, %v7472_v25 }
 0x6fb   : > { %4712 = vst [vmem:[%s7484_s26 + $0x1a0] sm:$0xff] %v4456_v57  ;;  %v4458_v13 = vmax.f32 %v3900_v22, 0.0  ;;  %4164 = vmatmul.mubr.bf16.gmra.mrb[32].mxu1 %v7341_v8 }
 0x6fc   : > { %4713 = vst [vmem:[%s7484_s26 + $0x1a8] sm:$0xff] %v4457_v55  ;;  %v4459_v0 = vmax.f32 %v3902_v61, 0.0  ;;  %4173 = vmatprep.mubr.bf16.mxu1 %v6593_v38 }
 0x6fd   : > { %4714 = vst [vmem:[%s7484_s26 + $0x1b0] sm:$0xff] %v4458_v13 }
 0x6fe   : > { %4715 = vst [vmem:[%s7484_s26 + $0x1b8] sm:$0xff] %v4459_v0  ;;  %v3905_v4 = vpop.f32.mrb[184].mxu1 }
 0x6ff   : > { %v3906_v1 = vadd.f32 %v3905_v4, %v7470_v42  ;;  %v3907_v36 = vpop.f32.mrb[185].mxu1 }
 0x700   : > { %v3908_v39 = vadd.f32 %v3907_v36, %v7472_v25  ;;  %v3909_v50 = vpop.f32.mrb[186].mxu1 }
 0x701   : > { %v4460_v6 = vmax.f32 %v3906_v1, 0.0  ;;  %v3910_v8 = vadd.f32 %v3909_v50, %v7470_v42  ;;  %v3911_v53 = vpop.f32.mrb[187].mxu1 }
 0x702   : > { %v4461_v26 = vmax.f32 %v3908_v39, 0.0  ;;  %v3912_v54 = vadd.f32 %v3911_v53, %v7472_v25 }
 0x703   : > { %4716 = vst [vmem:[%s7484_s26 + $0x1c0] sm:$0xff] %v4460_v6  ;;  %v4462_v20 = vmax.f32 %v3910_v8, 0.0  ;;  %4174 = vmatmul.mubr.bf16.gmra.mrb[36].mxu1 %v7339_v45 }
 0x704   : > { %4717 = vst [vmem:[%s7484_s26 + $0x1c8] sm:$0xff] %v4461_v26  ;;  %v4463_v16 = vmax.f32 %v3912_v54, 0.0  ;;  %4183 = vmatprep.mubr.bf16.mxu1 %v6593_v38 }
 0x705   : > { %4718 = vst [vmem:[%s7484_s26 + $0x1d0] sm:$0xff] %v4462_v20 }
 0x706   : > { %4719 = vst [vmem:[%s7484_s26 + $0x1d8] sm:$0xff] %v4463_v16  ;;  %v3915_v23 = vpop.f32.mrb[188].mxu1 }
 0x707   : > { %v3916_v28 = vadd.f32 %v3915_v23, %v7470_v42  ;;  %v3917_v35 = vpop.f32.mrb[189].mxu1 }
 0x708   : > { %v3918_v27 = vadd.f32 %v3917_v35, %v7472_v25  ;;  %v3919_v31 = vpop.f32.mrb[190].mxu1 }
 0x709   : > { %v4464_v32 = vmax.f32 %v3916_v28, 0.0  ;;  %v3920_v45 = vadd.f32 %v3919_v31, %v7470_v42  ;;  %v3921_v63 = vpop.f32.mrb[191].mxu1 }
 0x70a   : > { %v4465_v46 = vmax.f32 %v3918_v27, 0.0  ;;  %v3922_v58 = vadd.f32 %v3921_v63, %v7472_v25 }
 0x70b   : > { %4720 = vst [vmem:[%s7484_s26 + $0x1e0] sm:$0xff] %v4464_v32  ;;  %v4466_v49 = vmax.f32 %v3920_v45, 0.0  ;;  %4184 = vmatmul.mubr.bf16.gmra.mrb[40].mxu1 %v7353_v21 }
 0x70c   : > { %4721 = vst [vmem:[%s7484_s26 + $0x1e8] sm:$0xff] %v4465_v46  ;;  %v4467_v43 = vmax.f32 %v3922_v58, 0.0  ;;  %4193 = vmatprep.mubr.bf16.mxu1 %v6593_v38 }
 0x70d   : > { %4722 = vst [vmem:[%s7484_s26 + $0x1f0] sm:$0xff] %v4466_v49 }
 0x70e   : > { %4723 = vst [vmem:[%s7484_s26 + $0x1f8] sm:$0xff] %v4467_v43  ;;  %v3925_v29 = vpop.f32.mrb[192].mxu1 }
 0x70f   : > { %v3926_v33 = vadd.f32 %v3925_v29, %v7470_v42  ;;  %v3927_v10 = vpop.f32.mrb[193].mxu1 }
 0x710   : > { %v3928_v59 = vadd.f32 %v3927_v10, %v7472_v25  ;;  %v3929_v18 = vpop.f32.mrb[194].mxu1 }
 0x711   : > { %v4468_v37 = vmax.f32 %v3926_v33, 0.0  ;;  %v3930_v21 = vadd.f32 %v3929_v18, %v7470_v42  ;;  %v3931_v24 = vpop.f32.mrb[195].mxu1 }
 0x712   : > { %v4469_v30 = vmax.f32 %v3928_v59, 0.0  ;;  %v3932_v57 = vadd.f32 %v3931_v24, %v7472_v25 }
 0x713   : > { %4724 = vst [vmem:[%s7484_s26 + $0x200] sm:$0xff] %v4468_v37  ;;  %v4470_v22 = vmax.f32 %v3930_v21, 0.0  ;;  %4194 = vmatmul.mubr.bf16.gmra.mrb[44].mxu1 %v7351_v15 }
 0x714   : > { %4725 = vst [vmem:[%s7484_s26 + $0x208] sm:$0xff] %v4469_v30  ;;  %v4471_v17 = vmax.f32 %v3932_v57, 0.0  ;;  %4203 = vmatprep.mubr.bf16.mxu1 %v6593_v38 }
 0x715   : > { %4726 = vst [vmem:[%s7484_s26 + $0x210] sm:$0xff] %v4470_v22 }
 0x716   : > { %4727 = vst [vmem:[%s7484_s26 + $0x218] sm:$0xff] %v4471_v17  ;;  %v3935_v55 = vpop.f32.mrb[196].mxu1 }
 0x717   : > { %v3936_v61 = vadd.f32 %v3935_v55, %v7470_v42  ;;  %v3937_v13 = vpop.f32.mrb[197].mxu1 }
 0x718   : > { %v3938_v0 = vadd.f32 %v3937_v13, %v7472_v25  ;;  %v3939_v4 = vpop.f32.mrb[198].mxu1 }
 0x719   : > { %v4472_v1 = vmax.f32 %v3936_v61, 0.0  ;;  %v3940_v15 = vadd.f32 %v3939_v4, %v7470_v42  ;;  %v3941_v36 = vpop.f32.mrb[199].mxu1 }
 0x71a   : > { %v4473_v39 = vmax.f32 %v3938_v0, 0.0  ;;  %v3942_v50 = vadd.f32 %v3941_v36, %v7472_v25 }
 0x71b   : > { %4728 = vst [vmem:[%s7484_s26 + $0x220] sm:$0xff] %v4472_v1  ;;  %v4474_v6 = vmax.f32 %v3940_v15, 0.0  ;;  %4204 = vmatmul.mubr.bf16.gmra.mrb[48].mxu1 %v7365_v51 }
 0x71c   : > { %4729 = vst [vmem:[%s7484_s26 + $0x228] sm:$0xff] %v4473_v39  ;;  %v4475_v8 = vmax.f32 %v3942_v50, 0.0  ;;  %4213 = vmatprep.mubr.bf16.mxu1 %v6593_v38 }
 0x71d   : > { %4730 = vst [vmem:[%s7484_s26 + $0x230] sm:$0xff] %v4474_v6 }
 0x71e   : > { %4731 = vst [vmem:[%s7484_s26 + $0x238] sm:$0xff] %v4475_v8  ;;  %v3945_v53 = vpop.f32.mrb[200].mxu1 }
 0x71f   : > { %v3946_v26 = vadd.f32 %v3945_v53, %v7470_v42  ;;  %v3947_v54 = vpop.f32.mrb[201].mxu1 }
 0x720   : > { %v3948_v20 = vadd.f32 %v3947_v54, %v7472_v25  ;;  %v3949_v16 = vpop.f32.mrb[202].mxu1 }
 0x721   : > { %v4476_v23 = vmax.f32 %v3946_v26, 0.0  ;;  %v3950_v51 = vadd.f32 %v3949_v16, %v7470_v42  ;;  %v3951_v28 = vpop.f32.mrb[203].mxu1 }
 0x722   : > { %v4477_v35 = vmax.f32 %v3948_v20, 0.0  ;;  %v3952_v27 = vadd.f32 %v3951_v28, %v7472_v25 }
 0x723   : > { %4732 = vst [vmem:[%s7484_s26 + $0x240] sm:$0xff] %v4476_v23  ;;  %v4478_v31 = vmax.f32 %v3950_v51, 0.0  ;;  %4214 = vmatmul.mubr.bf16.gmra.mrb[52].mxu1 %v7363_v44 }
 0x724   : > { %4733 = vst [vmem:[%s7484_s26 + $0x248] sm:$0xff] %v4477_v35  ;;  %v4479_v32 = vmax.f32 %v3952_v27, 0.0  ;;  %4223 = vmatprep.mubr.bf16.mxu1 %v6593_v38 }
 0x725   : > { %4734 = vst [vmem:[%s7484_s26 + $0x250] sm:$0xff] %v4478_v31 }
 0x726   : > { %4735 = vst [vmem:[%s7484_s26 + $0x258] sm:$0xff] %v4479_v32  ;;  %v3955_v45 = vpop.f32.mrb[204].mxu1 }
 0x727   : > { %v3956_v63 = vadd.f32 %v3955_v45, %v7470_v42  ;;  %v3957_v46 = vpop.f32.mrb[205].mxu1 }
 0x728   : > { %v3958_v58 = vadd.f32 %v3957_v46, %v7472_v25  ;;  %v3959_v49 = vpop.f32.mrb[206].mxu1 }
 0x729   : > { %v4480_v43 = vmax.f32 %v3956_v63, 0.0  ;;  %v3960_v44 = vadd.f32 %v3959_v49, %v7470_v42  ;;  %v3961_v29 = vpop.f32.mrb[207].mxu1 }
 0x72a   : > { %v4481_v33 = vmax.f32 %v3958_v58, 0.0  ;;  %v3962_v10 = vadd.f32 %v3961_v29, %v7472_v25 }
 0x72b   : > { %4736 = vst [vmem:[%s7484_s26 + $0x260] sm:$0xff] %v4480_v43  ;;  %v4482_v59 = vmax.f32 %v3960_v44, 0.0  ;;  %4224 = vmatmul.mubr.bf16.gmra.mrb[56].mxu1 %v7377_v19 }
 0x72c   : > { %4737 = vst [vmem:[%s7484_s26 + $0x268] sm:$0xff] %v4481_v33  ;;  %v4483_v18 = vmax.f32 %v3962_v10, 0.0  ;;  %4233 = vmatprep.mubr.bf16.mxu1 %v6593_v38 }
 0x72d   : > { %4738 = vst [vmem:[%s7484_s26 + $0x270] sm:$0xff] %v4482_v59 }
 0x72e   : > { %4739 = vst [vmem:[%s7484_s26 + $0x278] sm:$0xff] %v4483_v18  ;;  %v3965_v37 = vpop.f32.mrb[208].mxu1 }
 0x72f   : > { %v3966_v21 = vadd.f32 %v3965_v37, %v7470_v42  ;;  %v3967_v24 = vpop.f32.mrb[209].mxu1 }
 0x730   : > { %v3968_v30 = vadd.f32 %v3967_v24, %v7472_v25  ;;  %v3969_v57 = vpop.f32.mrb[210].mxu1 }
 0x731   : > { %v4484_v22 = vmax.f32 %v3966_v21, 0.0  ;;  %v3970_v19 = vadd.f32 %v3969_v57, %v7470_v42  ;;  %v3971_v17 = vpop.f32.mrb[211].mxu1 }
 0x732   : > { %v4485_v55 = vmax.f32 %v3968_v30, 0.0  ;;  %v3972_v61 = vadd.f32 %v3971_v17, %v7472_v25 }
 0x733   : > { %4740 = vst [vmem:[%s7484_s26 + $0x280] sm:$0xff] %v4484_v22  ;;  %v4486_v13 = vmax.f32 %v3970_v19, 0.0  ;;  %4234 = vmatmul.mubr.bf16.gmra.mrb[60].mxu1 %v7375_v9 }
 0x734   : > { %4741 = vst [vmem:[%s7484_s26 + $0x288] sm:$0xff] %v4485_v55  ;;  %v4487_v0 = vmax.f32 %v3972_v61, 0.0  ;;  %4243 = vmatprep.mubr.bf16.mxu1 %v6593_v38 }
 0x735   : > { %4742 = vst [vmem:[%s7484_s26 + $0x290] sm:$0xff] %v4486_v13 }
 0x736   : > { %4743 = vst [vmem:[%s7484_s26 + $0x298] sm:$0xff] %v4487_v0  ;;  %v3975_v4 = vpop.f32.mrb[212].mxu1 }
 0x737   : > { %v3976_v1 = vadd.f32 %v3975_v4, %v7470_v42  ;;  %v3977_v15 = vpop.f32.mrb[213].mxu1 }
 0x738   : > { %v3978_v36 = vadd.f32 %v3977_v15, %v7472_v25  ;;  %v3979_v39 = vpop.f32.mrb[214].mxu1 }
 0x739   : > { %v4488_v50 = vmax.f32 %v3976_v1, 0.0  ;;  %v3980_v9 = vadd.f32 %v3979_v39, %v7470_v42  ;;  %v3981_v6 = vpop.f32.mrb[215].mxu1 }
 0x73a   : > { %v4489_v8 = vmax.f32 %v3978_v36, 0.0  ;;  %v3982_v53 = vadd.f32 %v3981_v6, %v7472_v25 }
 0x73b   : > { %4744 = vst [vmem:[%s7484_s26 + $0x2a0] sm:$0xff] %v4488_v50  ;;  %v4490_v26 = vmax.f32 %v3980_v9, 0.0  ;;  %4244 = vmatmul.mubr.bf16.gmra.mrb[64].mxu1 %v7389_v52 }
 0x73c   : > { %4745 = vst [vmem:[%s7484_s26 + $0x2a8] sm:$0xff] %v4489_v8  ;;  %v4491_v54 = vmax.f32 %v3982_v53, 0.0  ;;  %4253 = vmatprep.mubr.bf16.mxu1 %v6593_v38 }
 0x73d   : > { %4746 = vst [vmem:[%s7484_s26 + $0x2b0] sm:$0xff] %v4490_v26 }
 0x73e   : > { %4747 = vst [vmem:[%s7484_s26 + $0x2b8] sm:$0xff] %v4491_v54  ;;  %v3985_v20 = vpop.f32.mrb[216].mxu1 }
 0x73f   : > { %v3986_v16 = vadd.f32 %v3985_v20, %v7470_v42  ;;  %v3987_v23 = vpop.f32.mrb[217].mxu1 }
 0x740   : > { %v3988_v51 = vadd.f32 %v3987_v23, %v7472_v25  ;;  %v3989_v28 = vpop.f32.mrb[218].mxu1 }
 0x741   : > { %v4492_v35 = vmax.f32 %v3986_v16, 0.0  ;;  %v3990_v52 = vadd.f32 %v3989_v28, %v7470_v42  ;;  %v3991_v27 = vpop.f32.mrb[219].mxu1 }
 0x742   : > { %v4493_v31 = vmax.f32 %v3988_v51, 0.0  ;;  %v3992_v32 = vadd.f32 %v3991_v27, %v7472_v25 }
 0x743   : > { %4748 = vst [vmem:[%s7484_s26 + $0x2c0] sm:$0xff] %v4492_v35  ;;  %v4494_v45 = vmax.f32 %v3990_v52, 0.0  ;;  %4254 = vmatmul.mubr.bf16.gmra.mrb[68].mxu1 %v7387_v41 }
 0x744   : > { %4749 = vst [vmem:[%s7484_s26 + $0x2c8] sm:$0xff] %v4493_v31  ;;  %v4495_v63 = vmax.f32 %v3992_v32, 0.0  ;;  %4263 = vmatprep.mubr.bf16.mxu1 %v6593_v38 }
 0x745   : > { %4750 = vst [vmem:[%s7484_s26 + $0x2d0] sm:$0xff] %v4494_v45 }
 0x746   : > { %4751 = vst [vmem:[%s7484_s26 + $0x2d8] sm:$0xff] %v4495_v63  ;;  %v3995_v46 = vpop.f32.mrb[220].mxu1 }
 0x747   : > { %v3996_v58 = vadd.f32 %v3995_v46, %v7470_v42  ;;  %v3997_v49 = vpop.f32.mrb[221].mxu1 }
 0x748   : > { %v3998_v43 = vadd.f32 %v3997_v49, %v7472_v25  ;;  %v3999_v44 = vpop.f32.mrb[222].mxu1 }
 0x749   : > { %v4496_v29 = vmax.f32 %v3996_v58, 0.0  ;;  %v4000_v41 = vadd.f32 %v3999_v44, %v7470_v42  ;;  %v4001_v33 = vpop.f32.mrb[223].mxu1 }
 0x74a   : > { %v4497_v10 = vmax.f32 %v3998_v43, 0.0  ;;  %v4002_v59 = vadd.f32 %v4001_v33, %v7472_v25 }
 0x74b   : > { %4752 = vst [vmem:[%s7484_s26 + $0x2e0] sm:$0xff] %v4496_v29  ;;  %v4498_v18 = vmax.f32 %v4000_v41, 0.0  ;;  %4264 = vmatmul.mubr.bf16.gmra.mrb[72].mxu1 %v7401_v62 }
 0x74c   : > { %4753 = vst [vmem:[%s7484_s26 + $0x2e8] sm:$0xff] %v4497_v10  ;;  %v4499_v37 = vmax.f32 %v4002_v59, 0.0  ;;  %4273 = vmatprep.mubr.bf16.mxu1 %v6593_v38 }
 0x74d   : > { %4754 = vst [vmem:[%s7484_s26 + $0x2f0] sm:$0xff] %v4498_v18 }
 0x74e   : > { %4755 = vst [vmem:[%s7484_s26 + $0x2f8] sm:$0xff] %v4499_v37  ;;  %v4005_v21 = vpop.f32.mrb[224].mxu1 }
 0x74f   : > { %v4006_v24 = vadd.f32 %v4005_v21, %v7470_v42  ;;  %v4007_v30 = vpop.f32.mrb[225].mxu1 }
 0x750   : > { %v4008_v57 = vadd.f32 %v4007_v30, %v7472_v25  ;;  %v4009_v22 = vpop.f32.mrb[226].mxu1 }
 0x751   : > { %v4500_v19 = vmax.f32 %v4006_v24, 0.0  ;;  %v4010_v62 = vadd.f32 %v4009_v22, %v7470_v42  ;;  %v4011_v17 = vpop.f32.mrb[227].mxu1 }
 0x752   : > { %v4501_v55 = vmax.f32 %v4008_v57, 0.0  ;;  %v4012_v61 = vadd.f32 %v4011_v17, %v7472_v25 }
 0x753   : > { %4756 = vst [vmem:[%s7484_s26 + $0x300] sm:$0xff] %v4500_v19  ;;  %v4502_v13 = vmax.f32 %v4010_v62, 0.0  ;;  %4274 = vmatmul.mubr.bf16.gmra.mrb[76].mxu1 %v7399_v34 }
 0x754   : > { %4757 = vst [vmem:[%s7484_s26 + $0x308] sm:$0xff] %v4501_v55  ;;  %v4503_v0 = vmax.f32 %v4012_v61, 0.0  ;;  %4283 = vmatprep.mubr.bf16.mxu1 %v6593_v38 }
 0x755   : > { %4758 = vst [vmem:[%s7484_s26 + $0x310] sm:$0xff] %v4502_v13 }
 0x756   : > { %4759 = vst [vmem:[%s7484_s26 + $0x318] sm:$0xff] %v4503_v0  ;;  %v4015_v4 = vpop.f32.mrb[228].mxu1 }
 0x757   : > { %v4016_v1 = vadd.f32 %v4015_v4, %v7470_v42  ;;  %v4017_v15 = vpop.f32.mrb[229].mxu1 }
 0x758   : > { %v4018_v36 = vadd.f32 %v4017_v15, %v7472_v25  ;;  %v4019_v39 = vpop.f32.mrb[230].mxu1 }
 0x759   : > { %v4504_v50 = vmax.f32 %v4016_v1, 0.0  ;;  %v4020_v34 = vadd.f32 %v4019_v39, %v7470_v42  ;;  %v4021_v9 = vpop.f32.mrb[231].mxu1 }
 0x75a   : > { %v4505_v6 = vmax.f32 %v4018_v36, 0.0  ;;  %v4022_v8 = vadd.f32 %v4021_v9, %v7472_v25 }
 0x75b   : > { %4760 = vst [vmem:[%s7484_s26 + $0x320] sm:$0xff] %v4504_v50  ;;  %v4506_v53 = vmax.f32 %v4020_v34, 0.0  ;;  %4284 = vmatmul.mubr.bf16.gmra.mrb[80].mxu1 %v7413_v7 }
 0x75c   : > { %4761 = vst [vmem:[%s7484_s26 + $0x328] sm:$0xff] %v4505_v6  ;;  %v4507_v26 = vmax.f32 %v4022_v8, 0.0  ;;  %4293 = vmatprep.mubr.bf16.mxu1 %v6593_v38 }
 0x75d   : > { %4762 = vst [vmem:[%s7484_s26 + $0x330] sm:$0xff] %v4506_v53 }
 0x75e   : > { %4763 = vst [vmem:[%s7484_s26 + $0x338] sm:$0xff] %v4507_v26  ;;  %v4025_v54 = vpop.f32.mrb[232].mxu1 }
 0x75f   : > { %v4026_v20 = vadd.f32 %v4025_v54, %v7470_v42  ;;  %v4027_v16 = vpop.f32.mrb[233].mxu1 }
 0x760   : > { %v4028_v23 = vadd.f32 %v4027_v16, %v7472_v25  ;;  %v4029_v51 = vpop.f32.mrb[234].mxu1 }
 0x761   : > { %v4508_v28 = vmax.f32 %v4026_v20, 0.0  ;;  %v4030_v7 = vadd.f32 %v4029_v51, %v7470_v42  ;;  %v4031_v35 = vpop.f32.mrb[235].mxu1 }
 0x762   : > { %v4509_v52 = vmax.f32 %v4028_v23, 0.0  ;;  %v4032_v27 = vadd.f32 %v4031_v35, %v7472_v25 }
 0x763   : > { %4764 = vst [vmem:[%s7484_s26 + $0x340] sm:$0xff] %v4508_v28  ;;  %v4510_v31 = vmax.f32 %v4030_v7, 0.0  ;;  %4294 = vmatmul.mubr.bf16.gmra.mrb[84].mxu1 %v7411_v3 }
 0x764   : > { %4765 = vst [vmem:[%s7484_s26 + $0x348] sm:$0xff] %v4509_v52  ;;  %v4511_v32 = vmax.f32 %v4032_v27, 0.0  ;;  %4303 = vmatprep.mubr.bf16.mxu1 %v6593_v38 }
 0x765   : > { %4766 = vst [vmem:[%s7484_s26 + $0x350] sm:$0xff] %v4510_v31 }
 0x766   : > { %4767 = vst [vmem:[%s7484_s26 + $0x358] sm:$0xff] %v4511_v32  ;;  %v4035_v45 = vpop.f32.mrb[236].mxu1 }
 0x767   : > { %v4036_v63 = vadd.f32 %v4035_v45, %v7470_v42  ;;  %v4037_v46 = vpop.f32.mrb[237].mxu1 }
 0x768   : > { %v4038_v58 = vadd.f32 %v4037_v46, %v7472_v25  ;;  %v4039_v49 = vpop.f32.mrb[238].mxu1 }
 0x769   : > { %v4512_v43 = vmax.f32 %v4036_v63, 0.0  ;;  %v4040_v3 = vadd.f32 %v4039_v49, %v7470_v42  ;;  %v4041_v44 = vpop.f32.mrb[239].mxu1 }
 0x76a   : > { %v4513_v29 = vmax.f32 %v4038_v58, 0.0  ;;  %v4042_v41 = vadd.f32 %v4041_v44, %v7472_v25 }
 0x76b   : > { %4768 = vst [vmem:[%s7484_s26 + $0x360] sm:$0xff] %v4512_v43  ;;  %v4514_v33 = vmax.f32 %v4040_v3, 0.0  ;;  %4304 = vmatmul.mubr.bf16.gmra.mrb[88].mxu1 %v7425_v11 }
 0x76c   : > { %4769 = vst [vmem:[%s7484_s26 + $0x368] sm:$0xff] %v4513_v29  ;;  %v4515_v10 = vmax.f32 %v4042_v41, 0.0  ;;  %4313 = vmatprep.mubr.bf16.mxu1 %v6593_v38 }
 0x76d   : > { %4770 = vst [vmem:[%s7484_s26 + $0x370] sm:$0xff] %v4514_v33 }
 0x76e   : > { %4771 = vst [vmem:[%s7484_s26 + $0x378] sm:$0xff] %v4515_v10  ;;  %v4045_v59 = vpop.f32.mrb[240].mxu1 }
 0x76f   : > { %v4046_v18 = vadd.f32 %v4045_v59, %v7470_v42  ;;  %v4047_v37 = vpop.f32.mrb[241].mxu1 }
 0x770   : > { %v4048_v21 = vadd.f32 %v4047_v37, %v7472_v25  ;;  %v4049_v24 = vpop.f32.mrb[242].mxu1 }
 0x771   : > { %v4516_v30 = vmax.f32 %v4046_v18, 0.0  ;;  %v4050_v11 = vadd.f32 %v4049_v24, %v7470_v42  ;;  %v4051_v57 = vpop.f32.mrb[243].mxu1 }
 0x772   : > { %v4517_v22 = vmax.f32 %v4048_v21, 0.0  ;;  %v4052_v19 = vadd.f32 %v4051_v57, %v7472_v25 }
 0x773   : > { %4772 = vst [vmem:[%s7484_s26 + $0x380] sm:$0xff] %v4516_v30  ;;  %v4518_v62 = vmax.f32 %v4050_v11, 0.0  ;;  %4314 = vmatmul.mubr.bf16.gmra.mrb[92].mxu1 %v7423_v5 }
 0x774   : > { %4773 = vst [vmem:[%s7484_s26 + $0x388] sm:$0xff] %v4517_v22  ;;  %v4519_v17 = vmax.f32 %v4052_v19, 0.0  ;;  %4323 = vmatprep.mubr.bf16.mxu1 %v6593_v38 }
 0x775   : > { %4774 = vst [vmem:[%s7484_s26 + $0x390] sm:$0xff] %v4518_v62 }
 0x776   : > { %4775 = vst [vmem:[%s7484_s26 + $0x398] sm:$0xff] %v4519_v17  ;;  %v4055_v55 = vpop.f32.mrb[244].mxu1 }
 0x777   : > { %v4056_v61 = vadd.f32 %v4055_v55, %v7470_v42  ;;  %v4057_v13 = vpop.f32.mrb[245].mxu1 }
 0x778   : > { %v4058_v0 = vadd.f32 %v4057_v13, %v7472_v25  ;;  %v4059_v4 = vpop.f32.mrb[246].mxu1 }
 0x779   : > { %v4520_v1 = vmax.f32 %v4056_v61, 0.0  ;;  %v4060_v5 = vadd.f32 %v4059_v4, %v7470_v42  ;;  %v4061_v15 = vpop.f32.mrb[247].mxu1 }
 0x77a   : > { %v4521_v36 = vmax.f32 %v4058_v0, 0.0  ;;  %v4062_v39 = vadd.f32 %v4061_v15, %v7472_v25 }
 0x77b   : > { %4776 = vst [vmem:[%s7484_s26 + $0x3a0] sm:$0xff] %v4520_v1  ;;  %v4522_v50 = vmax.f32 %v4060_v5, 0.0  ;;  %4324 = vmatmul.mubr.bf16.gmra.mrb[96].mxu1 %v7437_v48 }
 0x77c   : > { %4777 = vst [vmem:[%s7484_s26 + $0x3a8] sm:$0xff] %v4521_v36  ;;  %v4523_v34 = vmax.f32 %v4062_v39, 0.0  ;;  %4333 = vmatprep.mubr.bf16.mxu1 %v6593_v38 }
 0x77d   : > { %4778 = vst [vmem:[%s7484_s26 + $0x3b0] sm:$0xff] %v4522_v50 }
 0x77e   : > { %4779 = vst [vmem:[%s7484_s26 + $0x3b8] sm:$0xff] %v4523_v34  ;;  %v4065_v9 = vpop.f32.mrb[248].mxu1 }
 0x77f   : > { %v4066_v6 = vadd.f32 %v4065_v9, %v7470_v42  ;;  %v4067_v8 = vpop.f32.mrb[249].mxu1 }
 0x780   : > { %v4068_v53 = vadd.f32 %v4067_v8, %v7472_v25  ;;  %v4069_v26 = vpop.f32.mrb[250].mxu1 }
 0x781   : > { %v4524_v54 = vmax.f32 %v4066_v6, 0.0  ;;  %v4070_v48 = vadd.f32 %v4069_v26, %v7470_v42  ;;  %v4071_v20 = vpop.f32.mrb[251].mxu1 }
 0x782   : > { %v4525_v16 = vmax.f32 %v4068_v53, 0.0  ;;  %v4072_v23 = vadd.f32 %v4071_v20, %v7472_v25 }
 0x783   : > { %4780 = vst [vmem:[%s7484_s26 + $0x3c0] sm:$0xff] %v4524_v54  ;;  %v4526_v51 = vmax.f32 %v4070_v48, 0.0  ;;  %4334 = vmatmul.mubr.bf16.gmra.mrb[100].mxu1 %v7435_v47 }
 0x784   : > { %4781 = vst [vmem:[%s7484_s26 + $0x3c8] sm:$0xff] %v4525_v16  ;;  %v4527_v28 = vmax.f32 %v4072_v23, 0.0  ;;  %4343 = vmatprep.mubr.bf16.mxu1 %v6593_v38 }
 0x785   : > { %4782 = vst [vmem:[%s7484_s26 + $0x3d0] sm:$0xff] %v4526_v51 }
 0x786   : > { %4783 = vst [vmem:[%s7484_s26 + $0x3d8] sm:$0xff] %v4527_v28  ;;  %v4075_v7 = vpop.f32.mrb[252].mxu1 }
 0x787   : > { %v4076_v35 = vadd.f32 %v4075_v7, %v7470_v42  ;;  %v4077_v52 = vpop.f32.mrb[253].mxu1 }
 0x788   : > { %v4078_v27 = vadd.f32 %v4077_v52, %v7472_v25  ;;  %v4079_v31 = vpop.f32.mrb[254].mxu1 }
 0x789   : > { %v4528_v32 = vmax.f32 %v4076_v35, 0.0  ;;  %v4080_v47 = vadd.f32 %v4079_v31, %v7470_v42  ;;  %v4081_v45 = vpop.f32.mrb[255].mxu1 }
 0x78a   : > { %v4529_v63 = vmax.f32 %v4078_v27, 0.0  ;;  %v4082_v46 = vadd.f32 %v4081_v45, %v7472_v25 }
 0x78b   : > { %4784 = vst [vmem:[%s7484_s26 + $0x3e0] sm:$0xff] %v4528_v32  ;;  %v4530_v58 = vmax.f32 %v4080_v47, 0.0  ;;  %4344 = vmatmul.mubr.bf16.gmra.mrb[104].mxu1 %v7449_v14 }
 0x78c   : > { %4785 = vst [vmem:[%s7484_s26 + $0x3e8] sm:$0xff] %v4529_v63  ;;  %v4531_v49 = vmax.f32 %v4082_v46, 0.0  ;;  %4353 = vmatprep.mubr.bf16.mxu1 %v6593_v38 }
 0x78d   : > { %4786 = vst [vmem:[%s7484_s26 + $0x3f0] sm:$0xff] %v4530_v58 }
 0x78e   : > { %4787 = vst [vmem:[%s7484_s26 + $0x3f8] sm:$0xff] %v4531_v49  ;;  %v4085_v43 = vpop.f32.mrb[0].mxu1 }
 0x78f   : > { %v4086_v3 = vadd.f32 %v4085_v43, %v7470_v42  ;;  %v4087_v44 = vpop.f32.mrb[1].mxu1 }
 0x790   : > { %v4088_v29 = vadd.f32 %v4087_v44, %v7472_v25  ;;  %v4089_v41 = vpop.f32.mrb[2].mxu1 }
 0x791   : > { %v4532_v33 = vmax.f32 %v4086_v3, 0.0  ;;  %v4090_v14 = vadd.f32 %v4089_v41, %v7470_v42  ;;  %v4091_v10 = vpop.f32.mrb[3].mxu1 }
 0x792   : > { %v4533_v59 = vmax.f32 %v4088_v29, 0.0  ;;  %v4092_v18 = vadd.f32 %v4091_v10, %v7472_v25 }
 0x793   : > { %4788 = vst [vmem:[%s7484_s26 + $0x400] sm:$0xff] %v4532_v33  ;;  %v4534_v37 = vmax.f32 %v4090_v14, 0.0  ;;  %4354 = vmatmul.mubr.bf16.gmra.mrb[108].mxu1 %v7447_v2 }
 0x794   : > { %4789 = vst [vmem:[%s7484_s26 + $0x408] sm:$0xff] %v4533_v59  ;;  %v4535_v21 = vmax.f32 %v4092_v18, 0.0  ;;  %4363 = vmatprep.mubr.bf16.mxu1 %v6593_v38 }
 0x795   : > { %4790 = vst [vmem:[%s7484_s26 + $0x410] sm:$0xff] %v4534_v37 }
 0x796   : > { %4791 = vst [vmem:[%s7484_s26 + $0x418] sm:$0xff] %v4535_v21  ;;  %v4095_v24 = vpop.f32.mrb[4].mxu1 }
 0x797   : > { %v4096_v30 = vadd.f32 %v4095_v24, %v7470_v42  ;;  %v4097_v11 = vpop.f32.mrb[5].mxu1 }
 0x798   : > { %v4098_v57 = vadd.f32 %v4097_v11, %v7472_v25  ;;  %v4099_v22 = vpop.f32.mrb[6].mxu1 }
 0x799   : > { %v4536_v19 = vmax.f32 %v4096_v30, 0.0  ;;  %v4100_v2 = vadd.f32 %v4099_v22, %v7470_v42  ;;  %v4101_v62 = vpop.f32.mrb[7].mxu1 }
 0x79a   : > { %v4537_v17 = vmax.f32 %v4098_v57, 0.0  ;;  %v4102_v55 = vadd.f32 %v4101_v62, %v7472_v25 }
 0x79b   : > { %4792 = vst [vmem:[%s7484_s26 + $0x420] sm:$0xff] %v4536_v19  ;;  %v4538_v61 = vmax.f32 %v4100_v2, 0.0  ;;  %4364 = vmatmul.mubr.bf16.gmra.mrb[112].mxu1 %v7461_v12 }
 0x79c   : > { %4793 = vst [vmem:[%s7484_s26 + $0x428] sm:$0xff] %v4537_v17  ;;  %v4539_v13 = vmax.f32 %v4102_v55, 0.0  ;;  %4373 = vmatprep.mubr.bf16.mxu1 %v6593_v38 }
 0x79d   : > { %4794 = vst [vmem:[%s7484_s26 + $0x430] sm:$0xff] %v4538_v61 }
 0x79e   : > { %4795 = vst [vmem:[%s7484_s26 + $0x438] sm:$0xff] %v4539_v13  ;;  %v4105_v0 = vpop.f32.mrb[8].mxu1 }
 0x79f   : > { %v4106_v4 = vadd.f32 %v4105_v0, %v7470_v42  ;;  %v4107_v1 = vpop.f32.mrb[9].mxu1 }
 0x7a0   : > { %v4108_v5 = vadd.f32 %v4107_v1, %v7472_v25  ;;  %v4109_v15 = vpop.f32.mrb[10].mxu1 }
 0x7a1   : > { %v4540_v36 = vmax.f32 %v4106_v4, 0.0  ;;  %v4110_v12 = vadd.f32 %v4109_v15, %v7470_v42  ;;  %v4111_v39 = vpop.f32.mrb[11].mxu1 }
 0x7a2   : > { %v4541_v50 = vmax.f32 %v4108_v5, 0.0  ;;  %v4112_v34 = vadd.f32 %v4111_v39, %v7472_v25 }
 0x7a3   : > { %4796 = vst [vmem:[%s7484_s26 + $0x440] sm:$0xff] %v4540_v36  ;;  %v4542_v9 = vmax.f32 %v4110_v12, 0.0  ;;  %4374 = vmatmul.mubr.bf16.gmra.mrb[116].mxu1 %v7459_v40 }
 0x7a4   : > { %4797 = vst [vmem:[%s7484_s26 + $0x448] sm:$0xff] %v4541_v50  ;;  %v4543_v6 = vmax.f32 %v4112_v34, 0.0  ;;  %4383 = vmatprep.mubr.bf16.mxu1 %v6593_v38 }
 0x7a5   : > { %4798 = vst [vmem:[%s7484_s26 + $0x450] sm:$0xff] %v4542_v9 }
 0x7a6   : > { %4799 = vst [vmem:[%s7484_s26 + $0x458] sm:$0xff] %v4543_v6  ;;  %v4115_v8 = vpop.f32.mrb[12].mxu1 }
 0x7a7   : > { %v4116_v53 = vadd.f32 %v4115_v8, %v7470_v42  ;;  %v4117_v26 = vpop.f32.mrb[13].mxu1 }
 0x7a8   : > { %v4118_v54 = vadd.f32 %v4117_v26, %v7472_v25  ;;  %v4119_v48 = vpop.f32.mrb[14].mxu1 }
 0x7a9   : > { %v4544_v20 = vmax.f32 %v4116_v53, 0.0  ;;  %v4120_v40 = vadd.f32 %v4119_v48, %v7470_v42  ;;  %v4121_v16 = vpop.f32.mrb[15].mxu1 }
 0x7aa   : > { %v4545_v23 = vmax.f32 %v4118_v54, 0.0  ;;  %v4122_v51 = vadd.f32 %v4121_v16, %v7472_v25 }
 0x7ab   : > { %4800 = vst [vmem:[%s7484_s26 + $0x460] sm:$0xff] %v4544_v20  ;;  %v4546_v28 = vmax.f32 %v4120_v40, 0.0  ;;  %4384 = vmatmul.mubr.bf16.gmra.mrb[120].mxu1 %v7478_v56 }
 0x7ac   : > { %4801 = vst [vmem:[%s7484_s26 + $0x468] sm:$0xff] %v4545_v23  ;;  %v4547_v7 = vmax.f32 %v4122_v51, 0.0  ;;  %4393 = vmatprep.mubr.bf16.mxu1 %v6593_v38 }
 0x7ad   : > { %4802 = vst [vmem:[%s7484_s26 + $0x470] sm:$0xff] %v4546_v28 }
 0x7ae   : > { %4803 = vst [vmem:[%s7484_s26 + $0x478] sm:$0xff] %v4547_v7  ;;  %v4125_v35 = vpop.f32.mrb[16].mxu1 }
 0x7af   : > { %v4126_v52 = vadd.f32 %v4125_v35, %v7470_v42  ;;  %v4127_v27 = vpop.f32.mrb[17].mxu1 }
 0x7b0   : > { %v4128_v31 = vadd.f32 %v4127_v27, %v7472_v25  ;;  %v4129_v32 = vpop.f32.mrb[18].mxu1 }
 0x7b1   : > { %v4548_v47 = vmax.f32 %v4126_v52, 0.0  ;;  %v4130_v56 = vadd.f32 %v4129_v32, %v7470_v42  ;;  %v4131_v45 = vpop.f32.mrb[19].mxu1 }
 0x7b2   : > { %v4549_v63 = vmax.f32 %v4128_v31, 0.0  ;;  %v4132_v46 = vadd.f32 %v4131_v45, %v7472_v25 }
 0x7b3   : > { %4804 = vst [vmem:[%s7484_s26 + $0x480] sm:$0xff] %v4548_v47  ;;  %v4550_v38 = vmax.f32 %v4130_v56, 0.0  ;;  %4394 = vmatmul.mubr.bf16.gmra.mrb[124].mxu1 %v7475_v60 }
 0x7b4   : > { %4805 = vst [vmem:[%s7484_s26 + $0x488] sm:$0xff] %v4549_v63  ;;  %v4551_v58 = vmax.f32 %v4132_v46, 0.0 }
 0x7b5   : > { %4806 = vst [vmem:[%s7484_s26 + $0x490] sm:$0xff] %v4550_v38 }
 0x7b6   : > { %4807 = vst [vmem:[%s7484_s26 + $0x498] sm:$0xff] %v4551_v58  ;;  %v4135_v49 = vpop.f32.mrb[20].mxu1 }
 0x7b7   : > { %v4136_v43 = vadd.f32 %v4135_v49, %v7470_v42  ;;  %v4137_v3 = vpop.f32.mrb[21].mxu1 }
 0x7b8   : > { %v4138_v44 = vadd.f32 %v4137_v3, %v7472_v25  ;;  %v4139_v29 = vpop.f32.mrb[22].mxu1 }
 0x7b9   : > { %v4552_v41 = vmax.f32 %v4136_v43, 0.0  ;;  %v4140_v33 = vadd.f32 %v4139_v29, %v7470_v42  ;;  %v4141_v14 = vpop.f32.mrb[23].mxu1 }
 0x7ba   : > { %v4553_v10 = vmax.f32 %v4138_v44, 0.0  ;;  %v4142_v60 = vadd.f32 %v4141_v14, %v7472_v25 }
 0x7bb   : > { %4808 = vst [vmem:[%s7484_s26 + $0x4a0] sm:$0xff] %v4552_v41  ;;  %v4554_v59 = vmax.f32 %v4140_v33, 0.0 }
 0x7bc   : > { %4809 = vst [vmem:[%s7484_s26 + $0x4a8] sm:$0xff] %v4553_v10  ;;  %v4555_v18 = vmax.f32 %v4142_v60, 0.0 }
 0x7bd   : > { %4810 = vst [vmem:[%s7484_s26 + $0x4b0] sm:$0xff] %v4554_v59 }
 0x7be   : > { %4811 = vst [vmem:[%s7484_s26 + $0x4b8] sm:$0xff] %v4555_v18  ;;  %v4145_v37 = vpop.f32.mrb[24].mxu1 }
 0x7bf   : > { %v4146_v21 = vadd.f32 %v4145_v37, %v7470_v42  ;;  %v4147_v24 = vpop.f32.mrb[25].mxu1 }
 0x7c0   : > { %v4148_v30 = vadd.f32 %v4147_v24, %v7472_v25  ;;  %v4149_v11 = vpop.f32.mrb[26].mxu1 }
 0x7c1   : > { %v4556_v57 = vmax.f32 %v4146_v21, 0.0  ;;  %v4150_v22 = vadd.f32 %v4149_v11, %v7470_v42  ;;  %v4151_v19 = vpop.f32.mrb[27].mxu1 }
 0x7c2   : > { %v4557_v2 = vmax.f32 %v4148_v30, 0.0  ;;  %v4152_v62 = vadd.f32 %v4151_v19, %v7472_v25 }
 0x7c3   : > { %4812 = vst [vmem:[%s7484_s26 + $0x4c0] sm:$0xff] %v4556_v57  ;;  %v4558_v17 = vmax.f32 %v4150_v22, 0.0 }
 0x7c4   : > { %4813 = vst [vmem:[%s7484_s26 + $0x4c8] sm:$0xff] %v4557_v2  ;;  %v4559_v55 = vmax.f32 %v4152_v62, 0.0 }
 0x7c5   : > { %4814 = vst [vmem:[%s7484_s26 + $0x4d0] sm:$0xff] %v4558_v17 }
 0x7c6   : > { %4815 = vst [vmem:[%s7484_s26 + $0x4d8] sm:$0xff] %v4559_v55  ;;  %v4155_v61 = vpop.f32.mrb[28].mxu1 }
 0x7c7   : > { %v4156_v13 = vadd.f32 %v4155_v61, %v7470_v42  ;;  %v4157_v0 = vpop.f32.mrb[29].mxu1 }
 0x7c8   : > { %v4158_v4 = vadd.f32 %v4157_v0, %v7472_v25  ;;  %v4159_v1 = vpop.f32.mrb[30].mxu1 }
 0x7c9   : > { %v4560_v5 = vmax.f32 %v4156_v13, 0.0  ;;  %v4160_v15 = vadd.f32 %v4159_v1, %v7470_v42  ;;  %v4161_v36 = vpop.f32.mrb[31].mxu1 }
 0x7ca   : > { %v4561_v12 = vmax.f32 %v4158_v4, 0.0  ;;  %v4162_v39 = vadd.f32 %v4161_v36, %v7472_v25 }
 0x7cb   : > { %4816 = vst [vmem:[%s7484_s26 + $0x4e0] sm:$0xff] %v4560_v5  ;;  %v4562_v50 = vmax.f32 %v4160_v15, 0.0 }
 0x7cc   : > { %4817 = vst [vmem:[%s7484_s26 + $0x4e8] sm:$0xff] %v4561_v12  ;;  %v4563_v34 = vmax.f32 %v4162_v39, 0.0 }
 0x7cd   : > { %4818 = vst [vmem:[%s7484_s26 + $0x4f0] sm:$0xff] %v4562_v50 }
 0x7ce   : > { %4819 = vst [vmem:[%s7484_s26 + $0x4f8] sm:$0xff] %v4563_v34  ;;  %v4165_v9 = vpop.f32.mrb[32].mxu1 }
 0x7cf   : > { %v4166_v6 = vadd.f32 %v4165_v9, %v7470_v42  ;;  %v4167_v8 = vpop.f32.mrb[33].mxu1 }
 0x7d0   : > { %v4168_v53 = vadd.f32 %v4167_v8, %v7472_v25  ;;  %v4169_v26 = vpop.f32.mrb[34].mxu1 }
 0x7d1   : > { %v4564_v54 = vmax.f32 %v4166_v6, 0.0  ;;  %v4170_v48 = vadd.f32 %v4169_v26, %v7470_v42  ;;  %v4171_v20 = vpop.f32.mrb[35].mxu1 }
 0x7d2   : > { %v4565_v40 = vmax.f32 %v4168_v53, 0.0  ;;  %v4172_v16 = vadd.f32 %v4171_v20, %v7472_v25 }
 0x7d3   : > { %4820 = vst [vmem:[%s7484_s26 + $0x500] sm:$0xff] %v4564_v54  ;;  %v4566_v23 = vmax.f32 %v4170_v48, 0.0 }
 0x7d4   : > { %4821 = vst [vmem:[%s7484_s26 + $0x508] sm:$0xff] %v4565_v40  ;;  %v4567_v51 = vmax.f32 %v4172_v16, 0.0 }
 0x7d5   : > { %4822 = vst [vmem:[%s7484_s26 + $0x510] sm:$0xff] %v4566_v23 }
 0x7d6   : > { %4823 = vst [vmem:[%s7484_s26 + $0x518] sm:$0xff] %v4567_v51  ;;  %v4175_v28 = vpop.f32.mrb[36].mxu1 }
 0x7d7   : > { %v4176_v7 = vadd.f32 %v4175_v28, %v7470_v42  ;;  %v4177_v35 = vpop.f32.mrb[37].mxu1 }
 0x7d8   : > { %v4178_v52 = vadd.f32 %v4177_v35, %v7472_v25  ;;  %v4179_v27 = vpop.f32.mrb[38].mxu1 }
 0x7d9   : > { %v4568_v31 = vmax.f32 %v4176_v7, 0.0  ;;  %v4180_v32 = vadd.f32 %v4179_v27, %v7470_v42  ;;  %v4181_v47 = vpop.f32.mrb[39].mxu1 }
 0x7da   : > { %v4569_v56 = vmax.f32 %v4178_v52, 0.0  ;;  %v4182_v45 = vadd.f32 %v4181_v47, %v7472_v25 }
 0x7db   : > { %4824 = vst [vmem:[%s7484_s26 + $0x520] sm:$0xff] %v4568_v31  ;;  %v4570_v63 = vmax.f32 %v4180_v32, 0.0 }
 0x7dc   : > { %4825 = vst [vmem:[%s7484_s26 + $0x528] sm:$0xff] %v4569_v56  ;;  %v4571_v46 = vmax.f32 %v4182_v45, 0.0 }
 0x7dd   : > { %4826 = vst [vmem:[%s7484_s26 + $0x530] sm:$0xff] %v4570_v63 }
 0x7de   : > { %4827 = vst [vmem:[%s7484_s26 + $0x538] sm:$0xff] %v4571_v46  ;;  %v4185_v38 = vpop.f32.mrb[40].mxu1 }
 0x7df   : > { %v4186_v58 = vadd.f32 %v4185_v38, %v7470_v42  ;;  %v4187_v49 = vpop.f32.mrb[41].mxu1 }
 0x7e0   : > { %v4188_v43 = vadd.f32 %v4187_v49, %v7472_v25  ;;  %v4189_v3 = vpop.f32.mrb[42].mxu1 }
 0x7e1   : > { %v4572_v44 = vmax.f32 %v4186_v58, 0.0  ;;  %v4190_v29 = vadd.f32 %v4189_v3, %v7470_v42  ;;  %v4191_v41 = vpop.f32.mrb[43].mxu1 }
 0x7e2   : > { %v4573_v33 = vmax.f32 %v4188_v43, 0.0  ;;  %v4192_v14 = vadd.f32 %v4191_v41, %v7472_v25 }
 0x7e3   : > { %4828 = vst [vmem:[%s7484_s26 + $0x540] sm:$0xff] %v4572_v44  ;;  %v4574_v10 = vmax.f32 %v4190_v29, 0.0 }
 0x7e4   : > { %4829 = vst [vmem:[%s7484_s26 + $0x548] sm:$0xff] %v4573_v33  ;;  %v4575_v60 = vmax.f32 %v4192_v14, 0.0 }
 0x7e5   : > { %4830 = vst [vmem:[%s7484_s26 + $0x550] sm:$0xff] %v4574_v10 }
 0x7e6   : > { %4831 = vst [vmem:[%s7484_s26 + $0x558] sm:$0xff] %v4575_v60  ;;  %v4195_v59 = vpop.f32.mrb[44].mxu1 }
 0x7e7   : > { %v4196_v18 = vadd.f32 %v4195_v59, %v7470_v42  ;;  %v4197_v37 = vpop.f32.mrb[45].mxu1 }
 0x7e8   : > { %v4198_v21 = vadd.f32 %v4197_v37, %v7472_v25  ;;  %v4199_v24 = vpop.f32.mrb[46].mxu1 }
 0x7e9   : > { %v4576_v30 = vmax.f32 %v4196_v18, 0.0  ;;  %v4200_v11 = vadd.f32 %v4199_v24, %v7470_v42  ;;  %v4201_v57 = vpop.f32.mrb[47].mxu1 }
 0x7ea   : > { %v4577_v22 = vmax.f32 %v4198_v21, 0.0  ;;  %v4202_v19 = vadd.f32 %v4201_v57, %v7472_v25 }
 0x7eb   : > { %4832 = vst [vmem:[%s7484_s26 + $0x560] sm:$0xff] %v4576_v30  ;;  %v4578_v2 = vmax.f32 %v4200_v11, 0.0 }
 0x7ec   : > { %4833 = vst [vmem:[%s7484_s26 + $0x568] sm:$0xff] %v4577_v22  ;;  %v4579_v62 = vmax.f32 %v4202_v19, 0.0 }
 0x7ed   : > { %4834 = vst [vmem:[%s7484_s26 + $0x570] sm:$0xff] %v4578_v2 }
 0x7ee   : > { %4835 = vst [vmem:[%s7484_s26 + $0x578] sm:$0xff] %v4579_v62  ;;  %v4205_v17 = vpop.f32.mrb[48].mxu1 }
 0x7ef   : > { %v4206_v55 = vadd.f32 %v4205_v17, %v7470_v42  ;;  %v4207_v61 = vpop.f32.mrb[49].mxu1 }
 0x7f0   : > { %v4208_v13 = vadd.f32 %v4207_v61, %v7472_v25  ;;  %v4209_v0 = vpop.f32.mrb[50].mxu1 }
 0x7f1   : > { %v4580_v4 = vmax.f32 %v4206_v55, 0.0  ;;  %v4210_v1 = vadd.f32 %v4209_v0, %v7470_v42  ;;  %v4211_v5 = vpop.f32.mrb[51].mxu1 }
 0x7f2   : > { %v4581_v15 = vmax.f32 %v4208_v13, 0.0  ;;  %v4212_v36 = vadd.f32 %v4211_v5, %v7472_v25 }
 0x7f3   : > { %4836 = vst [vmem:[%s7484_s26 + $0x580] sm:$0xff] %v4580_v4  ;;  %v4582_v12 = vmax.f32 %v4210_v1, 0.0 }
 0x7f4   : > { %4837 = vst [vmem:[%s7484_s26 + $0x588] sm:$0xff] %v4581_v15  ;;  %v4583_v39 = vmax.f32 %v4212_v36, 0.0 }
 0x7f5   : > { %4838 = vst [vmem:[%s7484_s26 + $0x590] sm:$0xff] %v4582_v12 }
 0x7f6   : > { %4839 = vst [vmem:[%s7484_s26 + $0x598] sm:$0xff] %v4583_v39  ;;  %v4215_v50 = vpop.f32.mrb[52].mxu1 }
 0x7f7   : > { %v4216_v34 = vadd.f32 %v4215_v50, %v7470_v42  ;;  %v4217_v9 = vpop.f32.mrb[53].mxu1 }
 0x7f8   : > { %v4218_v6 = vadd.f32 %v4217_v9, %v7472_v25  ;;  %v4219_v8 = vpop.f32.mrb[54].mxu1 }
 0x7f9   : > { %v4584_v53 = vmax.f32 %v4216_v34, 0.0  ;;  %v4220_v26 = vadd.f32 %v4219_v8, %v7470_v42  ;;  %v4221_v54 = vpop.f32.mrb[55].mxu1 }
 0x7fa   : > { %v4585_v48 = vmax.f32 %v4218_v6, 0.0  ;;  %v4222_v20 = vadd.f32 %v4221_v54, %v7472_v25 }
 0x7fb   : > { %4840 = vst [vmem:[%s7484_s26 + $0x5a0] sm:$0xff] %v4584_v53  ;;  %v4586_v40 = vmax.f32 %v4220_v26, 0.0 }
 0x7fc   : > { %4841 = vst [vmem:[%s7484_s26 + $0x5a8] sm:$0xff] %v4585_v48  ;;  %v4587_v16 = vmax.f32 %v4222_v20, 0.0 }
 0x7fd   : > { %4842 = vst [vmem:[%s7484_s26 + $0x5b0] sm:$0xff] %v4586_v40 }
 0x7fe   : > { %4843 = vst [vmem:[%s7484_s26 + $0x5b8] sm:$0xff] %v4587_v16  ;;  %v4225_v23 = vpop.f32.mrb[56].mxu1 }
 0x7ff   : > { %v4226_v51 = vadd.f32 %v4225_v23, %v7470_v42  ;;  %v4227_v28 = vpop.f32.mrb[57].mxu1 }
 0x800   : > { %v4228_v7 = vadd.f32 %v4227_v28, %v7472_v25  ;;  %v4229_v35 = vpop.f32.mrb[58].mxu1 }
 0x801   : > { %v4588_v52 = vmax.f32 %v4226_v51, 0.0  ;;  %v4230_v27 = vadd.f32 %v4229_v35, %v7470_v42  ;;  %v4231_v31 = vpop.f32.mrb[59].mxu1 }
 0x802   : > { %v4589_v32 = vmax.f32 %v4228_v7, 0.0  ;;  %v4232_v47 = vadd.f32 %v4231_v31, %v7472_v25 }
 0x803   : > { %4844 = vst [vmem:[%s7484_s26 + $0x5c0] sm:$0xff] %v4588_v52  ;;  %v4590_v56 = vmax.f32 %v4230_v27, 0.0 }
 0x804   : > { %4845 = vst [vmem:[%s7484_s26 + $0x5c8] sm:$0xff] %v4589_v32  ;;  %v4591_v45 = vmax.f32 %v4232_v47, 0.0 }
 0x805   : > { %4846 = vst [vmem:[%s7484_s26 + $0x5d0] sm:$0xff] %v4590_v56 }
 0x806   : > { %4847 = vst [vmem:[%s7484_s26 + $0x5d8] sm:$0xff] %v4591_v45  ;;  %v4235_v63 = vpop.f32.mrb[60].mxu1 }
 0x807   : > { %v4236_v46 = vadd.f32 %v4235_v63, %v7470_v42  ;;  %v4237_v38 = vpop.f32.mrb[61].mxu1 }
 0x808   : > { %v4238_v58 = vadd.f32 %v4237_v38, %v7472_v25  ;;  %v4239_v49 = vpop.f32.mrb[62].mxu1 }
 0x809   : > { %v4592_v43 = vmax.f32 %v4236_v46, 0.0  ;;  %v4240_v3 = vadd.f32 %v4239_v49, %v7470_v42  ;;  %v4241_v44 = vpop.f32.mrb[63].mxu1 }
 0x80a   : > { %v4593_v29 = vmax.f32 %v4238_v58, 0.0  ;;  %v4242_v41 = vadd.f32 %v4241_v44, %v7472_v25 }
 0x80b   : > { %4848 = vst [vmem:[%s7484_s26 + $0x5e0] sm:$0xff] %v4592_v43  ;;  %v4594_v33 = vmax.f32 %v4240_v3, 0.0 }
 0x80c   : > { %4849 = vst [vmem:[%s7484_s26 + $0x5e8] sm:$0xff] %v4593_v29  ;;  %v4595_v14 = vmax.f32 %v4242_v41, 0.0 }
 0x80d   : > { %4850 = vst [vmem:[%s7484_s26 + $0x5f0] sm:$0xff] %v4594_v33 }
 0x80e   : > { %4851 = vst [vmem:[%s7484_s26 + $0x5f8] sm:$0xff] %v4595_v14  ;;  %v4245_v10 = vpop.f32.mrb[64].mxu1 }
 0x80f   : > { %v4246_v60 = vadd.f32 %v4245_v10, %v7470_v42  ;;  %v4247_v59 = vpop.f32.mrb[65].mxu1 }
 0x810   : > { %v4248_v18 = vadd.f32 %v4247_v59, %v7472_v25  ;;  %v4249_v37 = vpop.f32.mrb[66].mxu1 }
 0x811   : > { %v4596_v21 = vmax.f32 %v4246_v60, 0.0  ;;  %v4250_v24 = vadd.f32 %v4249_v37, %v7470_v42  ;;  %v4251_v30 = vpop.f32.mrb[67].mxu1 }
 0x812   : > { %v4597_v11 = vmax.f32 %v4248_v18, 0.0  ;;  %v4252_v57 = vadd.f32 %v4251_v30, %v7472_v25 }
 0x813   : > { %4852 = vst [vmem:[%s7484_s26 + $0x600] sm:$0xff] %v4596_v21  ;;  %v4598_v22 = vmax.f32 %v4250_v24, 0.0 }
 0x814   : > { %4853 = vst [vmem:[%s7484_s26 + $0x608] sm:$0xff] %v4597_v11  ;;  %v4599_v19 = vmax.f32 %v4252_v57, 0.0 }
 0x815   : > { %4854 = vst [vmem:[%s7484_s26 + $0x610] sm:$0xff] %v4598_v22 }
 0x816   : > { %4855 = vst [vmem:[%s7484_s26 + $0x618] sm:$0xff] %v4599_v19  ;;  %v4255_v2 = vpop.f32.mrb[68].mxu1 }
 0x817   : > { %v4256_v62 = vadd.f32 %v4255_v2, %v7470_v42  ;;  %v4257_v17 = vpop.f32.mrb[69].mxu1 }
 0x818   : > { %v4258_v55 = vadd.f32 %v4257_v17, %v7472_v25  ;;  %v4259_v61 = vpop.f32.mrb[70].mxu1 }
 0x819   : > { %v4600_v13 = vmax.f32 %v4256_v62, 0.0  ;;  %v4260_v0 = vadd.f32 %v4259_v61, %v7470_v42  ;;  %v4261_v4 = vpop.f32.mrb[71].mxu1 }
 0x81a   : > { %v4601_v1 = vmax.f32 %v4258_v55, 0.0  ;;  %v4262_v5 = vadd.f32 %v4261_v4, %v7472_v25 }
 0x81b   : > { %4856 = vst [vmem:[%s7484_s26 + $0x620] sm:$0xff] %v4600_v13  ;;  %v4602_v15 = vmax.f32 %v4260_v0, 0.0 }
 0x81c   : > { %4857 = vst [vmem:[%s7484_s26 + $0x628] sm:$0xff] %v4601_v1  ;;  %v4603_v36 = vmax.f32 %v4262_v5, 0.0 }
 0x81d   : > { %4858 = vst [vmem:[%s7484_s26 + $0x630] sm:$0xff] %v4602_v15 }
 0x81e   : > { %4859 = vst [vmem:[%s7484_s26 + $0x638] sm:$0xff] %v4603_v36  ;;  %v4265_v12 = vpop.f32.mrb[72].mxu1 }
 0x81f   : > { %v4266_v39 = vadd.f32 %v4265_v12, %v7470_v42  ;;  %v4267_v50 = vpop.f32.mrb[73].mxu1 }
 0x820   : > { %v4268_v34 = vadd.f32 %v4267_v50, %v7472_v25  ;;  %v4269_v9 = vpop.f32.mrb[74].mxu1 }
 0x821   : > { %v4604_v6 = vmax.f32 %v4266_v39, 0.0  ;;  %v4270_v8 = vadd.f32 %v4269_v9, %v7470_v42  ;;  %v4271_v53 = vpop.f32.mrb[75].mxu1 }
 0x822   : > { %v4605_v26 = vmax.f32 %v4268_v34, 0.0  ;;  %v4272_v54 = vadd.f32 %v4271_v53, %v7472_v25 }
 0x823   : > { %4860 = vst [vmem:[%s7484_s26 + $0x640] sm:$0xff] %v4604_v6  ;;  %v4606_v48 = vmax.f32 %v4270_v8, 0.0 }
 0x824   : > { %4861 = vst [vmem:[%s7484_s26 + $0x648] sm:$0xff] %v4605_v26  ;;  %v4607_v20 = vmax.f32 %v4272_v54, 0.0 }
 0x825   : > { %4862 = vst [vmem:[%s7484_s26 + $0x650] sm:$0xff] %v4606_v48 }
 0x826   : > { %4863 = vst [vmem:[%s7484_s26 + $0x658] sm:$0xff] %v4607_v20  ;;  %v4275_v40 = vpop.f32.mrb[76].mxu1 }
 0x827   : > { %v4276_v16 = vadd.f32 %v4275_v40, %v7470_v42  ;;  %v4277_v23 = vpop.f32.mrb[77].mxu1 }
 0x828   : > { %v4278_v51 = vadd.f32 %v4277_v23, %v7472_v25  ;;  %v4279_v28 = vpop.f32.mrb[78].mxu1 }
 0x829   : > { %v4608_v7 = vmax.f32 %v4276_v16, 0.0  ;;  %v4280_v35 = vadd.f32 %v4279_v28, %v7470_v42  ;;  %v4281_v52 = vpop.f32.mrb[79].mxu1 }
 0x82a   : > { %v4609_v27 = vmax.f32 %v4278_v51, 0.0  ;;  %v4282_v31 = vadd.f32 %v4281_v52, %v7472_v25 }
 0x82b   : > { %4864 = vst [vmem:[%s7484_s26 + $0x660] sm:$0xff] %v4608_v7  ;;  %v4610_v32 = vmax.f32 %v4280_v35, 0.0 }
 0x82c   : > { %4865 = vst [vmem:[%s7484_s26 + $0x668] sm:$0xff] %v4609_v27  ;;  %v4611_v47 = vmax.f32 %v4282_v31, 0.0 }
 0x82d   : > { %4866 = vst [vmem:[%s7484_s26 + $0x670] sm:$0xff] %v4610_v32 }
 0x82e   : > { %4867 = vst [vmem:[%s7484_s26 + $0x678] sm:$0xff] %v4611_v47  ;;  %v4285_v56 = vpop.f32.mrb[80].mxu1 }
 0x82f   : > { %v4286_v45 = vadd.f32 %v4285_v56, %v7470_v42  ;;  %v4287_v63 = vpop.f32.mrb[81].mxu1 }
 0x830   : > { %v4288_v46 = vadd.f32 %v4287_v63, %v7472_v25  ;;  %v4289_v38 = vpop.f32.mrb[82].mxu1 }
 0x831   : > { %v4612_v58 = vmax.f32 %v4286_v45, 0.0  ;;  %v4290_v49 = vadd.f32 %v4289_v38, %v7470_v42  ;;  %v4291_v43 = vpop.f32.mrb[83].mxu1 }
 0x832   : > { %v4613_v3 = vmax.f32 %v4288_v46, 0.0  ;;  %v4292_v44 = vadd.f32 %v4291_v43, %v7472_v25 }
 0x833   : > { %4868 = vst [vmem:[%s7484_s26 + $0x680] sm:$0xff] %v4612_v58  ;;  %v4614_v29 = vmax.f32 %v4290_v49, 0.0 }
 0x834   : > { %4869 = vst [vmem:[%s7484_s26 + $0x688] sm:$0xff] %v4613_v3  ;;  %v4615_v41 = vmax.f32 %v4292_v44, 0.0 }
 0x835   : > { %4870 = vst [vmem:[%s7484_s26 + $0x690] sm:$0xff] %v4614_v29 }
 0x836   : > { %4871 = vst [vmem:[%s7484_s26 + $0x698] sm:$0xff] %v4615_v41  ;;  %v4295_v33 = vpop.f32.mrb[84].mxu1 }
 0x837   : > { %v4296_v14 = vadd.f32 %v4295_v33, %v7470_v42  ;;  %v4297_v10 = vpop.f32.mrb[85].mxu1 }
 0x838   : > { %v4298_v60 = vadd.f32 %v4297_v10, %v7472_v25  ;;  %v4299_v59 = vpop.f32.mrb[86].mxu1 }
 0x839   : > { %v4616_v18 = vmax.f32 %v4296_v14, 0.0  ;;  %v4300_v37 = vadd.f32 %v4299_v59, %v7470_v42  ;;  %v4301_v21 = vpop.f32.mrb[87].mxu1 }
 0x83a   : > { %v4617_v24 = vmax.f32 %v4298_v60, 0.0  ;;  %v4302_v30 = vadd.f32 %v4301_v21, %v7472_v25 }
 0x83b   : > { %4872 = vst [vmem:[%s7484_s26 + $0x6a0] sm:$0xff] %v4616_v18  ;;  %v4618_v11 = vmax.f32 %v4300_v37, 0.0 }
 0x83c   : > { %4873 = vst [vmem:[%s7484_s26 + $0x6a8] sm:$0xff] %v4617_v24  ;;  %v4619_v57 = vmax.f32 %v4302_v30, 0.0 }
 0x83d   : > { %4874 = vst [vmem:[%s7484_s26 + $0x6b0] sm:$0xff] %v4618_v11 }
 0x83e   : > { %4875 = vst [vmem:[%s7484_s26 + $0x6b8] sm:$0xff] %v4619_v57  ;;  %v4305_v22 = vpop.f32.mrb[88].mxu1 }
 0x83f   : > { %v4306_v19 = vadd.f32 %v4305_v22, %v7470_v42  ;;  %v4307_v2 = vpop.f32.mrb[89].mxu1 }
 0x840   : > { %v4308_v62 = vadd.f32 %v4307_v2, %v7472_v25  ;;  %v4309_v17 = vpop.f32.mrb[90].mxu1 }
 0x841   : > { %v4620_v55 = vmax.f32 %v4306_v19, 0.0  ;;  %v4310_v61 = vadd.f32 %v4309_v17, %v7470_v42  ;;  %v4311_v13 = vpop.f32.mrb[91].mxu1 }
 0x842   : > { %v4621_v0 = vmax.f32 %v4308_v62, 0.0  ;;  %v4312_v4 = vadd.f32 %v4311_v13, %v7472_v25 }
 0x843   : > { %4876 = vst [vmem:[%s7484_s26 + $0x6c0] sm:$0xff] %v4620_v55  ;;  %v4622_v1 = vmax.f32 %v4310_v61, 0.0 }
 0x844   : > { %4877 = vst [vmem:[%s7484_s26 + $0x6c8] sm:$0xff] %v4621_v0  ;;  %v4623_v5 = vmax.f32 %v4312_v4, 0.0 }
 0x845   : > { %4878 = vst [vmem:[%s7484_s26 + $0x6d0] sm:$0xff] %v4622_v1 }
 0x846   : > { %4879 = vst [vmem:[%s7484_s26 + $0x6d8] sm:$0xff] %v4623_v5  ;;  %v4315_v15 = vpop.f32.mrb[92].mxu1 }
 0x847   : > { %v4316_v36 = vadd.f32 %v4315_v15, %v7470_v42  ;;  %v4317_v12 = vpop.f32.mrb[93].mxu1 }
 0x848   : > { %v4318_v39 = vadd.f32 %v4317_v12, %v7472_v25  ;;  %v4319_v50 = vpop.f32.mrb[94].mxu1 }
 0x849   : > { %v4624_v34 = vmax.f32 %v4316_v36, 0.0  ;;  %v4320_v9 = vadd.f32 %v4319_v50, %v7470_v42  ;;  %v4321_v6 = vpop.f32.mrb[95].mxu1 }
 0x84a   : > { %v4625_v8 = vmax.f32 %v4318_v39, 0.0  ;;  %v4322_v53 = vadd.f32 %v4321_v6, %v7472_v25 }
 0x84b   : > { %4880 = vst [vmem:[%s7484_s26 + $0x6e0] sm:$0xff] %v4624_v34  ;;  %v4626_v26 = vmax.f32 %v4320_v9, 0.0 }
 0x84c   : > { %4881 = vst [vmem:[%s7484_s26 + $0x6e8] sm:$0xff] %v4625_v8  ;;  %v4627_v54 = vmax.f32 %v4322_v53, 0.0 }
 0x84d   : > { %4882 = vst [vmem:[%s7484_s26 + $0x6f0] sm:$0xff] %v4626_v26 }
 0x84e   : > { %4883 = vst [vmem:[%s7484_s26 + $0x6f8] sm:$0xff] %v4627_v54  ;;  %v4325_v48 = vpop.f32.mrb[96].mxu1 }
 0x84f   : > { %v4326_v20 = vadd.f32 %v4325_v48, %v7470_v42  ;;  %v4327_v40 = vpop.f32.mrb[97].mxu1 }
 0x850   : > { %v4328_v16 = vadd.f32 %v4327_v40, %v7472_v25  ;;  %v4329_v23 = vpop.f32.mrb[98].mxu1 }
 0x851   : > { %v4628_v51 = vmax.f32 %v4326_v20, 0.0  ;;  %v4330_v28 = vadd.f32 %v4329_v23, %v7470_v42  ;;  %v4331_v7 = vpop.f32.mrb[99].mxu1 }
 0x852   : > { %v4629_v35 = vmax.f32 %v4328_v16, 0.0  ;;  %v4332_v52 = vadd.f32 %v4331_v7, %v7472_v25 }
 0x853   : > { %4884 = vst [vmem:[%s7484_s26 + $0x700] sm:$0xff] %v4628_v51  ;;  %v4630_v27 = vmax.f32 %v4330_v28, 0.0 }
 0x854   : > { %4885 = vst [vmem:[%s7484_s26 + $0x708] sm:$0xff] %v4629_v35  ;;  %v4631_v31 = vmax.f32 %v4332_v52, 0.0 }
 0x855   : > { %4886 = vst [vmem:[%s7484_s26 + $0x710] sm:$0xff] %v4630_v27 }
 0x856   : > { %4887 = vst [vmem:[%s7484_s26 + $0x718] sm:$0xff] %v4631_v31  ;;  %v4335_v32 = vpop.f32.mrb[100].mxu1 }
 0x857   : > { %v4336_v47 = vadd.f32 %v4335_v32, %v7470_v42  ;;  %v4337_v56 = vpop.f32.mrb[101].mxu1 }
 0x858   : > { %v4338_v45 = vadd.f32 %v4337_v56, %v7472_v25  ;;  %v4339_v63 = vpop.f32.mrb[102].mxu1 }
 0x859   : > { %v4632_v46 = vmax.f32 %v4336_v47, 0.0  ;;  %v4340_v38 = vadd.f32 %v4339_v63, %v7470_v42  ;;  %v4341_v58 = vpop.f32.mrb[103].mxu1 }
 0x85a   : > { %v4633_v49 = vmax.f32 %v4338_v45, 0.0  ;;  %v4342_v43 = vadd.f32 %v4341_v58, %v7472_v25 }
 0x85b   : > { %4888 = vst [vmem:[%s7484_s26 + $0x720] sm:$0xff] %v4632_v46  ;;  %v4634_v3 = vmax.f32 %v4340_v38, 0.0 }
 0x85c   : > { %4889 = vst [vmem:[%s7484_s26 + $0x728] sm:$0xff] %v4633_v49  ;;  %v4635_v44 = vmax.f32 %v4342_v43, 0.0 }
 0x85d   : > { %4890 = vst [vmem:[%s7484_s26 + $0x730] sm:$0xff] %v4634_v3 }
 0x85e   : > { %4891 = vst [vmem:[%s7484_s26 + $0x738] sm:$0xff] %v4635_v44  ;;  %v4345_v29 = vpop.f32.mrb[104].mxu1 }
 0x85f   : > { %v4346_v41 = vadd.f32 %v4345_v29, %v7470_v42  ;;  %v4347_v33 = vpop.f32.mrb[105].mxu1 }
 0x860   : > { %v4348_v14 = vadd.f32 %v4347_v33, %v7472_v25  ;;  %v4349_v10 = vpop.f32.mrb[106].mxu1 }
 0x861   : > { %v4636_v60 = vmax.f32 %v4346_v41, 0.0  ;;  %v4350_v59 = vadd.f32 %v4349_v10, %v7470_v42  ;;  %v4351_v18 = vpop.f32.mrb[107].mxu1 }
 0x862   : > { %v4637_v37 = vmax.f32 %v4348_v14, 0.0  ;;  %v4352_v21 = vadd.f32 %v4351_v18, %v7472_v25 }
 0x863   : > { %4892 = vst [vmem:[%s7484_s26 + $0x740] sm:$0xff] %v4636_v60  ;;  %v4638_v24 = vmax.f32 %v4350_v59, 0.0 }
 0x864   : > { %4893 = vst [vmem:[%s7484_s26 + $0x748] sm:$0xff] %v4637_v37  ;;  %v4639_v30 = vmax.f32 %v4352_v21, 0.0 }
 0x865   : > { %4894 = vst [vmem:[%s7484_s26 + $0x750] sm:$0xff] %v4638_v24 }
 0x866   : > { %4895 = vst [vmem:[%s7484_s26 + $0x758] sm:$0xff] %v4639_v30  ;;  %v4355_v11 = vpop.f32.mrb[108].mxu1 }
 0x867   : > { %v4356_v57 = vadd.f32 %v4355_v11, %v7470_v42  ;;  %v4357_v22 = vpop.f32.mrb[109].mxu1 }
 0x868   : > { %v4358_v19 = vadd.f32 %v4357_v22, %v7472_v25  ;;  %v4359_v2 = vpop.f32.mrb[110].mxu1 }
 0x869   : > { %v4640_v62 = vmax.f32 %v4356_v57, 0.0  ;;  %v4360_v17 = vadd.f32 %v4359_v2, %v7470_v42  ;;  %v4361_v55 = vpop.f32.mrb[111].mxu1 }
 0x86a   : > { %v4641_v61 = vmax.f32 %v4358_v19, 0.0  ;;  %v4362_v13 = vadd.f32 %v4361_v55, %v7472_v25 }
 0x86b   : > { %4896 = vst [vmem:[%s7484_s26 + $0x760] sm:$0xff] %v4640_v62  ;;  %v4642_v0 = vmax.f32 %v4360_v17, 0.0 }
 0x86c   : > { %4897 = vst [vmem:[%s7484_s26 + $0x768] sm:$0xff] %v4641_v61  ;;  %v4643_v4 = vmax.f32 %v4362_v13, 0.0 }
 0x86d   : > { %4898 = vst [vmem:[%s7484_s26 + $0x770] sm:$0xff] %v4642_v0 }
 0x86e   : > { %4899 = vst [vmem:[%s7484_s26 + $0x778] sm:$0xff] %v4643_v4  ;;  %v4365_v1 = vpop.f32.mrb[112].mxu1 }
 0x86f   : > { %v4366_v5 = vadd.f32 %v4365_v1, %v7470_v42  ;;  %v4367_v15 = vpop.f32.mrb[113].mxu1 }
 0x870   : > { %v4368_v36 = vadd.f32 %v4367_v15, %v7472_v25  ;;  %v4369_v12 = vpop.f32.mrb[114].mxu1 }
 0x871   : > { %v4644_v39 = vmax.f32 %v4366_v5, 0.0  ;;  %v4370_v50 = vadd.f32 %v4369_v12, %v7470_v42  ;;  %v4371_v34 = vpop.f32.mrb[115].mxu1 }
 0x872   : > { %v4645_v9 = vmax.f32 %v4368_v36, 0.0  ;;  %v4372_v6 = vadd.f32 %v4371_v34, %v7472_v25 }
 0x873   : > { %4900 = vst [vmem:[%s7484_s26 + $0x780] sm:$0xff] %v4644_v39  ;;  %v4646_v8 = vmax.f32 %v4370_v50, 0.0 }
 0x874   : > { %4901 = vst [vmem:[%s7484_s26 + $0x788] sm:$0xff] %v4645_v9  ;;  %v4647_v53 = vmax.f32 %v4372_v6, 0.0 }
 0x875   : > { %4902 = vst [vmem:[%s7484_s26 + $0x790] sm:$0xff] %v4646_v8 }
 0x876   : > { %4903 = vst [vmem:[%s7484_s26 + $0x798] sm:$0xff] %v4647_v53  ;;  %v4375_v26 = vpop.f32.mrb[116].mxu1 }
 0x877   : > { %v4376_v54 = vadd.f32 %v4375_v26, %v7470_v42  ;;  %v4377_v48 = vpop.f32.mrb[117].mxu1 }
 0x878   : > { %v4378_v20 = vadd.f32 %v4377_v48, %v7472_v25  ;;  %v4379_v40 = vpop.f32.mrb[118].mxu1 }
 0x879   : > { %v4648_v16 = vmax.f32 %v4376_v54, 0.0  ;;  %v4380_v23 = vadd.f32 %v4379_v40, %v7470_v42  ;;  %v4381_v51 = vpop.f32.mrb[119].mxu1 }
 0x87a   : > { %v4649_v28 = vmax.f32 %v4378_v20, 0.0  ;;  %v4382_v7 = vadd.f32 %v4381_v51, %v7472_v25 }
 0x87b   : > { %4904 = vst [vmem:[%s7484_s26 + $0x7a0] sm:$0xff] %v4648_v16  ;;  %v4650_v35 = vmax.f32 %v4380_v23, 0.0 }
 0x87c   : > { %4905 = vst [vmem:[%s7484_s26 + $0x7a8] sm:$0xff] %v4649_v28  ;;  %v4651_v52 = vmax.f32 %v4382_v7, 0.0 }
 0x87d   : > { %4906 = vst [vmem:[%s7484_s26 + $0x7b0] sm:$0xff] %v4650_v35 }
 0x87e   : > { %4907 = vst [vmem:[%s7484_s26 + $0x7b8] sm:$0xff] %v4651_v52  ;;  %v4385_v27 = vpop.f32.mrb[120].mxu1 }
 0x87f   : > { %v4386_v31 = vadd.f32 %v4385_v27, %v7470_v42  ;;  %v4387_v32 = vpop.f32.mrb[121].mxu1 }
 0x880   : > { %v4388_v47 = vadd.f32 %v4387_v32, %v7472_v25  ;;  %v4389_v56 = vpop.f32.mrb[122].mxu1 }
 0x881   : > { %v4652_v45 = vmax.f32 %v4386_v31, 0.0  ;;  %v4390_v63 = vadd.f32 %v4389_v56, %v7470_v42  ;;  %v4391_v46 = vpop.f32.mrb[123].mxu1 }
 0x882   : > { %v4653_v38 = vmax.f32 %v4388_v47, 0.0  ;;  %v4392_v58 = vadd.f32 %v4391_v46, %v7472_v25 }
 0x883   : > { %4908 = vst [vmem:[%s7484_s26 + $0x7c0] sm:$0xff] %v4652_v45  ;;  %v4654_v49 = vmax.f32 %v4390_v63, 0.0 }
 0x884   : > { %4909 = vst [vmem:[%s7484_s26 + $0x7c8] sm:$0xff] %v4653_v38  ;;  %v4655_v43 = vmax.f32 %v4392_v58, 0.0 }
 0x885   : > { %4910 = vst [vmem:[%s7484_s26 + $0x7d0] sm:$0xff] %v4654_v49 }
 0x886   : > { %4911 = vst [vmem:[%s7484_s26 + $0x7d8] sm:$0xff] %v4655_v43  ;;  %v4395_v3 = vpop.f32.mrb[124].mxu1 }
 0x887   : > { %v4396_v44 = vadd.f32 %v4395_v3, %v7470_v42  ;;  %v4397_v29 = vpop.f32.mrb[125].mxu1 }
 0x888   : > { %v4398_v41 = vadd.f32 %v4397_v29, %v7472_v25  ;;  %v4399_v33 = vpop.f32.mrb[126].mxu1 }
 0x889   : > { %v4656_v14 = vmax.f32 %v4396_v44, 0.0  ;;  %v4400_v10 = vadd.f32 %v4399_v33, %v7470_v42  ;;  %v4401_v60 = vpop.f32.mrb[127].mxu1 }
 0x88a   : > { %v4657_v59 = vmax.f32 %v4398_v41, 0.0  ;;  %v4402_v18 = vadd.f32 %v4401_v60, %v7472_v25 }
 0x88b   : > { %4912 = vst [vmem:[%s7484_s26 + $0x7e0] sm:$0xff] %v4656_v14  ;;  %v4658_v37 = vmax.f32 %v4400_v10, 0.0 }
 0x88c   : > { %4913 = vst [vmem:[%s7484_s26 + $0x7e8] sm:$0xff] %v4657_v59  ;;  %v4659_v21 = vmax.f32 %v4402_v18, 0.0 }
 0x88d   : > { %4914 = vst [vmem:[%s7484_s26 + $0x7f0] sm:$0xff] %v4658_v37 }
 0x88e   : > { %4915 = vst [vmem:[%s7484_s26 + $0x7f8] sm:$0xff] %v4659_v21 }
 0x88f   : > { %6508 = shalt.err (!%p6505_p10)
}
 0x890   : > { %s6509_s20 = scalar_lea.hbm %s8069_s18, 32768  ;;  %s6513_s10 = scalar_lea.hbm %s8126_s8, 65536 }
 0x891   : > { %p6510_p11 = scmp.ne.s32.totalorder %s8069_s18, %s6509_s20  ;;  %p6514_p9 = scmp.lt.u32.totalorder %s8069_s18, %s8126_s8 }
 0x892   : > { %p6515_p7 = scmp.lt.u32.totalorder %s6513_s10, %s6509_s20  ;;  %p6517_p12 = scmp.lt.u32.totalorder %s6509_s20, %s8069_s18 }
 0x893   : > { %p6511_p3 = pnand %p6510_p11, %p8151_p1 }
 0x894   : > { %p6516_p4 = por %p6515_p7, %p6514_p9 }
 0x895   : > { %p6512_p5 = pneg %p6511_p3 }
 0x896   : > { %p6518_p13 = por %p6517_p12, %p6516_p4 }
 0x898   : > { %p6519_p0 = pnand %p6518_p13, %p6512_p5 }
 0x89a   : > { %6522 = shalt.err (!%p6519_p0)
}
 0x89b   : > { %s6595_s9 = smov 256   ;;  %s6596_s21 = smov 16  }
 0x89c   : > { %5820 = dma.vmem_to_hbm [thread:$0]  (%p8151_p1), %s8071_s25, 32768, %s8069_s18, %s4917_s11, %s6595_s9, %s6595_s9, %s6596_s21  }
 0x89d PF: > { %s4945_s14 = sand.u32 1, %s6565_s27   ;;  %p8152_p2 = scmp.ne.s32.totalorder %s8140_s16, 0 }
 0x89e   : > { %p8153_p8 = scmp.ge.s32.totalorder %s6577_s30, 2  ;;  %s4946_s17 = scalar_lea.sflag [#allocation4], %s4945_s14 }
 0x8a0   : > { %p5849_p6 = pnand %p8153_p8, %p8152_p2 }
 0x8a2   : > { %6560 = dma.done.wait (!%p5849_p6), %s4946_s17, 32768  }
 0x8a3   : > { %6562 = vsyncadd (!%p5849_p6), %s4946_s17, 4294934528  ;;  %p25_p10 = scmp.ge.s32.totalorder %s6851_s15, 4   ;;  %s8154_s27 = smov %s6569_s28 }
 0x8a4   : > { %s8155_s28 = smov %s6573_s29  ;;  %s8156_s29 = smov %s6863_s13 }
 0x8a5   : > { %s8157_s30 = smov %s6851_s15  ;;  %27 = sbr.rel (!%p25_p10) target bundleno = 9 (0x9), region = 125 }
 0x8ac   :  { %4951 = vsyncpa [#allocation3], 1 }
 0x8ad   :  { %4953 = vsyncpa [#allocation3 + $0x1], 1 }
 0x8ae   :  { %4954 = vsyncpa [#allocation6], 1 }
 0x8af   :  { %4955 = vsyncpa [#allocation9], 1 }
 0x8b0   :  { %4956 = vsyncpa [#allocation12], 1 }
 0x8b1   :  { %4957 = vsyncpa [#allocation15], 1 }
 0x8b2   :  { %4958 = vsyncpa [#allocation4], 1 }
 0x8b3   :  { %4960 = vsyncpa [#allocation4 + $0x1], 1 }

</bundles_post_ra>
